<compile_context>
chip_gen: v7x
topology: tpu7x:2x2x1
jax: 0.10.0
libtpu: 0.0.40
codegen_flags: <defaults>
</compile_context>

<pallas_src>
import functools

import jax
import jax.numpy as jnp
from jax.experimental import pallas as pl
from jax.experimental.pallas import tpu as pltpu

EPS = 1e-5              # PyTorch BatchNorm2d default
LANE = 128              # TPU lane width
SUBLANE = 8             # TPU sublane width (f32)
_VMEM_LIMIT = 40 * 1024 * 1024   # fits v7x's 64 MiB VMEM with headroom


def _round_up(v, m):
    return (v + m - 1) // m * m


def _pick_row_tile(h, w, max_rows=2048):
    """Output rows per grid step: multiple of 8, ~<= max_rows flattened rows."""
    th = max(SUBLANE, (max_rows // max(w, 1)) // SUBLANE * SUBLANE)
    return min(th, _round_up(h, SUBLANE))


def _conv_relu_tile(xa_ref, xb_ref, w_ref, b_ref):
    """relu(conv3x3(x) + b) for one (TH, W) row tile, f32.

    xa_ref: (1, TH, W+2, CIN_PAD) bf16  padded-input rows [j*TH, j*TH+TH)
    xb_ref: (1, 2,  W+2, CIN_PAD) bf16  padded-input rows [j*TH+TH, j*TH+TH+2)
    w_ref:  (9, CIN_PAD, COUT_PAD) bf16 per-tap weight matrices
    b_ref:  (1, COUT_PAD) f32           conv bias
    returns (TH*W, COUT_PAD) f32
    """
    th, wp2, cin_pad = xa_ref.shape[1], xa_ref.shape[2], xa_ref.shape[3]
    cout_pad = w_ref.shape[2]
    out_w = wp2 - 2

    # Full (TH+2)-row halo window, assembled in VMEM.
    win = jnp.concatenate([xa_ref[0], xb_ref[0]], axis=0)   # (TH+2, W+2, Cin)

    # 3x3 conv = 9 (TH*W, Cin) x (Cin, Cout) MXU matmuls, f32 accumulation.
    # (Fusing taps into fewer/larger-K matmuls is a modest win only; the op
    # is memory-bound at these channel counts.)
    acc = jnp.zeros((th * out_w, cout_pad), jnp.float32)
    for ky in range(3):
        rows = win[ky:ky + th]                               # (TH, W+2, Cin)
        for kx in range(3):
            lhs = rows[:, kx:kx + out_w, :].reshape(th * out_w, cin_pad)
            acc = acc + jnp.dot(lhs, w_ref[ky * 3 + kx],
                                preferred_element_type=jnp.float32)
    return jnp.maximum(acc + b_ref[...], 0.0)


def _conv_stats_kernel(xa_ref, xb_ref, w_ref, b_ref, sum_ref, sq_ref, *, h):
    """Pass 1: per-image BN partial sums, accumulated across row tiles."""
    j = pl.program_id(1)
    th = xa_ref.shape[1]
    out_w = xa_ref.shape[2] - 2

    y = _conv_relu_tile(xa_ref, xb_ref, w_ref, b_ref)        # (TH*W, COUT) f32

    if h % th:   # only the last row tile can overhang the true image height
        row = jax.lax.broadcasted_iota(jnp.int32, (th, out_w), 0) + j * th
        valid = (row < h).reshape(th * out_w, 1).astype(jnp.float32)
        yv = y * valid
    else:
        yv = y

    @pl.when(j == 0)
    def _():
        sum_ref[...] = jnp.zeros_like(sum_ref)
        sq_ref[...] = jnp.zeros_like(sq_ref)

    sum_ref[...] += jnp.sum(yv, axis=0, keepdims=True).reshape(sum_ref.shape)
    sq_ref[...] += jnp.sum(yv * y, axis=0, keepdims=True).reshape(sq_ref.shape)


def _conv_bn_kernel(xa_ref, xb_ref, w_ref, b_ref, scale_ref, shift_ref, o_ref):
    """Pass 2: recompute conv+ReLU, apply folded BN, write final output."""
    c_out = o_ref.shape[1]
    y = _conv_relu_tile(xa_ref, xb_ref, w_ref, b_ref)        # (TH*W, COUT_PAD)
    y = y * scale_ref[...] + shift_ref[...]                  # folded BatchNorm
    o_ref[...] = y[:, :c_out]                                # real channels only


@functools.partial(jax.jit, static_argnames=("kernel_size",))
def conv_relu_bn(x, weight, bias, gamma, beta, kernel_size=3):
    """x: (N, Cin, H, W) NCHW.  Returns (N, Cout, H, W) NCHW float32."""
    if kernel_size != 3:
        raise ValueError("only kernel_size=3 / padding=1 is supported")
    n, c_in, h, w = x.shape
    c_out = weight.shape[0]
    cin_pad = _round_up(max(c_in, SUBLANE), SUBLANE)
    cout_pad = _round_up(c_out, LANE)

    th = _pick_row_tile(h, w)
    n_tiles = (h + th - 1) // th
    h_pad = n_tiles * th                  # rows actually computed
    h_in = h_pad + SUBLANE                # padded-input rows (halo + slack)

    # Layout prep (XLA, one cheap pass over the small input): NCHW -> NHWC,
    # 1-px halo + alignment padding, bf16 for the MXU.  The NCHW<->NHWC
    # transposes exist only because the public interface is PyTorch NCHW.
    x_nhwc = jnp.transpose(x, (0, 2, 3, 1)).astype(jnp.bfloat16)
    x_pad = jnp.pad(x_nhwc, ((0, 0), (1, h_in - h - 1), (1, 1),
                             (0, cin_pad - c_in)))

    w_taps = jnp.transpose(weight, (2, 3, 1, 0)).astype(jnp.bfloat16)
    w_taps = jnp.pad(w_taps, ((0, 0), (0, 0), (0, cin_pad - c_in),
                              (0, cout_pad - c_out)))
    w_taps = w_taps.reshape(9, cin_pad, cout_pad)
    b_row = jnp.pad(bias.astype(jnp.float32),
                    (0, cout_pad - c_out)).reshape(1, cout_pad)

    # Main TH-row window + 2-row bottom halo of the SAME padded input.
    xa_spec = pl.BlockSpec((1, th, w + 2, cin_pad),
                           lambda i, j: (i, j, 0, 0))
    xb_spec = pl.BlockSpec((1, 2, w + 2, cin_pad),
                           lambda i, j: (i, (j + 1) * (th // 2), 0, 0))
    w_spec = pl.BlockSpec((9, cin_pad, cout_pad), lambda i, j: (0, 0, 0))
    vec_spec = pl.BlockSpec((1, cout_pad), lambda i, j: (0, 0))

    # ---- pass 1: BN partial sums only (no conv intermediate in HBM) --------
    stat_spec = pl.BlockSpec((1, 1, cout_pad), lambda i, j: (i, 0, 0))
    sums, sqs = pl.pallas_call(
        functools.partial(_conv_stats_kernel, h=h),
        grid=(n, n_tiles),
        in_specs=[xa_spec, xb_spec, w_spec, vec_spec],
        out_specs=[stat_spec, stat_spec],
        out_shape=[jax.ShapeDtypeStruct((n, 1, cout_pad), jnp.float32)] * 2,
        compiler_params=pltpu.CompilerParams(
            # TODO(synk): when N == 1 the only parallel axis has a single
            # block, so one v7x TensorCore idles in this pass; splitting H
            # into two parallel halves with separate partials would fix it.
            dimension_semantics=("parallel", "arbitrary"),
            vmem_limit_bytes=_VMEM_LIMIT),
    )(x_pad, x_pad, w_taps, b_row)

    # ---- fold stats into per-channel scale/shift (tiny, XLA) ---------------
    count = float(n * h * w)
    mean = jnp.sum(sums, axis=(0, 1)) / count
    ex2 = jnp.sum(sqs, axis=(0, 1)) / count
    # NOTE: E[y^2]-mean^2 with f32 partials can cancel for huge N*H*W.
    var = jnp.maximum(ex2 - mean * mean, 0.0)                 # biased variance
    inv_std = jax.lax.rsqrt(var + EPS)
    gamma_pad = jnp.pad(gamma.astype(jnp.float32), (0, cout_pad - c_out))
    beta_pad = jnp.pad(beta.astype(jnp.float32), (0, cout_pad - c_out))
    scale = (gamma_pad * inv_std).reshape(1, cout_pad)
    shift = (beta_pad - mean * gamma_pad * inv_std).reshape(1, cout_pad)

    # ---- pass 2: recompute conv+ReLU, apply folded BN, write output once ---
    out_flat = pl.pallas_call(
        _conv_bn_kernel,
        grid=(n, n_tiles),
        in_specs=[xa_spec, xb_spec, w_spec, vec_spec, vec_spec, vec_spec],
        out_specs=pl.BlockSpec((th * w, c_out),
                               lambda i, j: (i * n_tiles + j, 0)),
        out_shape=jax.ShapeDtypeStruct((n * h_pad * w, c_out), jnp.float32),
        compiler_params=pltpu.CompilerParams(
            dimension_semantics=("parallel", "parallel"),
            vmem_limit_bytes=_VMEM_LIMIT),
    )(x_pad, x_pad, w_taps, b_row, scale, shift)

    out = out_flat.reshape(n, h_pad, w, c_out)                # free reshape
    if h_pad != h:
        out = out[:, :h]                                      # only when tiled past H
    # Back to NCHW only because the PyTorch interface demands it; an NHWC
    # consumer would return `out` directly.
    return jnp.transpose(out, (0, 3, 1, 2))


def _reference(x, weight, bias, gamma, beta):
    """Pure-JAX reference matching PyTorch Conv2d+ReLU+BatchNorm2d(train).

    Conv inputs are rounded to bf16 to mirror the kernel's MXU input precision
    (the kernel accumulates in f32), keeping the comparison tolerance tight.
    """
    xq = x.astype(jnp.bfloat16).astype(jnp.float32)
    wq = weight.astype(jnp.bfloat16).astype(jnp.float32)
    y = jax.lax.conv_general_dilated(
        xq, wq, window_strides=(1, 1), padding=((1, 1), (1, 1)),
        dimension_numbers=("NCHW", "OIHW", "NCHW"),
        precision=jax.lax.Precision.HIGHEST)
    y = y + bias.reshape(1, -1, 1, 1)
    y = jnp.maximum(y, 0.0)
    mean = jnp.mean(y, axis=(0, 2, 3), keepdims=True)
    var = jnp.mean((y - mean) ** 2, axis=(0, 2, 3), keepdims=True)
    y = (y - mean) / jnp.sqrt(var + EPS)
    return gamma.reshape(1, -1, 1, 1) * y + beta.reshape(1, -1, 1, 1)


if __name__ == "__main__":
    key = jax.random.PRNGKey(0)
    kx_, kw_, kb_ = jax.random.split(key, 3)

    N, C_IN, C_OUT, H, W, K = 2, 4, 8, 16, 16, 3

    x = jax.random.normal(kx_, (N, C_IN, H, W), dtype=jnp.float32)

    # Deterministic parameter init (shapes from nn.Conv2d / nn.BatchNorm2d).
    fan_in = C_IN * K * K
    bound = 1.0 / (fan_in ** 0.5)
    weight = jax.random.uniform(kw_, (C_OUT, C_IN, K, K), jnp.float32,
                                -bound, bound)
    bias = jax.random.uniform(kb_, (C_OUT,), jnp.float32, -bound, bound)
    gamma = jnp.ones((C_OUT,), jnp.float32)    # BatchNorm2d weight init
    beta = jnp.zeros((C_OUT,), jnp.float32)    # BatchNorm2d bias init

    out = conv_relu_bn(x, weight, bias, gamma, beta, kernel_size=K)
    out = jax.block_until_ready(out)

    ref = _reference(x, weight, bias, gamma, beta)
    assert out.shape == (N, C_OUT, H, W)
    max_diff = float(jnp.max(jnp.abs(out - ref)))
    assert jnp.allclose(out, ref, atol=1e-3, rtol=1e-3), (
        "mismatch vs reference, max abs diff = %g" % max_diff)

    print("KERNEL_OK")
</pallas_src>

<mosaic_0001>
module attributes {stable_mosaic.version = 11 : i64} {
  func.func @_conv_stats_kernel(%arg0: i32, %arg1: i32, %arg2: memref<1x16x18x8xbf16, #tpu.memory_space<vmem>>, %arg3: memref<1x2x18x8xbf16, #tpu.memory_space<vmem>>, %arg4: memref<9x8x128xbf16, #tpu.memory_space<vmem>>, %arg5: memref<1x128xf32, #tpu.memory_space<vmem>>, %arg6: memref<1x1x128xf32, #tpu.memory_space<vmem>>, %arg7: memref<1x1x128xf32, #tpu.memory_space<vmem>>) attributes {dimension_semantics = [#tpu.dimension_semantics<parallel>, #tpu.dimension_semantics<arbitrary>], iteration_bounds = array<i64: 2, 1>, scalar_prefetch = 0 : i64, scratch_operands = 0 : i64, tpu.core_type = #tpu.core_type<tc>, window_params = [{transform_indices = @transform_0, window_bounds = array<i64: 1, 16, 18, 8>}, {transform_indices = @transform_1, window_bounds = array<i64: 1, 2, 18, 8>}, {pipeline_mode = #tpu.pipeline_mode<synchronous>, transform_indices = @transform_2, window_bounds = array<i64: 9, 8, 128>}, {pipeline_mode = #tpu.pipeline_mode<synchronous>, transform_indices = @transform_3, window_bounds = array<i64: 1, 128>}, {transform_indices = @transform_4, window_bounds = array<i64: 1, 1, 128>}, {transform_indices = @transform_5, window_bounds = array<i64: 1, 1, 128>}]} {
    %c0 = arith.constant 0 : index
    %c0_0 = arith.constant 0 : index
    %c0_1 = arith.constant 0 : index
    %c0_2 = arith.constant 0 : index
    %0 = vector.load %arg2[%c0, %c0_0, %c0_1, %c0_2] : memref<1x16x18x8xbf16, #tpu.memory_space<vmem>>, vector<1x16x18x8xbf16>
    %1 = vector.shape_cast %0 : vector<1x16x18x8xbf16> to vector<16x18x8xbf16>
    %c0_3 = arith.constant 0 : index
    %c0_4 = arith.constant 0 : index
    %c0_5 = arith.constant 0 : index
    %c0_6 = arith.constant 0 : index
    %2 = vector.load %arg3[%c0_3, %c0_4, %c0_5, %c0_6] : memref<1x2x18x8xbf16, #tpu.memory_space<vmem>>, vector<1x2x18x8xbf16>
    %3 = vector.shape_cast %2 : vector<1x2x18x8xbf16> to vector<2x18x8xbf16>
    %4 = tpu.concatenate %1, %3 in 0 : vector<16x18x8xbf16>, vector<2x18x8xbf16> -> vector<18x18x8xbf16>
    %cst = arith.constant 0.000000e+00 : f32
    %5 = vector.broadcast %cst : f32 to vector<256x128xf32>
    %6 = vector.extract_strided_slice %4 {offsets = [0, 0, 0], sizes = [16, 18, 8], strides = [1, 1, 1]} : vector<18x18x8xbf16> to vector<16x18x8xbf16>
    %7 = vector.extract_strided_slice %6 {offsets = [0, 0, 0], sizes = [16, 16, 8], strides = [1, 1, 1]} : vector<16x18x8xbf16> to vector<16x16x8xbf16>
    %8 = vector.shape_cast %7 : vector<16x16x8xbf16> to vector<256x8xbf16>
    %c0_7 = arith.constant 0 : index
    %c0_8 = arith.constant 0 : index
    %c0_9 = arith.constant 0 : index
    %9 = vector.load %arg4[%c0_7, %c0_8, %c0_9] : memref<9x8x128xbf16, #tpu.memory_space<vmem>>, vector<1x8x128xbf16>
    %10 = vector.shape_cast %9 : vector<1x8x128xbf16> to vector<8x128xbf16>
    %cst_10 = arith.constant dense<0.000000e+00> : vector<256x128xf32>
    %11 = tpu.matmul %8, %10, %cst_10 {dimension_numbers = #tpu.dot_dimension_numbers<[1], [0], [0], [1], [0, 0, 1, 1], [], []>} : vector<256x8xbf16>, vector<8x128xbf16>, vector<256x128xf32> -> vector<256x128xf32>
    %12 = arith.addf %5, %11 : vector<256x128xf32>
    %13 = vector.extract_strided_slice %6 {offsets = [0, 1, 0], sizes = [16, 16, 8], strides = [1, 1, 1]} : vector<16x18x8xbf16> to vector<16x16x8xbf16>
    %14 = vector.shape_cast %13 : vector<16x16x8xbf16> to vector<256x8xbf16>
    %c1 = arith.constant 1 : index
    %c0_11 = arith.constant 0 : index
    %c0_12 = arith.constant 0 : index
    %15 = vector.load %arg4[%c1, %c0_11, %c0_12] : memref<9x8x128xbf16, #tpu.memory_space<vmem>>, vector<1x8x128xbf16>
    %16 = vector.shape_cast %15 : vector<1x8x128xbf16> to vector<8x128xbf16>
    %cst_13 = arith.constant dense<0.000000e+00> : vector<256x128xf32>
    %17 = tpu.matmul %14, %16, %cst_13 {dimension_numbers = #tpu.dot_dimension_numbers<[1], [0], [0], [1], [0, 0, 1, 1], [], []>} : vector<256x8xbf16>, vector<8x128xbf16>, vector<256x128xf32> -> vector<256x128xf32>
    %18 = arith.addf %12, %17 : vector<256x128xf32>
    %19 = vector.extract_strided_slice %6 {offsets = [0, 2, 0], sizes = [16, 16, 8], strides = [1, 1, 1]} : vector<16x18x8xbf16> to vector<16x16x8xbf16>
    %20 = vector.shape_cast %19 : vector<16x16x8xbf16> to vector<256x8xbf16>
    %c2 = arith.constant 2 : index
    %c0_14 = arith.constant 0 : index
    %c0_15 = arith.constant 0 : index
    %21 = vector.load %arg4[%c2, %c0_14, %c0_15] : memref<9x8x128xbf16, #tpu.memory_space<vmem>>, vector<1x8x128xbf16>
    %22 = vector.shape_cast %21 : vector<1x8x128xbf16> to vector<8x128xbf16>
    %cst_16 = arith.constant dense<0.000000e+00> : vector<256x128xf32>
    %23 = tpu.matmul %20, %22, %cst_16 {dimension_numbers = #tpu.dot_dimension_numbers<[1], [0], [0], [1], [0, 0, 1, 1], [], []>} : vector<256x8xbf16>, vector<8x128xbf16>, vector<256x128xf32> -> vector<256x128xf32>
    %24 = arith.addf %18, %23 : vector<256x128xf32>
    %25 = vector.extract_strided_slice %4 {offsets = [1, 0, 0], sizes = [16, 18, 8], strides = [1, 1, 1]} : vector<18x18x8xbf16> to vector<16x18x8xbf16>
    %26 = vector.extract_strided_slice %25 {offsets = [0, 0, 0], sizes = [16, 16, 8], strides = [1, 1, 1]} : vector<16x18x8xbf16> to vector<16x16x8xbf16>
    %27 = vector.shape_cast %26 : vector<16x16x8xbf16> to vector<256x8xbf16>
    %c3 = arith.constant 3 : index
    %c0_17 = arith.constant 0 : index
    %c0_18 = arith.constant 0 : index
    %28 = vector.load %arg4[%c3, %c0_17, %c0_18] : memref<9x8x128xbf16, #tpu.memory_space<vmem>>, vector<1x8x128xbf16>
    %29 = vector.shape_cast %28 : vector<1x8x128xbf16> to vector<8x128xbf16>
    %cst_19 = arith.constant dense<0.000000e+00> : vector<256x128xf32>
    %30 = tpu.matmul %27, %29, %cst_19 {dimension_numbers = #tpu.dot_dimension_numbers<[1], [0], [0], [1], [0, 0, 1, 1], [], []>} : vector<256x8xbf16>, vector<8x128xbf16>, vector<256x128xf32> -> vector<256x128xf32>
    %31 = arith.addf %24, %30 : vector<256x128xf32>
    %32 = vector.extract_strided_slice %25 {offsets = [0, 1, 0], sizes = [16, 16, 8], strides = [1, 1, 1]} : vector<16x18x8xbf16> to vector<16x16x8xbf16>
    %33 = vector.shape_cast %32 : vector<16x16x8xbf16> to vector<256x8xbf16>
    %c4 = arith.constant 4 : index
    %c0_20 = arith.constant 0 : index
    %c0_21 = arith.constant 0 : index
    %34 = vector.load %arg4[%c4, %c0_20, %c0_21] : memref<9x8x128xbf16, #tpu.memory_space<vmem>>, vector<1x8x128xbf16>
    %35 = vector.shape_cast %34 : vector<1x8x128xbf16> to vector<8x128xbf16>
    %cst_22 = arith.constant dense<0.000000e+00> : vector<256x128xf32>
    %36 = tpu.matmul %33, %35, %cst_22 {dimension_numbers = #tpu.dot_dimension_numbers<[1], [0], [0], [1], [0, 0, 1, 1], [], []>} : vector<256x8xbf16>, vector<8x128xbf16>, vector<256x128xf32> -> vector<256x128xf32>
    %37 = arith.addf %31, %36 : vector<256x128xf32>
    %38 = vector.extract_strided_slice %25 {offsets = [0, 2, 0], sizes = [16, 16, 8], strides = [1, 1, 1]} : vector<16x18x8xbf16> to vector<16x16x8xbf16>
    %39 = vector.shape_cast %38 : vector<16x16x8xbf16> to vector<256x8xbf16>
    %c5 = arith.constant 5 : index
    %c0_23 = arith.constant 0 : index
    %c0_24 = arith.constant 0 : index
    %40 = vector.load %arg4[%c5, %c0_23, %c0_24] : memref<9x8x128xbf16, #tpu.memory_space<vmem>>, vector<1x8x128xbf16>
    %41 = vector.shape_cast %40 : vector<1x8x128xbf16> to vector<8x128xbf16>
    %cst_25 = arith.constant dense<0.000000e+00> : vector<256x128xf32>
    %42 = tpu.matmul %39, %41, %cst_25 {dimension_numbers = #tpu.dot_dimension_numbers<[1], [0], [0], [1], [0, 0, 1, 1], [], []>} : vector<256x8xbf16>, vector<8x128xbf16>, vector<256x128xf32> -> vector<256x128xf32>
    %43 = arith.addf %37, %42 : vector<256x128xf32>
    %44 = vector.extract_strided_slice %4 {offsets = [2, 0, 0], sizes = [16, 18, 8], strides = [1, 1, 1]} : vector<18x18x8xbf16> to vector<16x18x8xbf16>
    %45 = vector.extract_strided_slice %44 {offsets = [0, 0, 0], sizes = [16, 16, 8], strides = [1, 1, 1]} : vector<16x18x8xbf16> to vector<16x16x8xbf16>
    %46 = vector.shape_cast %45 : vector<16x16x8xbf16> to vector<256x8xbf16>
    %c6 = arith.constant 6 : index
    %c0_26 = arith.constant 0 : index
    %c0_27 = arith.constant 0 : index
    %47 = vector.load %arg4[%c6, %c0_26, %c0_27] : memref<9x8x128xbf16, #tpu.memory_space<vmem>>, vector<1x8x128xbf16>
    %48 = vector.shape_cast %47 : vector<1x8x128xbf16> to vector<8x128xbf16>
    %cst_28 = arith.constant dense<0.000000e+00> : vector<256x128xf32>
    %49 = tpu.matmul %46, %48, %cst_28 {dimension_numbers = #tpu.dot_dimension_numbers<[1], [0], [0], [1], [0, 0, 1, 1], [], []>} : vector<256x8xbf16>, vector<8x128xbf16>, vector<256x128xf32> -> vector<256x128xf32>
    %50 = arith.addf %43, %49 : vector<256x128xf32>
    %51 = vector.extract_strided_slice %44 {offsets = [0, 1, 0], sizes = [16, 16, 8], strides = [1, 1, 1]} : vector<16x18x8xbf16> to vector<16x16x8xbf16>
    %52 = vector.shape_cast %51 : vector<16x16x8xbf16> to vector<256x8xbf16>
    %c7 = arith.constant 7 : index
    %c0_29 = arith.constant 0 : index
    %c0_30 = arith.constant 0 : index
    %53 = vector.load %arg4[%c7, %c0_29, %c0_30] : memref<9x8x128xbf16, #tpu.memory_space<vmem>>, vector<1x8x128xbf16>
    %54 = vector.shape_cast %53 : vector<1x8x128xbf16> to vector<8x128xbf16>
    %cst_31 = arith.constant dense<0.000000e+00> : vector<256x128xf32>
    %55 = tpu.matmul %52, %54, %cst_31 {dimension_numbers = #tpu.dot_dimension_numbers<[1], [0], [0], [1], [0, 0, 1, 1], [], []>} : vector<256x8xbf16>, vector<8x128xbf16>, vector<256x128xf32> -> vector<256x128xf32>
    %56 = arith.addf %50, %55 : vector<256x128xf32>
    %57 = vector.extract_strided_slice %44 {offsets = [0, 2, 0], sizes = [16, 16, 8], strides = [1, 1, 1]} : vector<16x18x8xbf16> to vector<16x16x8xbf16>
    %58 = vector.shape_cast %57 : vector<16x16x8xbf16> to vector<256x8xbf16>
    %c8 = arith.constant 8 : index
    %c0_32 = arith.constant 0 : index
    %c0_33 = arith.constant 0 : index
    %59 = vector.load %arg4[%c8, %c0_32, %c0_33] : memref<9x8x128xbf16, #tpu.memory_space<vmem>>, vector<1x8x128xbf16>
    %60 = vector.shape_cast %59 : vector<1x8x128xbf16> to vector<8x128xbf16>
    %cst_34 = arith.constant dense<0.000000e+00> : vector<256x128xf32>
    %61 = tpu.matmul %58, %60, %cst_34 {dimension_numbers = #tpu.dot_dimension_numbers<[1], [0], [0], [1], [0, 0, 1, 1], [], []>} : vector<256x8xbf16>, vector<8x128xbf16>, vector<256x128xf32> -> vector<256x128xf32>
    %62 = arith.addf %56, %61 : vector<256x128xf32>
    %c0_35 = arith.constant 0 : index
    %c0_36 = arith.constant 0 : index
    %63 = vector.load %arg5[%c0_35, %c0_36] : memref<1x128xf32, #tpu.memory_space<vmem>>, vector<1x128xf32>
    %64 = vector.broadcast %63 : vector<1x128xf32> to vector<256x128xf32>
    %65 = arith.addf %62, %64 : vector<256x128xf32>
    %cst_37 = arith.constant 0.000000e+00 : f32
    %66 = vector.broadcast %cst_37 : f32 to vector<256x128xf32>
    %67 = arith.maximumf %65, %66 : vector<256x128xf32>
    %c0_i32 = arith.constant 0 : i32
    %68 = arith.cmpi eq, %arg1, %c0_i32 : i32
    %69 = arith.extui %68 : i1 to i32
    %c0_i32_38 = arith.constant 0 : i32
    %70 = arith.cmpi ne, %69, %c0_i32_38 : i32
    scf.if %70 {
      %cst_53 = arith.constant 0.000000e+00 : f32
      %84 = vector.broadcast %cst_53 : f32 to vector<1x1x128xf32>
      %c0_54 = arith.constant 0 : index
      %c0_55 = arith.constant 0 : index
      %c0_56 = arith.constant 0 : index
      %85 = vector.load %arg6[%c0_54, %c0_55, %c0_56] : memref<1x1x128xf32, #tpu.memory_space<vmem>>, vector<1x1x128xf32>
      tpu.vector_store %arg6[%c0_54, %c0_55, %c0_56], %84 {strides = array<i32>} : memref<1x1x128xf32, #tpu.memory_space<vmem>>, vector<1x1x128xf32>,
      %cst_57 = arith.constant 0.000000e+00 : f32
      %86 = vector.broadcast %cst_57 : f32 to vector<1x1x128xf32>
      %c0_58 = arith.constant 0 : index
      %c0_59 = arith.constant 0 : index
      %c0_60 = arith.constant 0 : index
      %87 = vector.load %arg7[%c0_58, %c0_59, %c0_60] : memref<1x1x128xf32, #tpu.memory_space<vmem>>, vector<1x1x128xf32>
      tpu.vector_store %arg7[%c0_58, %c0_59, %c0_60], %86 {strides = array<i32>} : memref<1x1x128xf32, #tpu.memory_space<vmem>>, vector<1x1x128xf32>,
    } else {
    }
    %c0_39 = arith.constant 0 : index
    %c0_40 = arith.constant 0 : index
    %c0_41 = arith.constant 0 : index
    %71 = vector.load %arg6[%c0_39, %c0_40, %c0_41] : memref<1x1x128xf32, #tpu.memory_space<vmem>>, vector<1x1x128xf32>
    %cst_42 = arith.constant dense<0.000000e+00> : vector<128xf32>
    %72 = vector.multi_reduction <add>, %67, %cst_42 [0] : vector<256x128xf32> to vector<128xf32>
    %73 = vector.shape_cast %72 : vector<128xf32> to vector<1x128xf32>
    %74 = vector.shape_cast %73 : vector<1x128xf32> to vector<1x1x128xf32>
    %75 = arith.addf %71, %74 : vector<1x1x128xf32>
    %c0_43 = arith.constant 0 : index
    %c0_44 = arith.constant 0 : index
    %c0_45 = arith.constant 0 : index
    %76 = vector.load %arg6[%c0_43, %c0_44, %c0_45] : memref<1x1x128xf32, #tpu.memory_space<vmem>>, vector<1x1x128xf32>
    tpu.vector_store %arg6[%c0_43, %c0_44, %c0_45], %75 {strides = array<i32>} : memref<1x1x128xf32, #tpu.memory_space<vmem>>, vector<1x1x128xf32>,
    %c0_46 = arith.constant 0 : index
    %c0_47 = arith.constant 0 : index
    %c0_48 = arith.constant 0 : index
    %77 = vector.load %arg7[%c0_46, %c0_47, %c0_48] : memref<1x1x128xf32, #tpu.memory_space<vmem>>, vector<1x1x128xf32>
    %78 = arith.mulf %67, %67 : vector<256x128xf32>
    %cst_49 = arith.constant dense<0.000000e+00> : vector<128xf32>
    %79 = vector.multi_reduction <add>, %78, %cst_49 [0] : vector<256x128xf32> to vector<128xf32>
    %80 = vector.shape_cast %79 : vector<128xf32> to vector<1x128xf32>
    %81 = vector.shape_cast %80 : vector<1x128xf32> to vector<1x1x128xf32>
    %82 = arith.addf %77, %81 : vector<1x1x128xf32>
    %c0_50 = arith.constant 0 : index
    %c0_51 = arith.constant 0 : index
    %c0_52 = arith.constant 0 : index
    %83 = vector.load %arg7[%c0_50, %c0_51, %c0_52] : memref<1x1x128xf32, #tpu.memory_space<vmem>>, vector<1x1x128xf32>
    tpu.vector_store %arg7[%c0_50, %c0_51, %c0_52], %82 {strides = array<i32>} : memref<1x1x128xf32, #tpu.memory_space<vmem>>, vector<1x1x128xf32>,
    return
  }
  func.func @transform_0(%arg0: i32, %arg1: i32) -> (i32, i32, i32, i32) {
    %c0_i32 = arith.constant 0 : i32
    %c0_i32_0 = arith.constant 0 : i32
    %c0_i32_1 = arith.constant 0 : i32
    return %arg0, %arg1, %c0_i32, %c0_i32_0 : i32, i32, i32, i32
  }
  func.func @transform_1(%arg0: i32, %arg1: i32) -> (i32, i32, i32, i32) {
    %c1_i32 = arith.constant 1 : i32
    %0 = arith.addi %arg1, %c1_i32 : i32
    %c8_i32 = arith.constant 8 : i32
    %1 = arith.muli %0, %c8_i32 : i32
    %c0_i32 = arith.constant 0 : i32
    %c0_i32_0 = arith.constant 0 : i32
    %c0_i32_1 = arith.constant 0 : i32
    return %arg0, %1, %c0_i32, %c0_i32_0 : i32, i32, i32, i32
  }
  func.func @transform_2(%arg0: i32, %arg1: i32) -> (i32, i32, i32) {
    %c0_i32 = arith.constant 0 : i32
    %c0_i32_0 = arith.constant 0 : i32
    %c0_i32_1 = arith.constant 0 : i32
    %c0_i32_2 = arith.constant 0 : i32
    return %c0_i32, %c0_i32_0, %c0_i32_1 : i32, i32, i32
  }
  func.func @transform_3(%arg0: i32, %arg1: i32) -> (i32, i32) {
    %c0_i32 = arith.constant 0 : i32
    %c0_i32_0 = arith.constant 0 : i32
    %c0_i32_1 = arith.constant 0 : i32
    return %c0_i32, %c0_i32_0 : i32, i32
  }
  func.func @transform_4(%arg0: i32, %arg1: i32) -> (i32, i32, i32) {
    %c0_i32 = arith.constant 0 : i32
    %c0_i32_0 = arith.constant 0 : i32
    %c0_i32_1 = arith.constant 0 : i32
    return %arg0, %c0_i32, %c0_i32_0 : i32, i32, i32
  }
  func.func @transform_5(%arg0: i32, %arg1: i32) -> (i32, i32, i32) {
    %c0_i32 = arith.constant 0 : i32
    %c0_i32_0 = arith.constant 0 : i32
    %c0_i32_1 = arith.constant 0 : i32
    return %arg0, %c0_i32, %c0_i32_0 : i32, i32, i32
  }
}

module attributes {stable_mosaic.version = 11 : i64} {
  func.func @_conv_bn_kernel(%arg0: i32, %arg1: i32, %arg2: memref<1x16x18x8xbf16, #tpu.memory_space<vmem>>, %arg3: memref<1x2x18x8xbf16, #tpu.memory_space<vmem>>, %arg4: memref<9x8x128xbf16, #tpu.memory_space<vmem>>, %arg5: memref<1x128xf32, #tpu.memory_space<vmem>>, %arg6: memref<1x128xf32, #tpu.memory_space<vmem>>, %arg7: memref<1x128xf32, #tpu.memory_space<vmem>>, %arg8: memref<256x8xf32, #tpu.memory_space<vmem>>) attributes {dimension_semantics = [#tpu.dimension_semantics<parallel>, #tpu.dimension_semantics<parallel>], iteration_bounds = array<i64: 2, 1>, scalar_prefetch = 0 : i64, scratch_operands = 0 : i64, tpu.core_type = #tpu.core_type<tc>, window_params = [{transform_indices = @transform_0, window_bounds = array<i64: 1, 16, 18, 8>}, {transform_indices = @transform_1, window_bounds = array<i64: 1, 2, 18, 8>}, {pipeline_mode = #tpu.pipeline_mode<synchronous>, transform_indices = @transform_2, window_bounds = array<i64: 9, 8, 128>}, {pipeline_mode = #tpu.pipeline_mode<synchronous>, transform_indices = @transform_3, window_bounds = array<i64: 1, 128>}, {pipeline_mode = #tpu.pipeline_mode<synchronous>, transform_indices = @transform_4, window_bounds = array<i64: 1, 128>}, {pipeline_mode = #tpu.pipeline_mode<synchronous>, transform_indices = @transform_5, window_bounds = array<i64: 1, 128>}, {transform_indices = @transform_6, window_bounds = array<i64: 256, 8>}]} {
    %c0 = arith.constant 0 : index
    %c0_0 = arith.constant 0 : index
    %c0_1 = arith.constant 0 : index
    %c0_2 = arith.constant 0 : index
    %0 = vector.load %arg2[%c0, %c0_0, %c0_1, %c0_2] : memref<1x16x18x8xbf16, #tpu.memory_space<vmem>>, vector<1x16x18x8xbf16>
    %1 = vector.shape_cast %0 : vector<1x16x18x8xbf16> to vector<16x18x8xbf16>
    %c0_3 = arith.constant 0 : index
    %c0_4 = arith.constant 0 : index
    %c0_5 = arith.constant 0 : index
    %c0_6 = arith.constant 0 : index
    %2 = vector.load %arg3[%c0_3, %c0_4, %c0_5, %c0_6] : memref<1x2x18x8xbf16, #tpu.memory_space<vmem>>, vector<1x2x18x8xbf16>
    %3 = vector.shape_cast %2 : vector<1x2x18x8xbf16> to vector<2x18x8xbf16>
    %4 = tpu.concatenate %1, %3 in 0 : vector<16x18x8xbf16>, vector<2x18x8xbf16> -> vector<18x18x8xbf16>
    %cst = arith.constant 0.000000e+00 : f32
    %5 = vector.broadcast %cst : f32 to vector<256x128xf32>
    %6 = vector.extract_strided_slice %4 {offsets = [0, 0, 0], sizes = [16, 18, 8], strides = [1, 1, 1]} : vector<18x18x8xbf16> to vector<16x18x8xbf16>
    %7 = vector.extract_strided_slice %6 {offsets = [0, 0, 0], sizes = [16, 16, 8], strides = [1, 1, 1]} : vector<16x18x8xbf16> to vector<16x16x8xbf16>
    %8 = vector.shape_cast %7 : vector<16x16x8xbf16> to vector<256x8xbf16>
    %c0_7 = arith.constant 0 : index
    %c0_8 = arith.constant 0 : index
    %c0_9 = arith.constant 0 : index
    %9 = vector.load %arg4[%c0_7, %c0_8, %c0_9] : memref<9x8x128xbf16, #tpu.memory_space<vmem>>, vector<1x8x128xbf16>
    %10 = vector.shape_cast %9 : vector<1x8x128xbf16> to vector<8x128xbf16>
    %cst_10 = arith.constant dense<0.000000e+00> : vector<256x128xf32>
    %11 = tpu.matmul %8, %10, %cst_10 {dimension_numbers = #tpu.dot_dimension_numbers<[1], [0], [0], [1], [0, 0, 1, 1], [], []>} : vector<256x8xbf16>, vector<8x128xbf16>, vector<256x128xf32> -> vector<256x128xf32>
    %12 = arith.addf %5, %11 : vector<256x128xf32>
    %13 = vector.extract_strided_slice %6 {offsets = [0, 1, 0], sizes = [16, 16, 8], strides = [1, 1, 1]} : vector<16x18x8xbf16> to vector<16x16x8xbf16>
    %14 = vector.shape_cast %13 : vector<16x16x8xbf16> to vector<256x8xbf16>
    %c1 = arith.constant 1 : index
    %c0_11 = arith.constant 0 : index
    %c0_12 = arith.constant 0 : index
    %15 = vector.load %arg4[%c1, %c0_11, %c0_12] : memref<9x8x128xbf16, #tpu.memory_space<vmem>>, vector<1x8x128xbf16>
    %16 = vector.shape_cast %15 : vector<1x8x128xbf16> to vector<8x128xbf16>
    %cst_13 = arith.constant dense<0.000000e+00> : vector<256x128xf32>
    %17 = tpu.matmul %14, %16, %cst_13 {dimension_numbers = #tpu.dot_dimension_numbers<[1], [0], [0], [1], [0, 0, 1, 1], [], []>} : vector<256x8xbf16>, vector<8x128xbf16>, vector<256x128xf32> -> vector<256x128xf32>
    %18 = arith.addf %12, %17 : vector<256x128xf32>
    %19 = vector.extract_strided_slice %6 {offsets = [0, 2, 0], sizes = [16, 16, 8], strides = [1, 1, 1]} : vector<16x18x8xbf16> to vector<16x16x8xbf16>
    %20 = vector.shape_cast %19 : vector<16x16x8xbf16> to vector<256x8xbf16>
    %c2 = arith.constant 2 : index
    %c0_14 = arith.constant 0 : index
    %c0_15 = arith.constant 0 : index
    %21 = vector.load %arg4[%c2, %c0_14, %c0_15] : memref<9x8x128xbf16, #tpu.memory_space<vmem>>, vector<1x8x128xbf16>
    %22 = vector.shape_cast %21 : vector<1x8x128xbf16> to vector<8x128xbf16>
    %cst_16 = arith.constant dense<0.000000e+00> : vector<256x128xf32>
    %23 = tpu.matmul %20, %22, %cst_16 {dimension_numbers = #tpu.dot_dimension_numbers<[1], [0], [0], [1], [0, 0, 1, 1], [], []>} : vector<256x8xbf16>, vector<8x128xbf16>, vector<256x128xf32> -> vector<256x128xf32>
    %24 = arith.addf %18, %23 : vector<256x128xf32>
    %25 = vector.extract_strided_slice %4 {offsets = [1, 0, 0], sizes = [16, 18, 8], strides = [1, 1, 1]} : vector<18x18x8xbf16> to vector<16x18x8xbf16>
    %26 = vector.extract_strided_slice %25 {offsets = [0, 0, 0], sizes = [16, 16, 8], strides = [1, 1, 1]} : vector<16x18x8xbf16> to vector<16x16x8xbf16>
    %27 = vector.shape_cast %26 : vector<16x16x8xbf16> to vector<256x8xbf16>
    %c3 = arith.constant 3 : index
    %c0_17 = arith.constant 0 : index
    %c0_18 = arith.constant 0 : index
    %28 = vector.load %arg4[%c3, %c0_17, %c0_18] : memref<9x8x128xbf16, #tpu.memory_space<vmem>>, vector<1x8x128xbf16>
    %29 = vector.shape_cast %28 : vector<1x8x128xbf16> to vector<8x128xbf16>
    %cst_19 = arith.constant dense<0.000000e+00> : vector<256x128xf32>
    %30 = tpu.matmul %27, %29, %cst_19 {dimension_numbers = #tpu.dot_dimension_numbers<[1], [0], [0], [1], [0, 0, 1, 1], [], []>} : vector<256x8xbf16>, vector<8x128xbf16>, vector<256x128xf32> -> vector<256x128xf32>
    %31 = arith.addf %24, %30 : vector<256x128xf32>
    %32 = vector.extract_strided_slice %25 {offsets = [0, 1, 0], sizes = [16, 16, 8], strides = [1, 1, 1]} : vector<16x18x8xbf16> to vector<16x16x8xbf16>
    %33 = vector.shape_cast %32 : vector<16x16x8xbf16> to vector<256x8xbf16>
    %c4 = arith.constant 4 : index
    %c0_20 = arith.constant 0 : index
    %c0_21 = arith.constant 0 : index
    %34 = vector.load %arg4[%c4, %c0_20, %c0_21] : memref<9x8x128xbf16, #tpu.memory_space<vmem>>, vector<1x8x128xbf16>
    %35 = vector.shape_cast %34 : vector<1x8x128xbf16> to vector<8x128xbf16>
    %cst_22 = arith.constant dense<0.000000e+00> : vector<256x128xf32>
    %36 = tpu.matmul %33, %35, %cst_22 {dimension_numbers = #tpu.dot_dimension_numbers<[1], [0], [0], [1], [0, 0, 1, 1], [], []>} : vector<256x8xbf16>, vector<8x128xbf16>, vector<256x128xf32> -> vector<256x128xf32>
    %37 = arith.addf %31, %36 : vector<256x128xf32>
    %38 = vector.extract_strided_slice %25 {offsets = [0, 2, 0], sizes = [16, 16, 8], strides = [1, 1, 1]} : vector<16x18x8xbf16> to vector<16x16x8xbf16>
    %39 = vector.shape_cast %38 : vector<16x16x8xbf16> to vector<256x8xbf16>
    %c5 = arith.constant 5 : index
    %c0_23 = arith.constant 0 : index
    %c0_24 = arith.constant 0 : index
    %40 = vector.load %arg4[%c5, %c0_23, %c0_24] : memref<9x8x128xbf16, #tpu.memory_space<vmem>>, vector<1x8x128xbf16>
    %41 = vector.shape_cast %40 : vector<1x8x128xbf16> to vector<8x128xbf16>
    %cst_25 = arith.constant dense<0.000000e+00> : vector<256x128xf32>
    %42 = tpu.matmul %39, %41, %cst_25 {dimension_numbers = #tpu.dot_dimension_numbers<[1], [0], [0], [1], [0, 0, 1, 1], [], []>} : vector<256x8xbf16>, vector<8x128xbf16>, vector<256x128xf32> -> vector<256x128xf32>
    %43 = arith.addf %37, %42 : vector<256x128xf32>
    %44 = vector.extract_strided_slice %4 {offsets = [2, 0, 0], sizes = [16, 18, 8], strides = [1, 1, 1]} : vector<18x18x8xbf16> to vector<16x18x8xbf16>
    %45 = vector.extract_strided_slice %44 {offsets = [0, 0, 0], sizes = [16, 16, 8], strides = [1, 1, 1]} : vector<16x18x8xbf16> to vector<16x16x8xbf16>
    %46 = vector.shape_cast %45 : vector<16x16x8xbf16> to vector<256x8xbf16>
    %c6 = arith.constant 6 : index
    %c0_26 = arith.constant 0 : index
    %c0_27 = arith.constant 0 : index
    %47 = vector.load %arg4[%c6, %c0_26, %c0_27] : memref<9x8x128xbf16, #tpu.memory_space<vmem>>, vector<1x8x128xbf16>
    %48 = vector.shape_cast %47 : vector<1x8x128xbf16> to vector<8x128xbf16>
    %cst_28 = arith.constant dense<0.000000e+00> : vector<256x128xf32>
    %49 = tpu.matmul %46, %48, %cst_28 {dimension_numbers = #tpu.dot_dimension_numbers<[1], [0], [0], [1], [0, 0, 1, 1], [], []>} : vector<256x8xbf16>, vector<8x128xbf16>, vector<256x128xf32> -> vector<256x128xf32>
    %50 = arith.addf %43, %49 : vector<256x128xf32>
    %51 = vector.extract_strided_slice %44 {offsets = [0, 1, 0], sizes = [16, 16, 8], strides = [1, 1, 1]} : vector<16x18x8xbf16> to vector<16x16x8xbf16>
    %52 = vector.shape_cast %51 : vector<16x16x8xbf16> to vector<256x8xbf16>
    %c7 = arith.constant 7 : index
    %c0_29 = arith.constant 0 : index
    %c0_30 = arith.constant 0 : index
    %53 = vector.load %arg4[%c7, %c0_29, %c0_30] : memref<9x8x128xbf16, #tpu.memory_space<vmem>>, vector<1x8x128xbf16>
    %54 = vector.shape_cast %53 : vector<1x8x128xbf16> to vector<8x128xbf16>
    %cst_31 = arith.constant dense<0.000000e+00> : vector<256x128xf32>
    %55 = tpu.matmul %52, %54, %cst_31 {dimension_numbers = #tpu.dot_dimension_numbers<[1], [0], [0], [1], [0, 0, 1, 1], [], []>} : vector<256x8xbf16>, vector<8x128xbf16>, vector<256x128xf32> -> vector<256x128xf32>
    %56 = arith.addf %50, %55 : vector<256x128xf32>
    %57 = vector.extract_strided_slice %44 {offsets = [0, 2, 0], sizes = [16, 16, 8], strides = [1, 1, 1]} : vector<16x18x8xbf16> to vector<16x16x8xbf16>
    %58 = vector.shape_cast %57 : vector<16x16x8xbf16> to vector<256x8xbf16>
    %c8 = arith.constant 8 : index
    %c0_32 = arith.constant 0 : index
    %c0_33 = arith.constant 0 : index
    %59 = vector.load %arg4[%c8, %c0_32, %c0_33] : memref<9x8x128xbf16, #tpu.memory_space<vmem>>, vector<1x8x128xbf16>
    %60 = vector.shape_cast %59 : vector<1x8x128xbf16> to vector<8x128xbf16>
    %cst_34 = arith.constant dense<0.000000e+00> : vector<256x128xf32>
    %61 = tpu.matmul %58, %60, %cst_34 {dimension_numbers = #tpu.dot_dimension_numbers<[1], [0], [0], [1], [0, 0, 1, 1], [], []>} : vector<256x8xbf16>, vector<8x128xbf16>, vector<256x128xf32> -> vector<256x128xf32>
    %62 = arith.addf %56, %61 : vector<256x128xf32>
    %c0_35 = arith.constant 0 : index
    %c0_36 = arith.constant 0 : index
    %63 = vector.load %arg5[%c0_35, %c0_36] : memref<1x128xf32, #tpu.memory_space<vmem>>, vector<1x128xf32>
    %64 = vector.broadcast %63 : vector<1x128xf32> to vector<256x128xf32>
    %65 = arith.addf %62, %64 : vector<256x128xf32>
    %cst_37 = arith.constant 0.000000e+00 : f32
    %66 = vector.broadcast %cst_37 : f32 to vector<256x128xf32>
    %67 = arith.maximumf %65, %66 : vector<256x128xf32>
    %c0_38 = arith.constant 0 : index
    %c0_39 = arith.constant 0 : index
    %68 = vector.load %arg6[%c0_38, %c0_39] : memref<1x128xf32, #tpu.memory_space<vmem>>, vector<1x128xf32>
    %69 = vector.broadcast %68 : vector<1x128xf32> to vector<256x128xf32>
    %70 = arith.mulf %67, %69 : vector<256x128xf32>
    %c0_40 = arith.constant 0 : index
    %c0_41 = arith.constant 0 : index
    %71 = vector.load %arg7[%c0_40, %c0_41] : memref<1x128xf32, #tpu.memory_space<vmem>>, vector<1x128xf32>
    %72 = vector.broadcast %71 : vector<1x128xf32> to vector<256x128xf32>
    %73 = arith.addf %70, %72 : vector<256x128xf32>
    %74 = vector.extract_strided_slice %73 {offsets = [0, 0], sizes = [256, 8], strides = [1, 1]} : vector<256x128xf32> to vector<256x8xf32>
    %c0_42 = arith.constant 0 : index
    %c0_43 = arith.constant 0 : index
    %75 = vector.load %arg8[%c0_42, %c0_43] : memref<256x8xf32, #tpu.memory_space<vmem>>, vector<256x8xf32>
    tpu.vector_store %arg8[%c0_42, %c0_43], %74 {strides = array<i32>} : memref<256x8xf32, #tpu.memory_space<vmem>>, vector<256x8xf32>,
    return
  }
  func.func @transform_0(%arg0: i32, %arg1: i32) -> (i32, i32, i32, i32) {
    %c0_i32 = arith.constant 0 : i32
    %c0_i32_0 = arith.constant 0 : i32
    %c0_i32_1 = arith.constant 0 : i32
    return %arg0, %arg1, %c0_i32, %c0_i32_0 : i32, i32, i32, i32
  }
  func.func @transform_1(%arg0: i32, %arg1: i32) -> (i32, i32, i32, i32) {
    %c1_i32 = arith.constant 1 : i32
    %0 = arith.addi %arg1, %c1_i32 : i32
    %c8_i32 = arith.constant 8 : i32
    %1 = arith.muli %0, %c8_i32 : i32
    %c0_i32 = arith.constant 0 : i32
    %c0_i32_0 = arith.constant 0 : i32
    %c0_i32_1 = arith.constant 0 : i32
    return %arg0, %1, %c0_i32, %c0_i32_0 : i32, i32, i32, i32
  }
  func.func @transform_2(%arg0: i32, %arg1: i32) -> (i32, i32, i32) {
    %c0_i32 = arith.constant 0 : i32
    %c0_i32_0 = arith.constant 0 : i32
    %c0_i32_1 = arith.constant 0 : i32
    %c0_i32_2 = arith.constant 0 : i32
    return %c0_i32, %c0_i32_0, %c0_i32_1 : i32, i32, i32
  }
  func.func @transform_3(%arg0: i32, %arg1: i32) -> (i32, i32) {
    %c0_i32 = arith.constant 0 : i32
    %c0_i32_0 = arith.constant 0 : i32
    %c0_i32_1 = arith.constant 0 : i32
    return %c0_i32, %c0_i32_0 : i32, i32
  }
  func.func @transform_4(%arg0: i32, %arg1: i32) -> (i32, i32) {
    %c0_i32 = arith.constant 0 : i32
    %c0_i32_0 = arith.constant 0 : i32
    %c0_i32_1 = arith.constant 0 : i32
    return %c0_i32, %c0_i32_0 : i32, i32
  }
  func.func @transform_5(%arg0: i32, %arg1: i32) -> (i32, i32) {
    %c0_i32 = arith.constant 0 : i32
    %c0_i32_0 = arith.constant 0 : i32
    %c0_i32_1 = arith.constant 0 : i32
    return %c0_i32, %c0_i32_0 : i32, i32
  }
  func.func @transform_6(%arg0: i32, %arg1: i32) -> (i32, i32) {
    %c1_i32 = arith.constant 1 : i32
    %0 = arith.muli %arg0, %c1_i32 : i32
    %1 = arith.addi %0, %arg1 : i32
    %c0_i32 = arith.constant 0 : i32
    %c0_i32_0 = arith.constant 0 : i32
    return %1, %c0_i32 : i32, i32
  }
}

</mosaic_0001>

<bundles_post_ra>
// kernel: conv_relu_bn.2
= control target key start
LH: loop header
LB: loop body
LE: loop exit
PB: predicated region body
PF: predicated region fallthrough
CT: control target
= control target key end

     0   :  { %s4422_s18 = smov 0   ;;  %s4424_s19 = smov 0   ;;  %s5483_s0 = inlined_call_operand.vmem [shape: bf16[2,24,18,8], index: 0, kind: input, shape index: {}, may-alias: {0,1}]   ;;  %s5484_s1 = inlined_call_operand.vmem [shape: bf16[2,24,18,8], index: 1, kind: input, shape index: {}, may-alias: {0,1}]   ;;  %s5485_s2 = inlined_call_operand.vmem [shape: bf16[9,8,128], index: 2, kind: input, shape index: {}]   ;;  %s5486_s3 = inlined_call_operand.vmem [shape: f32[1,128], index: 3, kind: input, shape index: {}]   ;;  %s5487_s4 = inlined_call_operand.vmem [shape: f32[2,1,128], index: 4, kind: output, shape index: {0}]   ;;  %s5488_s5 = inlined_call_operand.vmem [shape: f32[2,1,128], index: 5, kind: output, shape index: {1}]  }
   0x1   :  { %s4426_s20 = smov 0  }
   0x2 LB: > { %s28_s21 = sadd.s32 1, %s4385_s19  ;;  %p3358_p0 = scmp.ge.s32.totalorder %s4389_s20, 1  ;;  %s4389_s20 = sphi %s4426_s20, %s16_s20   ;;  %s4385_s19 = sphi %s4424_s19, %s5567_s19   ;;  %s4381_s18 = sphi %s4422_s18, %s5566_s18  }
   0x3   : > { %p30_p1 = scmp.ge.s32.totalorder %s28_s21, 2  ;;  %p246_p2 = scmp.lt.s32.totalorder %s4389_s20, 3 }
   0x5   : > { %s5569_s21 = smov (%p30_p1, %s28_s21), 0  ;;  %p247_p3 = pnand %p3358_p0, %p246_p2 }
   0x7   : > { %250 = sbr.rel (%p247_p3) target bundleno = 576 (0x240), region = 36 }
   0xe   : > { %v3361_v0 = vld [vmem:[%s5485_s2 + $0x4] sm:$0xf]  ;;  %vm881_vm0 = vcmask 1043456   ;;  %v3493_v1 = vld [vmem:[%s5485_s2 + $0x10] sm:$0xf]  ;;  %p303_p4 = scmp.lt.s32.totalorder %s4381_s18, 1 }
   0xf   : > { %4307 = vmatprep.subr.msk.bf16.mxu1 %vm881_vm0, %v3361_v0  ;;  %4311 = vmatprep.subr.msk.bf16.mxu0 %vm881_vm0, %v3493_v1  ;;  %v883_v2 = vsel %vm881_vm0, %v3361_v0, 0  ;;  %v4450_v3 = vsel %vm881_vm0, %v3493_v1, 0  ;;  %v394_v4 = vld [vmem:[%s5485_s2] sm:$0xf]  ;;  %v3512_v5 = vld [vmem:[%s5485_s2 + $0x14] sm:$0xf] }
  0x10   : > { %5520 = vst [vmem:[#allocation2_spill] sm:$0xff] %v4450_v3  ;;  %3744 = vmatpush3.bf16.msra.mxu1 %v883_v2  ;;  %3880 = vmatpush3.bf16.msra.mxu0 %v4450_v3  ;;  %s5571_s18 = smov (!%p303_p4, %s4381_s18), 1  ;;  %vm395_vm1 = vsmask.f32 3328  ;;  %vm396_vm2 = vsmask.f32 7440 }
  0x11   : > { %4308 = vmatprep.subr.msk.bf16.mxu1 %vm881_vm0, %v394_v4  ;;  %4313 = vmatprep.subr.msk.bf16.mxu0 %vm881_vm0, %v3512_v5  ;;  %s4317_s30 = smul.u32 288, %s5571_s18  ;;  %v4472_v6 = vsel %vm881_vm0, %v394_v4, 0  ;;  %v4475_v7 = vsel %vm881_vm0, %v3512_v5, 0  ;;  %v4480_v8 = vld [vmem:[%s5485_s2 + $0x18] sm:$0xf]  ;;  %vm832_vm3 = vcmask 64512   ;;  %vm4516_vm4 = vmor %vm395_vm1, %vm396_vm2  ;;  %s5408_s6 = scalar_lea.vmem %s5487_s4, %s5571_s18 }
  0x12   : > { %v4504_v20 = vsel %vm881_vm0, %v4480_v8, 0  ;;  %vm1354_vm5 = vcmask 1042432   ;;  %vm1355_vm6 = vcmask 1046532   ;;  %s5414_s9 = scalar_lea.vmem %s5488_s5, %s5571_s18 }
  0x13   : > { %s4469_s8 = scalar_lea.vmem %s5483_s0, %s4317_s30  ;;  %vm4697_vm7 = vmor %vm1354_vm5, %vm1355_vm6  ;;  %s3589_s17 = sadd.s32 192, %s4317_s30 }
  0x14   : > { %v4483_v9 = vld [vmem:[%s4469_s8] sm:$0xf]  ;;  %v4486_v10 = vld [vmem:[%s4469_s8 + $0x4] sm:$0xf]  ;;  %v342_v11 = vld [vmem:[%s4469_s8 + $0x8] sm:$0x1]  ;;  %s5065_s24 = scalar_lea.vmem %s5484_s1, %s3589_s17 }
  0x15   : > { %v399_v12 = vshrl.u32 %v4483_v9, 16  ;;  %v402_v13 = vshll.u32 %v4483_v9, 16  ;;  %v408_v14 = vshll.u32 %v4486_v10, 16  ;;  %v412_v15 = vshrl.u32 %v4486_v10, 16  ;;  %v4494_v16 = vld [vmem:[%s4469_s8 + $0xc] sm:$0xf] }
  0x16   : > { %v418_v17 = vshll.u32 %v342_v11, 16  ;;  %v4497_v18 = vld [vmem:[%s4469_s8 + $0x10] sm:$0xf]  ;;  %v4500_v19 = vld [vmem:[%s4469_s8 + $0x14] sm:$0x1]  ;;  %v423_v26 = vshrl.u32 %v4494_v16, 16 }
  0x17   : > { %v401_v21 = vrot.slane %v399_v12, 4  ;;  %v404_v22 = vrot.slane %v402_v13, 5  ;;  %v410_v23 = vrot.slane %v408_v14, 5  ;;  %v414_v24 = vrot.slane %v412_v15, 4  ;;  %v4512_v33 = vld [vmem:[%s4469_s8 + $0x18] sm:$0xf] }
  0x18   : > { %v420_v25 = vrot.slane %v418_v17, 5  ;;  %v426_v27 = vshll.u32 %v4494_v16, 16  ;;  %v432_v28 = vshll.u32 %v4497_v18, 16  ;;  %v436_v31 = vshrl.u32 %v4497_v18, 16  ;;  %v4525_v39 = vld [vmem:[%s4469_s8 + $0x1c] sm:$0xf] }
  0x19   : > { %v405_v29 = vor.u32 %v404_v22, %v401_v21  ;;  %v415_v30 = vor.u32 %v414_v24, %v410_v23  ;;  %v442_v32 = vshll.u32 %v4500_v19, 16  ;;  %v425_v35 = vrot.slane %v423_v26, 4  ;;  %v4529_v46 = vld [vmem:[%s4469_s8 + $0x20] sm:$0x1]  ;;  %v4539_v57 = vld [vmem:[%s4469_s8 + $0x24] sm:$0xf] }
  0x1a   : > { %v428_v36 = vrot.slane %v426_v27, 5  ;;  %v434_v37 = vrot.slane %v432_v28, 5  ;;  %v4522_v38 = vcombine.low %v4494_v16, %v4497_v18  ;;  %v438_v42 = vrot.slane %v436_v31, 4  ;;  %v4544_v62 = vld [vmem:[%s4469_s8 + $0x28] sm:$0xf] }
  0x1b   : > { %v406_v40 = vrot.slane %v405_v29, 4  ;;  %v416_v41 = vrot.slane %v415_v30, 4  ;;  %v444_v43 = vrot.slane %v442_v32, 5  ;;  %v1369_v45 = vrot.slane %v4500_v19, 5  ;;  %v4552_v4 = vld [vmem:[%s4469_s8 + $0x2c] sm:$0x1] }
  0x1c   : > { %v429_v44 = vor.u32 %v428_v36, %v425_v35  ;;  %v447_v47 = vshrl.u32 %v4512_v33, 16  ;;  %v450_v48 = vshll.u32 %v4512_v33, 16  ;;  %v439_v51 = vor.u32 %v438_v42, %v434_v37  ;;  %v4558_v14 = vld [vmem:[%s4469_s8 + $0x30] sm:$0xf]  ;;  %v4570_v28 = vld [vmem:[%s4469_s8 + $0x34] sm:$0xf] }
  0x1d   : > { %v411_v49 = vsel %vm4516_vm4, %v406_v40, %v410_v23  ;;  %v421_v50 = vsel %vm4516_vm4, %v416_v41, %v420_v25  ;;  %v456_v52 = vshll.u32 %v4525_v39, 16  ;;  %v460_v60 = vshrl.u32 %v4525_v39, 16  ;;  %v4565_v23 = vld [vmem:[%s5485_s2 + $0x8] sm:$0xf]  ;;  %v4577_v32 = vld [vmem:[%s4469_s8 + $0x38] sm:$0x1] }
  0x1e   : > { %v3362_v53 = vcombine.low %v411_v49, %v421_v50  ;;  %v430_v54 = vrot.slane %v429_v44, 4  ;;  %v449_v55 = vrot.slane %v447_v47, 4  ;;  %v452_v56 = vrot.slane %v450_v48, 5  ;;  %v4585_v48 = vld [vmem:[%s4469_s8 + $0x3c] sm:$0xf] }
  0x1f   : > { %v440_v58 = vrot.slane %v439_v51, 4  ;;  %v458_v59 = vrot.slane %v456_v52, 5  ;;  %v466_v61 = vshll.u32 %v4529_v46, 16  ;;  %v1373_v1 = vrot.slane %v4525_v39, 5  ;;  %v4593_v52 = vld [vmem:[%s4469_s8 + $0x40] sm:$0xf] }
  0x20   : > { %3745 = vmatprep.mubr.msk.bf16.mxu1 %vm832_vm3, %v3362_v53  ;;  %v435_v63 = vsel %vm4516_vm4, %v430_v54, %v434_v37  ;;  %v453_v0 = vor.u32 %v452_v56, %v449_v55  ;;  %v1376_v2 = vrot.slane %v4529_v46, 5  ;;  %v462_v11 = vrot.slane %v460_v60, 4 }
  0x21   : > { %v445_v5 = vsel %vm4516_vm4, %v440_v58, %v444_v43  ;;  %v468_v12 = vrot.slane %v466_v61, 5  ;;  %v471_v13 = vshrl.u32 %v4539_v57, 16  ;;  %v474_v21 = vshll.u32 %v4539_v57, 16 }
  0x22   : > { %v3363_v15 = vcombine.low %v435_v63, %v445_v5  ;;  %v454_v17 = vrot.slane %v453_v0, 4  ;;  %v480_v22 = vshll.u32 %v4544_v62, 16  ;;  %v463_v24 = vor.u32 %v462_v11, %v458_v59  ;;  %v4605_v5 = vld [vmem:[%s4469_s8 + $0x44] sm:$0x1] }
  0x23   : > { %v473_v25 = vrot.slane %v471_v13, 4  ;;  %v484_v26 = vshrl.u32 %v4544_v62, 16  ;;  %v490_v27 = vshll.u32 %v4552_v4, 16  ;;  %v476_v30 = vrot.slane %v474_v21, 5  ;;  %v4610_v13 = vld [vmem:[%s4469_s8 + $0x48] sm:$0xf] }
  0x24   : > { %3881 = vmatprep.mubr.msk.bf16.mxu0 %vm832_vm3, %v3363_v15  ;;  %3746 = vmatmul.mubr.msk.bf16.vlgmr.msra.gmra.mrb[0].mxu1 %vm832_vm3, %v3363_v15  ;;  %v459_v29 = vsel %vm4516_vm4, %v454_v17, %v458_v59  ;;  %v482_v31 = vrot.slane %v480_v22, 5  ;;  %v495_v35 = vshrl.u32 %v4558_v14, 16  ;;  %v464_v36 = vrot.slane %v463_v24, 4  ;;  %v4617_v24 = vld [vmem:[%s4469_s8 + $0x4c] sm:$0xf] }
  0x25   : > { %3778 = vmatpush3.bf16.msra.mxu1 %v4472_v6  ;;  %v486_v37 = vrot.slane %v484_v26, 4  ;;  %v492_v40 = vrot.slane %v490_v27, 5  ;;  %v498_v41 = vshll.u32 %v4558_v14, 16  ;;  %v477_v42 = vor.u32 %v476_v30, %v473_v25 }
  0x26   : > { %v497_v43 = vrot.slane %v495_v35, 4  ;;  %v504_v44 = vshll.u32 %v4570_v28, 16  ;;  %v508_v47 = vshrl.u32 %v4570_v28, 16  ;;  %4309 = vmatprep.subr.msk.bf16.mxu1 %vm881_vm0, %v4565_v23  ;;  %v469_v49 = vsel %vm4516_vm4, %v464_v36, %v468_v12 }
  0x27   : > { %v487_v6 = vor.u32 %v486_v37, %v482_v31  ;;  %v500_v50 = vrot.slane %v498_v41, 5  ;;  %v514_v51 = vshll.u32 %v4577_v32, 16  ;;  %v4595_v53 = vcombine.low %v459_v29, %v469_v49 }
  0x28   : > { %v478_v54 = vrot.slane %v477_v42, 4  ;;  %v506_v55 = vrot.slane %v504_v44, 5  ;;  %v510_v56 = vrot.slane %v508_v47, 4  ;;  %v519_v61 = vshrl.u32 %v4585_v48, 16  ;;  %v4639_v42 = vld [vmem:[%s4469_s8 + $0x54] sm:$0xf] }
  0x29   : > { %5523 = vst [vmem:[#allocation3_spill] sm:$0xff] %v4595_v53  ;;  %v488_v58 = vrot.slane %v487_v6, 4  ;;  %v501_v59 = vor.u32 %v500_v50, %v497_v43  ;;  %v516_v60 = vrot.slane %v514_v51, 5  ;;  %3882 = vmatmul.mubr.msk.bf16.vlgmr.msra.gmra.mrb[0].mxu0 %vm832_vm3, %v4595_v53  ;;  %3749 = vmatprep.mubr.msk.bf16.mxu1 %vm832_vm3, %v4595_v53  ;;  %v522_v11 = vshll.u32 %v4585_v48, 16  ;;  %5525 = vst [vmem:[#allocation5_spill] sm:$0xff] %v4639_v42 }
  0x2a   : > { %v483_v63 = vsel %vm4516_vm4, %v478_v54, %v482_v31  ;;  %v511_v0 = vor.u32 %v510_v56, %v506_v55  ;;  %v528_v12 = vshll.u32 %v4593_v52, 16  ;;  %3914 = vmatpush3.bf16.msra.mxu0 %v4475_v7  ;;  %v521_v21 = vrot.slane %v519_v61, 4  ;;  %v4644_v6 = vld [vmem:[%s4469_s8 + $0x58] sm:$0xf] }
  0x2b   : > { %v493_v15 = vsel %vm4516_vm4, %v488_v58, %v492_v40  ;;  %v502_v17 = vrot.slane %v501_v59, 4  ;;  %v532_v22 = vshrl.u32 %v4593_v52, 16  ;;  %v524_v27 = vrot.slane %v522_v11, 5  ;;  %4314 = vmatprep.subr.msk.bf16.mxu0 %vm881_vm0, %v4480_v8  ;;  %v4634_v8 = vld [vmem:[%s4469_s8 + $0x50] sm:$0x1] }
  0x2c   : > { %v4619_v25 = vcombine.low %v483_v63, %v493_v15  ;;  %v512_v26 = vrot.slane %v511_v0, 4  ;;  %v530_v29 = vrot.slane %v528_v12, 5  ;;  %v538_v31 = vshll.u32 %v4605_v5, 16  ;;  %v4657_v11 = vld [vmem:[%s4469_s8 + $0x5c] sm:$0x1] }
  0x2d   : > { %v507_v7 = vsel %vm4516_vm4, %v502_v17, %v506_v55  ;;  %v534_v30 = vrot.slane %v532_v22, 4  ;;  %v543_v35 = vshrl.u32 %v4610_v13, 16  ;;  %v525_v37 = vor.u32 %v524_v27, %v521_v21  ;;  %v4661_v15 = vld [vmem:[%s4469_s8 + $0x60] sm:$0xf]  ;;  %v4666_v27 = vld [vmem:[%s4469_s8 + $0x64] sm:$0xf] }
  0x2e   : > { %5524 = vst [vmem:[#allocation4_spill] sm:$0xff] %v4619_v25  ;;  %3885 = vmatprep.mubr.msk.bf16.mxu0 %vm832_vm3, %v4619_v25  ;;  %3750 = vmatmul.mubr.msk.bf16.gmra.mrb[4].mxu1 %vm832_vm3, %v4619_v25  ;;  %v517_v36 = vsel %vm4516_vm4, %v512_v26, %v516_v60  ;;  %v546_v40 = vshll.u32 %v4610_v13, 16  ;;  %v552_v41 = vshll.u32 %v4617_v24, 16  ;;  %v540_v47 = vrot.slane %v538_v31, 5  ;;  %v4878_v25 = vld [vmem:[%s4469_s8 + $0xa8] sm:$0xf] }
  0x2f   : > { %v4641_v43 = vcombine.low %v507_v7, %v517_v36  ;;  %v535_v44 = vor.u32 %v534_v30, %v530_v29  ;;  %v545_v49 = vrot.slane %v543_v35, 4  ;;  %v526_v50 = vrot.slane %v525_v37, 4 }
  0x30   : > { %v548_v51 = vrot.slane %v546_v40, 5  ;;  %v554_v54 = vrot.slane %v552_v41, 5  ;;  %v556_v55 = vshrl.u32 %v4617_v24, 16  ;;  %v562_v58 = vshll.u32 %v4634_v8, 16 }
  0x31   : > { %5526 = vst [vmem:[#allocation6_spill] sm:$0xff] %v4641_v43  ;;  %3753 = vmatprep.mubr.msk.bf16.mxu1 %vm832_vm3, %v4641_v43  ;;  %v536_v56 = vrot.slane %v535_v44, 4  ;;  %v567_v59 = vshrl.u32 %v4639_v42, 16  ;;  %v570_v60 = vshll.u32 %v4639_v42, 16  ;;  %3886 = vmatmul.mubr.msk.bf16.gmra.mrb[4].mxu0 %vm832_vm3, %v4641_v43  ;;  %v531_v61 = vsel %vm4516_vm4, %v526_v50, %v530_v29 }
  0x32   : > { %v549_v63 = vor.u32 %v548_v51, %v545_v49  ;;  %v558_v0 = vrot.slane %v556_v55, 4  ;;  %v576_v12 = vshll.u32 %v4644_v6, 16  ;;  %v564_v21 = vrot.slane %v562_v58, 5 }
  0x33   : > { %v541_v17 = vsel %vm4516_vm4, %v536_v56, %v540_v47  ;;  %v569_v22 = vrot.slane %v567_v59, 4  ;;  %v572_v26 = vrot.slane %v570_v60, 5  ;;  %v580_v36 = vshrl.u32 %v4644_v6, 16  ;;  %v4680_v47 = vld [vmem:[%s4469_s8 + $0x68] sm:$0x1] }
  0x34   : > { %v4668_v7 = vcombine.low %v531_v61, %v541_v17  ;;  %v550_v29 = vrot.slane %v549_v63, 4  ;;  %v559_v30 = vor.u32 %v558_v0, %v554_v54  ;;  %v578_v31 = vrot.slane %v576_v12, 5 }
  0x35   : > { %v573_v35 = vor.u32 %v572_v26, %v569_v22  ;;  %v586_v37 = vshll.u32 %v4657_v11, 16  ;;  %v591_v40 = vshrl.u32 %v4661_v15, 16  ;;  %v594_v49 = vshll.u32 %v4661_v15, 16 }
  0x36   : > { %5527 = vst [vmem:[#allocation7_spill] sm:$0xff] %v4668_v7  ;;  %3889 = vmatprep.mubr.msk.bf16.mxu0 %vm832_vm3, %v4668_v7  ;;  %3754 = vmatmul.mubr.msk.bf16.gmra.mrb[8].mxu1 %vm832_vm3, %v4668_v7  ;;  %v555_v41 = vsel %vm4516_vm4, %v550_v29, %v554_v54  ;;  %v560_v44 = vrot.slane %v559_v30, 4  ;;  %v600_v50 = vshll.u32 %v4666_v27, 16  ;;  %v582_v55 = vrot.slane %v580_v36, 4  ;;  %v4688_v54 = vld [vmem:[%s4469_s8 + $0x6c] sm:$0xf] }
  0x37   : > { %v574_v51 = vrot.slane %v573_v35, 4  ;;  %v588_v56 = vrot.slane %v586_v37, 5  ;;  %v593_v58 = vrot.slane %v591_v40, 4  ;;  %v596_v60 = vrot.slane %v594_v49, 5  ;;  %v4704_v36 = vld [vmem:[%s4469_s8 + $0x70] sm:$0xf] }
  0x38   : > { %v565_v59 = vsel %vm4516_vm4, %v560_v44, %v564_v21  ;;  %v602_v61 = vrot.slane %v600_v50, 5  ;;  %v604_v63 = vshrl.u32 %v4666_v27, 16  ;;  %v583_v17 = vor.u32 %v582_v55, %v578_v31  ;;  %v4855_v7 = vld [vmem:[%s4469_s8 + $0xa0] sm:$0xf] }
  0x39   : > { %v4690_v0 = vcombine.low %v555_v41, %v565_v59  ;;  %v579_v12 = vsel %vm4516_vm4, %v574_v51, %v578_v31  ;;  %v610_v22 = vshll.u32 %v4680_v47, 16  ;;  %v597_v21 = vor.u32 %v596_v60, %v593_v58  ;;  %v4717_v51 = vld [vmem:[%s4469_s8 + $0x74] sm:$0x1] }
  0x3a   : > { %v606_v29 = vrot.slane %v604_v63, 4  ;;  %v3427_v30 = vrot.slane %v4494_v16, 9  ;;  %v1366_v35 = vrot.slane %v4497_v18, 5  ;;  %v584_v31 = vrot.slane %v583_v17, 4 }
  0x3b   : > { %5528 = vst [vmem:[#allocation8_spill] sm:$0xff] %v4690_v0  ;;  %3890 = vmatmul.mubr.msk.bf16.gmra.mrb[8].mxu0 %vm832_vm3, %v4690_v0  ;;  %3757 = vmatprep.mubr.msk.bf16.mxu1 %vm832_vm3, %v4690_v0  ;;  %v612_v37 = vrot.slane %v610_v22, 5  ;;  %v615_v40 = vshrl.u32 %v4688_v54, 16  ;;  %v618_v41 = vshll.u32 %v4688_v54, 16  ;;  %v598_v44 = vrot.slane %v597_v21, 4 }
  0x3c   : > { %v607_v49 = vor.u32 %v606_v29, %v602_v61  ;;  %v1367_v16 = vsel %vm4697_vm7, %v3427_v30, %v1366_v35  ;;  %v1368_v18 = vrot.slane %v1366_v35, 4  ;;  %v589_v50 = vsel %vm4516_vm4, %v584_v31, %v588_v56  ;;  %v4729_v56 = vld [vmem:[%s4469_s8 + $0x78] sm:$0xf]  ;;  %v4745_v31 = vld [vmem:[%s4469_s8 + $0x7c] sm:$0xf] }
  0x3d   : > { %v617_v55 = vrot.slane %v615_v40, 4  ;;  %v620_v58 = vrot.slane %v618_v41, 5  ;;  %v624_v59 = vshll.u32 %v4704_v36, 16  ;;  %v4720_v60 = vcombine.low %v579_v12, %v589_v50 }
  0x3e   : > { %v603_v63 = vsel %vm4516_vm4, %v598_v44, %v602_v61  ;;  %v608_v17 = vrot.slane %v607_v49, 4  ;;  %v1370_v22 = vsel %vm4697_vm7, %v1368_v18, %v1369_v45  ;;  %v628_v35 = vshrl.u32 %v4704_v36, 16  ;;  %v4750_v49 = vld [vmem:[%s4469_s8 + $0x80] sm:$0x1] }
  0x3f   : > { %5531 = vst [vmem:[#allocation9_spill] sm:$0xff] %v4720_v60  ;;  %v4731_v21 = vcombine.low %v1367_v16, %v1370_v22  ;;  %v621_v29 = vor.u32 %v620_v58, %v617_v55  ;;  %v626_v30 = vrot.slane %v624_v59, 5  ;;  %3893 = vmatprep.mubr.msk.bf16.mxu0 %vm832_vm3, %v4720_v60  ;;  %3758 = vmatmul.mubr.msk.bf16.gmra.mrb[12].mxu1 %vm832_vm3, %v4720_v60  ;;  %v634_v45 = vshll.u32 %v4717_v51, 16  ;;  %v4848_v60 = vld [vmem:[%s4469_s8 + $0x9c] sm:$0xf] }
  0x40   : > { %v613_v19 = vsel %vm4516_vm4, %v608_v17, %v612_v37  ;;  %v3428_v61 = vrot.slane %v4512_v33, 9  ;;  %v1375_v12 = vrot.slane %v1373_v1, 4  ;;  %v630_v44 = vrot.slane %v628_v35, 4 }
  0x41   : > { %5532 = vst [vmem:[#allocation10_spill] sm:$0xff] %v4731_v21  ;;  %v4747_v40 = vcombine.low %v603_v63, %v613_v19  ;;  %v622_v41 = vrot.slane %v621_v29, 4  ;;  %v639_v16 = vshrl.u32 %v4729_v56, 16  ;;  %v636_v18 = vrot.slane %v634_v45, 5  ;;  %v4776_v29 = vld [vmem:[%s4469_s8 + $0x84] sm:$0xf] }
  0x42   : > { %v1374_v37 = vsel %vm4697_vm7, %v3428_v61, %v1373_v1  ;;  %v1377_v50 = vsel %vm4697_vm7, %v1375_v12, %v1376_v2  ;;  %v642_v55 = vshll.u32 %v4729_v56, 16  ;;  %v631_v59 = vor.u32 %v630_v44, %v626_v30 }
  0x43   : > { %5533 = vst [vmem:[#allocation11_spill] sm:$0xff] %v4747_v40  ;;  %3894 = vmatmul.mubr.msk.bf16.gmra.mrb[12].mxu0 %vm832_vm3, %v4747_v40  ;;  %3761 = vmatprep.mubr.msk.bf16.mxu1 %vm832_vm3, %v4747_v40  ;;  %v627_v58 = vsel %vm4516_vm4, %v622_v41, %v626_v30  ;;  %v4768_v63 = vcombine.low %v1374_v37, %v1377_v50  ;;  %v641_v1 = vrot.slane %v639_v16, 4  ;;  %v648_v2 = vshll.u32 %v4745_v31, 16  ;;  %v4782_v16 = vld [vmem:[%s4469_s8 + $0x88] sm:$0xf] }
  0x44   : > { %3915 = vmatprep.mubr.msk.bf16.mxu0 %vm832_vm3, %v4731_v21  ;;  %v644_v46 = vrot.slane %v642_v55, 5  ;;  %v652_v17 = vshrl.u32 %v4745_v31, 16  ;;  %v658_v22 = vshll.u32 %v4750_v49, 16  ;;  %v632_v35 = vrot.slane %v631_v59, 4 }
  0x45   : > { %5534 = vst [vmem:[#allocation12_spill] sm:$0xff] %v4768_v63  ;;  %v3429_v30 = vrot.slane %v4539_v57, 9  ;;  %v1380_v19 = vrot.slane %v4544_v62, 5  ;;  %v1383_v45 = vrot.slane %v4552_v4, 5  ;;  %v650_v12 = vrot.slane %v648_v2, 5 }
  0x46   : > { %v645_v61 = vor.u32 %v644_v46, %v641_v1  ;;  %v654_v41 = vrot.slane %v652_v17, 4  ;;  %v660_v44 = vrot.slane %v658_v22, 5  ;;  %v637_v37 = vsel %vm4516_vm4, %v632_v35, %v636_v18  ;;  %v4792_v1 = vld [vmem:[%s4469_s8 + $0x8c] sm:$0x1] }
  0x47   : > { %v1381_v50 = vsel %vm4697_vm7, %v3429_v30, %v1380_v19  ;;  %v1382_v55 = vrot.slane %v1380_v19, 4  ;;  %v663_v59 = vshrl.u32 %v4776_v29, 16  ;;  %v4789_v3 = vcombine.low %v627_v58, %v637_v37 }
  0x48   : > { %v646_v40 = vrot.slane %v645_v61, 4  ;;  %v655_v4 = vor.u32 %v654_v41, %v650_v12  ;;  %v666_v46 = vshll.u32 %v4776_v29, 16  ;;  %v672_v18 = vshll.u32 %v4782_v16, 16  ;;  %v4806_v61 = vld [vmem:[%s4469_s8 + $0x90] sm:$0xf] }
  0x49   : > { %5535 = vst [vmem:[#allocation13_spill] sm:$0xff] %v4789_v3  ;;  %v1384_v2 = vsel %vm4697_vm7, %v1382_v55, %v1383_v45  ;;  %v665_v17 = vrot.slane %v663_v59, 4  ;;  %v676_v22 = vshrl.u32 %v4782_v16, 16  ;;  %3762 = vmatmul.mubr.msk.bf16.gmra.mrb[16].mxu1 %vm832_vm3, %v4789_v3  ;;  %v4811_v45 = vld [vmem:[%s5485_s2 + $0x1c] sm:$0xf]  ;;  %v1387_v59 = vrot.slane %v4570_v28, 5 }
  0x4a   : > { %v651_v58 = vsel %vm4516_vm4, %v646_v40, %v650_v12  ;;  %v656_v35 = vrot.slane %v655_v4, 4  ;;  %v4803_v30 = vcombine.low %v1381_v50, %v1384_v2  ;;  %v668_v19 = vrot.slane %v666_v46, 5  ;;  %5537 = vst [vmem:[#allocation15_spill] sm:$0xff] %v4811_v45  ;;  %v4825_v46 = vld [vmem:[%s4469_s8 + $0x94] sm:$0xf] }
  0x4b   : > { %3916 = vmatmul.mubr.msk.bf16.vlgmr.msra.gmra.mrb[0].mxu0 %vm832_vm3, %v4768_v63  ;;  %v674_v41 = vrot.slane %v672_v18, 5  ;;  %v678_v37 = vrot.slane %v676_v22, 4  ;;  %v682_v40 = vshll.u32 %v4792_v1, 16  ;;  %v3430_v12 = vrot.slane %v4558_v14, 9  ;;  %v4830_v3 = vld [vmem:[%s4469_s8 + $0x98] sm:$0x1] }
  0x4c   : > { %5536 = vst [vmem:[#allocation14_spill] sm:$0xff] %v4803_v30  ;;  %3948 = vmatpush3.bf16.msra.mxu0 %v4504_v20  ;;  %v661_v50 = vsel %vm4516_vm4, %v656_v35, %v660_v44  ;;  %3919 = vmatprep.mubr.msk.bf16.mxu0 %vm832_vm3, %v4803_v30  ;;  %v669_v55 = vor.u32 %v668_v19, %v665_v17  ;;  %v1390_v4 = vrot.slane %v4577_v32, 5  ;;  %v687_v20 = vshrl.u32 %v4806_v61, 16 }
  0x4d   : > { %v4827_v2 = vcombine.low %v651_v58, %v661_v50  ;;  %v679_v18 = vor.u32 %v678_v37, %v674_v41  ;;  %v684_v22 = vrot.slane %v682_v40, 5  ;;  %4315 = vmatprep.subr.msk.bf16.mxu0 %vm881_vm0, %v4811_v45  ;;  %v1388_v17 = vsel %vm4697_vm7, %v3430_v12, %v1387_v59 }
  0x4e   : > { %v670_v44 = vrot.slane %v669_v55, 4  ;;  %v1389_v35 = vrot.slane %v1387_v59, 4  ;;  %v690_v32 = vshll.u32 %v4806_v61, 16  ;;  %v689_v19 = vrot.slane %v687_v20, 4 }
  0x4f   : > { %5538 = vst [vmem:[#allocation16_spill] sm:$0xff] %v4827_v2  ;;  %3765 = vmatprep.mubr.msk.bf16.mxu1 %vm832_vm3, %v4827_v2  ;;  %v680_v58 = vrot.slane %v679_v18, 4  ;;  %v696_v37 = vshll.u32 %v4825_v46, 16  ;;  %v700_v40 = vshrl.u32 %v4825_v46, 16  ;;  %v706_v59 = vshll.u32 %v4830_v3, 16 }
  0x50   : > { %v675_v50 = vsel %vm4516_vm4, %v670_v44, %v674_v41  ;;  %v1391_v55 = vsel %vm4697_vm7, %v1389_v35, %v1390_v4  ;;  %v692_v12 = vrot.slane %v690_v32, 5  ;;  %v3431_v4 = vrot.slane %v4585_v48, 9 }
  0x51   : > { %v685_v2 = vsel %vm4516_vm4, %v680_v58, %v684_v22  ;;  %v4852_v18 = vcombine.low %v1388_v17, %v1391_v55  ;;  %v698_v20 = vrot.slane %v696_v37, 5  ;;  %v702_v0 = vrot.slane %v700_v40, 4  ;;  %v4868_v58 = vld [vmem:[%s4469_s8 + $0xa4] sm:$0x1] }
  0x52   : > { %v4857_v43 = vcombine.low %v675_v50, %v685_v2  ;;  %v693_v41 = vor.u32 %v692_v12, %v689_v19  ;;  %v708_v44 = vrot.slane %v706_v59, 5  ;;  %v1394_v32 = vrot.slane %v4593_v52, 5 }
  0x53   : > { %5539 = vst [vmem:[#allocation17_spill] sm:$0xff] %v4852_v18  ;;  %3920 = vmatmul.mubr.msk.bf16.gmra.mrb[4].mxu0 %vm832_vm3, %v4852_v18  ;;  %v703_v35 = vor.u32 %v702_v0, %v698_v20  ;;  %v1397_v22 = vrot.slane %v4605_v5, 5  ;;  %v711_v17 = vshrl.u32 %v4848_v60, 16  ;;  %v714_v19 = vshll.u32 %v4848_v60, 16 }
  0x54   : > { %5540 = vst [vmem:[#allocation18_spill] sm:$0xff] %v4857_v43  ;;  %3766 = vmatmul.mubr.msk.bf16.gmra.mrb[20].mxu1 %vm832_vm3, %v4857_v43  ;;  %v694_v2 = vrot.slane %v693_v41, 4  ;;  %v720_v37 = vshll.u32 %v4855_v7, 16  ;;  %v724_v0 = vshrl.u32 %v4855_v7, 16  ;;  %v1395_v5 = vsel %vm4697_vm7, %v3431_v4, %v1394_v32 }
  0x55   : > { %v704_v40 = vrot.slane %v703_v35, 4  ;;  %v1396_v50 = vrot.slane %v1394_v32, 4  ;;  %v713_v55 = vrot.slane %v711_v17, 4  ;;  %v716_v59 = vrot.slane %v714_v19, 5  ;;  %v4887_v32 = vld [vmem:[%s4469_s8 + $0xac] sm:$0xf] }
  0x56   : > { %v699_v12 = vsel %vm4516_vm4, %v694_v2, %v698_v20  ;;  %v722_v41 = vrot.slane %v720_v37, 5  ;;  %v726_v43 = vrot.slane %v724_v0, 4  ;;  %v730_v35 = vshll.u32 %v4868_v58, 16 }
  0x57   : > { %v709_v53 = vsel %vm4516_vm4, %v704_v40, %v708_v44  ;;  %v1398_v18 = vsel %vm4697_vm7, %v1396_v50, %v1397_v22  ;;  %v3432_v4 = vrot.slane %v4610_v13, 9  ;;  %v717_v2 = vor.u32 %v716_v59, %v713_v55 }
  0x58   : > { %v4889_v17 = vcombine.low %v699_v12, %v709_v53  ;;  %v4891_v20 = vcombine.low %v1395_v5, %v1398_v18  ;;  %v727_v19 = vor.u32 %v726_v43, %v722_v41  ;;  %v732_v37 = vrot.slane %v730_v35, 5  ;;  %v4901_v18 = vld [vmem:[%s4469_s8 + $0xb0] sm:$0x1] }
  0x59   : > { %v1401_v0 = vrot.slane %v4617_v24, 5  ;;  %v1404_v44 = vrot.slane %v4634_v8, 5  ;;  %v735_v22 = vshrl.u32 %v4878_v25, 16  ;;  %v718_v53 = vrot.slane %v717_v2, 4 }
  0x5a   : > { %5541 = vst [vmem:[#allocation19_spill] sm:$0xff] %v4889_v17  ;;  %5542 = vst [vmem:[#allocation20_spill] sm:$0xff] %v4891_v20  ;;  %3769 = vmatprep.mubr.msk.bf16.mxu1 %vm832_vm3, %v4889_v17  ;;  %3923 = vmatprep.mubr.msk.bf16.mxu0 %vm832_vm3, %v4891_v20  ;;  %v728_v40 = vrot.slane %v727_v19, 4  ;;  %v738_v43 = vshll.u32 %v4878_v25, 16  ;;  %v744_v5 = vshll.u32 %v4887_v32, 16  ;;  %v748_v12 = vshrl.u32 %v4887_v32, 16 }
  0x5b   : > { %v1402_v8 = vsel %vm4697_vm7, %v3432_v4, %v1401_v0  ;;  %v1403_v50 = vrot.slane %v1401_v0, 4  ;;  %v737_v55 = vrot.slane %v735_v22, 4  ;;  %v723_v59 = vsel %vm4516_vm4, %v718_v53, %v722_v41  ;;  %v4913_v17 = vld [vmem:[%s4469_s8 + $0xb4] sm:$0xf]  ;;  %v4925_v53 = vld [vmem:[%s4469_s8 + $0xb8] sm:$0xf] }
  0x5c   : > { %v733_v35 = vsel %vm4516_vm4, %v728_v40, %v732_v37  ;;  %v740_v2 = vrot.slane %v738_v43, 5  ;;  %v746_v19 = vrot.slane %v744_v5, 5  ;;  %v750_v0 = vrot.slane %v748_v12, 4 }
  0x5d   : > { %v4915_v20 = vcombine.low %v723_v59, %v733_v35  ;;  %v1405_v4 = vsel %vm4697_vm7, %v1403_v50, %v1404_v44  ;;  %v754_v22 = vshll.u32 %v4901_v18, 16  ;;  %v3433_v41 = vrot.slane %v4639_v42, 9  ;;  %v4931_v44 = vld [vmem:[%s4469_s8 + $0xbc] sm:$0x1] }
  0x5e   : > { %v4920_v30 = vcombine.low %v1402_v8, %v1405_v4  ;;  %v741_v63 = vor.u32 %v740_v2, %v737_v55  ;;  %v1408_v37 = vrot.slane %v4644_v6, 5  ;;  %v751_v40 = vor.u32 %v750_v0, %v746_v19 }
  0x5f   : > { %5543 = vst [vmem:[#allocation21_spill] sm:$0xff] %v4915_v20  ;;  %3770 = vmatmul.mubr.msk.bf16.gmra.mrb[24].mxu1 %vm832_vm3, %v4915_v20  ;;  %v756_v43 = vrot.slane %v754_v22, 5  ;;  %v1411_v5 = vrot.slane %v4657_v11, 5  ;;  %v759_v50 = vshrl.u32 %v4913_v17, 16  ;;  %v762_v59 = vshll.u32 %v4913_v17, 16 }
  0x60   : > { %5544 = vst [vmem:[#allocation22_spill] sm:$0xff] %v4920_v30  ;;  %3924 = vmatmul.mubr.msk.bf16.gmra.mrb[8].mxu0 %vm832_vm3, %v4920_v30  ;;  %v742_v8 = vrot.slane %v741_v63, 4  ;;  %v1409_v55 = vsel %vm4697_vm7, %v3433_v41, %v1408_v37  ;;  %v1410_v12 = vrot.slane %v1408_v37, 4  ;;  %v752_v35 = vrot.slane %v751_v40, 4 }
  0x61   : > { %v761_v2 = vrot.slane %v759_v50, 4  ;;  %v768_v4 = vshll.u32 %v4925_v53, 16  ;;  %v772_v11 = vshrl.u32 %v4925_v53, 16  ;;  %v764_v20 = vrot.slane %v762_v59, 5 }
  0x62   : > { %v747_v0 = vsel %vm4516_vm4, %v742_v8, %v746_v19  ;;  %v1412_v22 = vsel %vm4697_vm7, %v1410_v12, %v1411_v5  ;;  %v778_v63 = vshll.u32 %v4931_v44, 16  ;;  %v757_v41 = vsel %vm4516_vm4, %v752_v35, %v756_v43 }
  0x63   : > { %v4948_v37 = vcombine.low %v1409_v55, %v1412_v22  ;;  %v770_v40 = vrot.slane %v768_v4, 5  ;;  %v774_v50 = vrot.slane %v772_v11, 4  ;;  %v4950_v30 = vcombine.low %v747_v0, %v757_v41 }
  0x64   : > { %v765_v21 = vor.u32 %v764_v20, %v761_v2  ;;  %v780_v45 = vrot.slane %v778_v63, 5  ;;  %v3434_v42 = vrot.slane %v4661_v15, 9  ;;  %v1415_v5 = vrot.slane %v4666_v27, 5 }
  0x65   : > { %3927 = vmatprep.mubr.msk.bf16.mxu0 %vm832_vm3, %v4948_v37  ;;  %v775_v19 = vor.u32 %v774_v50, %v770_v40  ;;  %v1418_v8 = vrot.slane %v4680_v47, 5  ;;  %v3435_v43 = vrot.slane %v4688_v54, 9  ;;  %3773 = vmatprep.mubr.msk.bf16.mxu1 %vm832_vm3, %v4950_v30  ;;  %v3394_v20 = vcombine.low %v4483_v9, %v4486_v10 }
  0x66   : > { %v766_v55 = vrot.slane %v765_v21, 4  ;;  %v1422_v12 = vrot.slane %v4704_v36, 5  ;;  %v1425_v59 = vrot.slane %v4717_v51, 5  ;;  %v1416_v2 = vsel %vm4697_vm7, %v3434_v42, %v1415_v5 }
  0x67   : > { %v776_v35 = vrot.slane %v775_v19, 4  ;;  %v1417_v4 = vrot.slane %v1415_v5, 4  ;;  %v1429_v47 = vrot.slane %v4745_v31, 5  ;;  %v3436_v9 = vrot.slane %v4729_v56, 9 }
  0x68   : > { %v771_v11 = vsel %vm4516_vm4, %v766_v55, %v770_v40  ;;  %v1423_v21 = vsel %vm4697_vm7, %v3435_v43, %v1422_v12  ;;  %v1424_v0 = vrot.slane %v1422_v12, 4  ;;  %v1432_v42 = vrot.slane %v4750_v49, 5 }
  0x69   : > { %v781_v10 = vsel %vm4516_vm4, %v776_v35, %v780_v45  ;;  %v1419_v51 = vsel %vm4697_vm7, %v1417_v4, %v1418_v8  ;;  %v1431_v22 = vrot.slane %v1429_v47, 4  ;;  %v3437_v19 = vrot.slane %v4776_v29, 9 }
  0x6a   : > { %v4977_v63 = vcombine.low %v771_v11, %v781_v10  ;;  %v4979_v41 = vcombine.low %v1416_v2, %v1419_v51  ;;  %v1426_v40 = vsel %vm4697_vm7, %v1424_v0, %v1425_v59  ;;  %v1436_v5 = vrot.slane %v4782_v16, 5 }
  0x6b   : > { %v4983_v50 = vcombine.low %v1423_v21, %v1426_v40  ;;  %v1439_v49 = vrot.slane %v4792_v1, 5  ;;  %v1430_v45 = vsel %vm4697_vm7, %v3436_v9, %v1429_v47  ;;  %v1433_v8 = vsel %vm4697_vm7, %v1431_v22, %v1432_v42 }
  0x6c   : > { %3774 = vmatmul.mubr.msk.bf16.gmra.mrb[28].mxu1 %vm832_vm3, %v4977_v63  ;;  %3928 = vmatmul.mubr.msk.bf16.gmra.mrb[12].mxu0 %vm832_vm3, %v4979_v41  ;;  %v1438_v43 = vrot.slane %v1436_v5, 4  ;;  %v1443_v55 = vrot.slane %v4825_v46, 5  ;;  %v1450_v12 = vrot.slane %v4855_v7, 5  ;;  %v1437_v59 = vsel %vm4697_vm7, %v3437_v19, %v1436_v5 }
  0x6d   : > { %3779 = vmatprep.mubr.msk.bf16.mxu1 %vm832_vm3, %v3394_v20  ;;  %3931 = vmatprep.mubr.msk.bf16.mxu0 %vm832_vm3, %v4983_v50  ;;  %v5005_v20 = vcombine.low %v1430_v45, %v1433_v8  ;;  %v3438_v35 = vrot.slane %v4806_v61, 9  ;;  %v1446_v4 = vrot.slane %v4830_v3, 5  ;;  %v5011_v47 = vcombine.low %v4512_v33, %v4525_v39  ;;  %v5023_v3 = vld [vmem:[%s5485_s2 + $0xc] sm:$0xf] }
  0x6e   : > { %v1440_v1 = vsel %vm4697_vm7, %v1438_v43, %v1439_v49  ;;  %v1445_v2 = vrot.slane %v1443_v55, 4  ;;  %v3439_v11 = vrot.slane %v4848_v60, 9  ;;  %v1568_v21 = vsel %vm881_vm0, %v4565_v23, 0 }
  0x6f   : > { %v5016_v0 = vcombine.low %v1437_v59, %v1440_v1  ;;  %v1452_v9 = vrot.slane %v1450_v12, 4  ;;  %v1453_v10 = vrot.slane %v4868_v58, 5  ;;  %v1457_v51 = vrot.slane %v4887_v32, 5 }
  0x70   : > { %v1444_v33 = vsel %vm4697_vm7, %v3438_v35, %v1443_v55  ;;  %v1447_v39 = vsel %vm4697_vm7, %v1445_v2, %v1446_v4  ;;  %v5039_v23 = vcombine.low %v4539_v57, %v4544_v62  ;;  %v1451_v58 = vsel %vm4697_vm7, %v3439_v11, %v1450_v12 }
  0x71   : > { %v5045_v22 = vcombine.low %v4661_v15, %v4666_v27  ;;  %v1454_v42 = vsel %vm4697_vm7, %v1452_v9, %v1453_v10  ;;  %v3440_v40 = vrot.slane %v4878_v25, 9  ;;  %v1464_v19 = vrot.slane %v4925_v53, 5 }
  0x72   : > { %v5055_v57 = vcombine.low %v4688_v54, %v4704_v36  ;;  %v5059_v62 = vcombine.low %v1444_v33, %v1447_v39  ;;  %v1459_v15 = vrot.slane %v1457_v51, 4  ;;  %v1460_v27 = vrot.slane %v4901_v18, 5 }
  0x73   : > { %v5069_v5 = vcombine.low %v4729_v56, %v4745_v31  ;;  %v5073_v54 = vcombine.low %v4776_v29, %v4782_v16  ;;  %v5077_v36 = vcombine.low %v4806_v61, %v4825_v46  ;;  %v5081_v18 = vcombine.low %v4848_v60, %v4855_v7  ;;  %v5100_v61 = vld [vmem:[%s5065_s24 + $0x4] sm:$0xf] }
  0x74   : > { %3780 = vmatmul.mubr.msk.bf16.vlgmr.msra.gmra.mrb[0].mxu1 %vm832_vm3, %v4522_v38  ;;  %3932 = vmatmul.mubr.msk.bf16.gmra.mrb[16].mxu0 %vm832_vm3, %v5005_v20  ;;  %v5085_v49 = vcombine.low %v4878_v25, %v4887_v32  ;;  %v5089_v56 = vcombine.low %v4558_v14, %v4570_v28  ;;  %v5091_v31 = vcombine.low %v1451_v58, %v1454_v42  ;;  %v3441_v16 = vrot.slane %v4913_v17, 9  ;;  %v5545_v42 = vld [vmem:[#allocation5_spill] sm:$0xff] }
  0x75   : > { %3812 = vmatpush3.bf16.msra.mxu1 %v1568_v21  ;;  %3783 = vmatprep.mubr.msk.bf16.mxu1 %vm832_vm3, %v5011_v47  ;;  %v5095_v29 = vcombine.low %v4913_v17, %v4925_v53  ;;  %v1466_v7 = vrot.slane %v1464_v19, 4  ;;  %v1467_v60 = vrot.slane %v4931_v44, 5  ;;  %v1458_v14 = vsel %vm4697_vm7, %v3440_v40, %v1457_v51  ;;  %v5120_v17 = vld [vmem:[%s5065_s24] sm:$0xf]  ;;  %v390_v53 = vld [vmem:[%s5065_s24 + $0x8] sm:$0x1] }
  0x76   : > { %3935 = vmatprep.mubr.msk.bf16.mxu0 %vm832_vm3, %v5016_v0  ;;  %4310 = vmatprep.subr.msk.bf16.mxu1 %vm881_vm0, %v5023_v3  ;;  %v1461_v28 = vsel %vm4697_vm7, %v1459_v15, %v1460_v27  ;;  %v2200_v25 = vrot.slane %v5100_v61, 5  ;;  %v1465_v46 = vsel %vm4697_vm7, %v3441_v16, %v1464_v19  ;;  %v5125_v44 = vcombine.low %v4585_v48, %v4593_v52 }
  0x77   : > { %v1468_v32 = vsel %vm4697_vm7, %v1466_v7, %v1467_v60  ;;  %v5127_v45 = vcombine.low %v1458_v14, %v1461_v28  ;;  %v5131_v8 = vcombine.low %v4610_v13, %v4617_v24  ;;  %v1970_v43 = vshrl.u32 %v5120_v17, 16  ;;  %v3567_v60 = vld [vmem:[%s5485_s2 + $0x20] sm:$0xf]  ;;  %v4363_v14 = vld [vmem:[%s4469_s8 + $0x4] sm:$0xf] }
  0x78   : > { %v1973_v55 = vshll.u32 %v5120_v17, 16  ;;  %v1979_v12 = vshll.u32 %v5100_v61, 16  ;;  %v1983_v59 = vshrl.u32 %v5100_v61, 16  ;;  %v5137_v1 = vcombine.low %v1465_v46, %v1468_v32  ;;  %v4365_v32 = vld [vmem:[%s4469_s8] sm:$0xf] }
  0x79   : > { %v3511_v35 = vrot.slane %v5120_v17, 9  ;;  %v2202_v48 = vrot.slane %v2200_v25, 4  ;;  %v2203_v52 = vrot.slane %v390_v53, 5  ;;  %v1972_v2 = vrot.slane %v1970_v43, 4 }
  0x7a   : > { %v1975_v4 = vrot.slane %v1973_v55, 5  ;;  %v1981_v11 = vrot.slane %v1979_v12, 5  ;;  %v1985_v21 = vrot.slane %v1983_v59, 4  ;;  %v1989_v9 = vshll.u32 %v390_v53, 16 }
  0x7b   : > { %v2201_v10 = vsel %vm4697_vm7, %v3511_v35, %v2200_v25  ;;  %v2204_v51 = vsel %vm4697_vm7, %v2202_v48, %v2203_v52  ;;  %v5154_v40 = vcombine.low %v5545_v42, %v4644_v6  ;;  %v5546_v6 = vld [vmem:[#allocation15_spill] sm:$0xff]  ;;  %v1359_v28 = vrot.slane %v4363_v14, 5  ;;  %v5547_v48 = vld [vmem:[#allocation10_spill] sm:$0xff]  ;;  %v5548_v52 = vld [vmem:[#allocation12_spill] sm:$0xff] }
  0x7c   : > { %3784 = vmatmul.mubr.msk.bf16.gmra.mrb[4].mxu1 %vm832_vm3, %v5039_v23  ;;  %3936 = vmatmul.mubr.msk.bf16.gmra.mrb[20].mxu0 %vm832_vm3, %v5059_v62  ;;  %v1976_v13 = vor.u32 %v1975_v4, %v1972_v2  ;;  %v1986_v24 = vor.u32 %v1985_v21, %v1981_v11  ;;  %v1991_v58 = vrot.slane %v1989_v9, 5  ;;  %v5156_v19 = vcombine.low %v2201_v10, %v2204_v51  ;;  %v4364_v25 = vld [vmem:[%s4469_s8 + $0x8] sm:$0x1]  ;;  %v4366_v2 = vld [vmem:[%s5485_s2 + $0x10] sm:$0xf]  ;;  %v5550_v4 = vld [vmem:[#allocation17_spill] sm:$0xff] }
  0x7d   : > { %3787 = vmatprep.mubr.msk.bf16.mxu1 %vm832_vm3, %v5089_v56  ;;  %3939 = vmatprep.mubr.msk.bf16.mxu0 %vm832_vm3, %v5091_v31  ;;  %v2648_v7 = vsel %vm881_vm0, %v5546_v6, 0  ;;  %v1362_v46 = vrot.slane %v4364_v25, 5  ;;  %v3426_v53 = vrot.slane %v4365_v32, 9  ;;  %v1361_v43 = vrot.slane %v1359_v28, 4  ;;  %v5551_v21 = vld [vmem:[#allocation20_spill] sm:$0xff]  ;;  %v5558_v42 = vld [vmem:[#allocation9_spill] sm:$0xff] }
  0x7e   : > { %v1977_v33 = vrot.slane %v1976_v13, 4  ;;  %v1987_v39 = vrot.slane %v1986_v24, 4  ;;  %v1774_v35 = vsel %vm881_vm0, %v5023_v3, 0  ;;  %v5549_v3 = vld [vmem:[#allocation14_spill] sm:$0xff]  ;;  %v5251_v24 = vld [vmem:[%s5065_s24 + $0xc] sm:$0xf] }
  0x7f   : > { %v1360_v55 = vsel %vm4697_vm7, %v3426_v53, %v1359_v28  ;;  %v1363_v12 = vsel %vm4697_vm7, %v1361_v43, %v1362_v46  ;;  %v5552_v13 = vld [vmem:[#allocation22_spill] sm:$0xff]  ;;  %v5254_v9 = vld [vmem:[%s5065_s24 + $0x10] sm:$0xf]  ;;  %v2860_v10 = vsel %vm881_vm0, %v3567_v60, 0  ;;  %v2619_v14 = vshll.u32 %v5251_v24, 16  ;;  %v5564_v46 = vld [vmem:[#allocation19_spill] sm:$0xff] }
  0x80   : > { %v1982_v15 = vsel %vm4516_vm4, %v1977_v33, %v1981_v11  ;;  %v1992_v27 = vsel %vm4516_vm4, %v1987_v39, %v1991_v58  ;;  %v3443_v59 = vcombine.low %v1360_v55, %v1363_v12  ;;  %v5240_v11 = vcombine.low %v5120_v17, %v5100_v61  ;;  %v5553_v17 = vld [vmem:[#allocation3_spill] sm:$0xff]  ;;  %v5554_v51 = vld [vmem:[#allocation4_spill] sm:$0xff]  ;;  %v5555_v33 = vld [vmem:[#allocation6_spill] sm:$0xff] }
  0x81   : > { %v5162_v16 = vcombine.low %v1982_v15, %v1992_v27  ;;  %v3531_v61 = vcombine.low %v5251_v24, %v5254_v9  ;;  %v5556_v39 = vld [vmem:[#allocation7_spill] sm:$0xff]  ;;  %v5557_v58 = vld [vmem:[#allocation8_spill] sm:$0xff]  ;;  %v5560_v27 = vld [vmem:[#allocation13_spill] sm:$0xff]  ;;  %v2629_v28 = vshrl.u32 %v5254_v9, 16  ;;  %v2621_v32 = vrot.slane %v2619_v14, 5 }
  0x82   : > { %v5559_v15 = vld [vmem:[#allocation11_spill] sm:$0xff]  ;;  %v5561_v6 = vld [vmem:[#allocation16_spill] sm:$0xff]  ;;  %v5563_v25 = vld [vmem:[#allocation2_spill] sm:$0xff]  ;;  %v2846_v34 = vrot.slane %v5254_v9, 5  ;;  %v4391_v26 = vmov 0.0  }
  0x83   : > { %v2631_v43 = vrot.slane %v2629_v28, 4  ;;  %v393_v55 = vld [vmem:[%s5065_s24 + $0x14] sm:$0x1]  ;;  %v5565_v12 = vld [vmem:[#allocation21_spill] sm:$0xff]  ;;  %3130 = vst [vmem:[%s5408_s6] sm:$0x1] %v4391_v26  ;;  %3131 = vst [vmem:[%s5414_s9] sm:$0x1] %v4391_v26 }
  0x84   : > { %3788 = vmatmul.mubr.msk.bf16.gmra.mrb[8].mxu1 %vm832_vm3, %v5125_v44  ;;  %3940 = vmatmul.mubr.msk.bf16.gmra.mrb[24].mxu0 %vm832_vm3, %v5127_v45 }
  0x85   : > { %3791 = vmatprep.mubr.msk.bf16.mxu1 %vm832_vm3, %v5131_v8  ;;  %3943 = vmatprep.mubr.msk.bf16.mxu0 %vm832_vm3, %v5137_v1 }
  0x8c   : > { %3792 = vmatmul.mubr.msk.bf16.gmra.mrb[12].mxu1 %vm832_vm3, %v5154_v40  ;;  %3944 = vmatmul.mubr.msk.bf16.gmra.mrb[28].mxu0 %vm832_vm3, %v5156_v19 }
  0x8d   : > { %3795 = vmatprep.mubr.msk.bf16.mxu1 %vm832_vm3, %v5045_v22  ;;  %3949 = vmatprep.mubr.msk.bf16.mxu0 %vm832_vm3, %v5011_v47 }
  0x94   : > { %3796 = vmatmul.mubr.msk.bf16.gmra.mrb[16].mxu1 %vm832_vm3, %v5055_v57  ;;  %3950 = vmatmul.mubr.msk.bf16.vlgmr.msra.gmra.mrb[0].mxu0 %vm832_vm3, %v5039_v23 }
  0x95   : > { %3982 = vmatpush3.bf16.msra.mxu0 %v2648_v7  ;;  %3799 = vmatprep.mubr.msk.bf16.mxu1 %vm832_vm3, %v5069_v5  ;;  %v5562_v7 = vld [vmem:[#allocation18_spill] sm:$0xff] }
  0x96   : > { %3953 = vmatprep.mubr.msk.bf16.mxu0 %vm832_vm3, %v5089_v56  ;;  %4316 = vmatprep.subr.msk.bf16.mxu0 %vm881_vm0, %v3567_v60  ;;  %v2616_v60 = vshrl.u32 %v5251_v24, 16 }
  0x9c   : > { %3800 = vmatmul.mubr.msk.bf16.gmra.mrb[20].mxu1 %vm832_vm3, %v5073_v54  ;;  %3954 = vmatmul.mubr.msk.bf16.gmra.mrb[4].mxu0 %vm832_vm3, %v5125_v44 }
  0x9d   : > { %3803 = vmatprep.mubr.msk.bf16.mxu1 %vm832_vm3, %v5077_v36  ;;  %3957 = vmatprep.mubr.msk.bf16.mxu0 %vm832_vm3, %v5131_v8 }
  0xa4   : > { %3804 = vmatmul.mubr.msk.bf16.gmra.mrb[24].mxu1 %vm832_vm3, %v5081_v18  ;;  %3958 = vmatmul.mubr.msk.bf16.gmra.mrb[8].mxu0 %vm832_vm3, %v5154_v40 }
  0xa5   : > { %3807 = vmatprep.mubr.msk.bf16.mxu1 %vm832_vm3, %v5085_v49  ;;  %3961 = vmatprep.mubr.msk.bf16.mxu0 %vm832_vm3, %v5045_v22 }
  0xac   : > { %3808 = vmatmul.mubr.msk.bf16.gmra.mrb[28].mxu1 %vm832_vm3, %v5095_v29  ;;  %3962 = vmatmul.mubr.msk.bf16.gmra.mrb[12].mxu0 %vm832_vm3, %v5055_v57 }
  0xad   : > { %3813 = vmatprep.mubr.msk.bf16.mxu1 %vm832_vm3, %v3443_v59  ;;  %3965 = vmatprep.mubr.msk.bf16.mxu0 %vm832_vm3, %v5069_v5 }
  0xb4   : > { %3814 = vmatmul.mubr.msk.bf16.vlgmr.msra.gmra.mrb[0].mxu1 %vm832_vm3, %v5547_v48  ;;  %3966 = vmatmul.mubr.msk.bf16.gmra.mrb[16].mxu0 %vm832_vm3, %v5073_v54 }
  0xb5   : > { %3846 = vmatpush3.bf16.msra.mxu1 %v1774_v35  ;;  %3817 = vmatprep.mubr.msk.bf16.mxu1 %vm832_vm3, %v5548_v52  ;;  %v2635_v35 = vshll.u32 %v393_v55, 16 }
  0xb6   : > { %3969 = vmatprep.mubr.msk.bf16.mxu0 %vm832_vm3, %v5077_v36  ;;  %4312 = vmatprep.subr.msk.bf16.mxu1 %vm881_vm0, %v4366_v2 }
  0xbc   : > { %3818 = vmatmul.mubr.msk.bf16.gmra.mrb[4].mxu1 %vm832_vm3, %v5549_v3  ;;  %3970 = vmatmul.mubr.msk.bf16.gmra.mrb[20].mxu0 %vm832_vm3, %v5081_v18 }
  0xbd   : > { %3821 = vmatprep.mubr.msk.bf16.mxu1 %vm832_vm3, %v5550_v4  ;;  %3973 = vmatprep.mubr.msk.bf16.mxu0 %vm832_vm3, %v5085_v49 }
  0xc4   : > { %3822 = vmatmul.mubr.msk.bf16.gmra.mrb[8].mxu1 %vm832_vm3, %v5551_v21  ;;  %3974 = vmatmul.mubr.msk.bf16.gmra.mrb[24].mxu0 %vm832_vm3, %v5095_v29 }
  0xc5   : > { %3825 = vmatprep.mubr.msk.bf16.mxu1 %vm832_vm3, %v5552_v13  ;;  %3977 = vmatprep.mubr.msk.bf16.mxu0 %vm832_vm3, %v5240_v11 }
  0xcc   : > { %3826 = vmatmul.mubr.msk.bf16.gmra.mrb[12].mxu1 %vm832_vm3, %v4948_v37  ;;  %3978 = vmatmul.mubr.msk.bf16.gmra.mrb[28].mxu0 %vm832_vm3, %v3531_v61  ;;  %v2637_v61 = vrot.slane %v2635_v35, 5 }
  0xcd   : > { %3829 = vmatprep.mubr.msk.bf16.mxu1 %vm832_vm3, %v4979_v41  ;;  %3983 = vmatprep.mubr.msk.bf16.mxu0 %vm832_vm3, %v5553_v17 }
  0xd4   : > { %3830 = vmatmul.mubr.msk.bf16.gmra.mrb[16].mxu1 %vm832_vm3, %v4983_v50  ;;  %3984 = vmatmul.mubr.msk.bf16.vlgmr.msra.gmra.mrb[0].mxu0 %vm832_vm3, %v5554_v51 }
  0xd5   : > { %4016 = vmatpush3.bf16.msra.mxu0 %v2860_v10  ;;  %3833 = vmatprep.mubr.msk.bf16.mxu1 %vm832_vm3, %v5005_v20 }
  0xd6   : > { %3987 = vmatprep.mubr.msk.bf16.mxu0 %vm832_vm3, %v5555_v33 }
  0xdc   : > { %3834 = vmatmul.mubr.msk.bf16.gmra.mrb[20].mxu1 %vm832_vm3, %v5016_v0  ;;  %3988 = vmatmul.mubr.msk.bf16.gmra.mrb[4].mxu0 %vm832_vm3, %v5556_v39 }
  0xdd   : > { %3837 = vmatprep.mubr.msk.bf16.mxu1 %vm832_vm3, %v5059_v62  ;;  %3991 = vmatprep.mubr.msk.bf16.mxu0 %vm832_vm3, %v5557_v58 }
  0xe4   : > { %3838 = vmatmul.mubr.msk.bf16.gmra.mrb[24].mxu1 %vm832_vm3, %v5091_v31  ;;  %3992 = vmatmul.mubr.msk.bf16.gmra.mrb[8].mxu0 %vm832_vm3, %v5558_v42 }
  0xe5   : > { %3841 = vmatprep.mubr.msk.bf16.mxu1 %vm832_vm3, %v5127_v45  ;;  %3995 = vmatprep.mubr.msk.bf16.mxu0 %vm832_vm3, %v5559_v15 }
  0xec   : > { %3842 = vmatmul.mubr.msk.bf16.gmra.mrb[28].mxu1 %vm832_vm3, %v5137_v1  ;;  %3996 = vmatmul.mubr.msk.bf16.gmra.mrb[12].mxu0 %vm832_vm3, %v5560_v27 }
  0xed   : > { %3847 = vmatprep.mubr.msk.bf16.mxu1 %vm832_vm3, %v4522_v38  ;;  %3999 = vmatprep.mubr.msk.bf16.mxu0 %vm832_vm3, %v5561_v6  ;;  %v2625_v38 = vshll.u32 %v5254_v9, 16 }
  0xef   : > { %v2627_v53 = vrot.slane %v2625_v38, 5 }
  0xf1   : > { %v2632_v59 = vor.u32 %v2631_v43, %v2627_v53 }
  0xf3   : > { %v2633_v2 = vrot.slane %v2632_v59, 4 }
  0xf4   : > { %3848 = vmatmul.mubr.msk.bf16.vlgmr.msra.gmra.mrb[0].mxu1 %vm832_vm3, %v5011_v47  ;;  %4000 = vmatmul.mubr.msk.bf16.gmra.mrb[16].mxu0 %vm832_vm3, %v5562_v7  ;;  %v2618_v47 = vrot.slane %v2616_v60, 4 }
  0xf5   : > { %4050 = vmatpush3.bf16.msra.mxu1 %v5563_v25  ;;  %3851 = vmatprep.mubr.msk.bf16.mxu1 %vm832_vm3, %v5039_v23 }
  0xf6   : > { %4003 = vmatprep.mubr.msk.bf16.mxu0 %vm832_vm3, %v5564_v46  ;;  %v2622_v23 = vor.u32 %v2621_v32, %v2618_v47 }
  0xf8   : > { %v2623_v48 = vrot.slane %v2622_v23, 4 }
  0xfc   : > { %3852 = vmatmul.mubr.msk.bf16.gmra.mrb[4].mxu1 %vm832_vm3, %v5089_v56  ;;  %4004 = vmatmul.mubr.msk.bf16.gmra.mrb[20].mxu0 %vm832_vm3, %v5565_v12  ;;  %v2628_v56 = vsel %vm4516_vm4, %v2623_v48, %v2627_v53 }
  0xfd   : > { %3855 = vmatprep.mubr.msk.bf16.mxu1 %vm832_vm3, %v5125_v44  ;;  %4007 = vmatprep.mubr.msk.bf16.mxu0 %vm832_vm3, %v4950_v30  ;;  %v2638_v44 = vsel %vm4516_vm4, %v2633_v2, %v2637_v61 }
  0xfe   : > { %v3549_v17 = vcombine.low %v2628_v56, %v2638_v44 }
 0x104   : > { %3856 = vmatmul.mubr.msk.bf16.gmra.mrb[8].mxu1 %vm832_vm3, %v5131_v8  ;;  %4008 = vmatmul.mubr.msk.bf16.gmra.mrb[24].mxu0 %vm832_vm3, %v4977_v63 }
 0x105   : > { %3859 = vmatprep.mubr.msk.bf16.mxu1 %vm832_vm3, %v5154_v40  ;;  %4011 = vmatprep.mubr.msk.bf16.mxu0 %vm832_vm3, %v5162_v16 }
 0x10c   : > { %3860 = vmatmul.mubr.msk.bf16.gmra.mrb[12].mxu1 %vm832_vm3, %v5045_v22  ;;  %4012 = vmatmul.mubr.msk.bf16.gmra.mrb[28].mxu0 %vm832_vm3, %v3549_v17 }
 0x10d   : > { %3863 = vmatprep.mubr.msk.bf16.mxu1 %vm832_vm3, %v5055_v57  ;;  %4017 = vmatprep.mubr.msk.bf16.mxu0 %vm832_vm3, %v5548_v52  ;;  %v5431_v52 = vld [vmem:[%s5486_s3] ss:$0 sm:$0xff] }
 0x114   : > { %3864 = vmatmul.mubr.msk.bf16.gmra.mrb[16].mxu1 %vm832_vm3, %v5069_v5  ;;  %4018 = vmatmul.mubr.msk.bf16.vlgmr.msra.gmra.mrb[0].mxu0 %vm832_vm3, %v5549_v3 }
 0x115   : > { %3867 = vmatprep.mubr.msk.bf16.mxu1 %vm832_vm3, %v5073_v54  ;;  %4021 = vmatprep.mubr.msk.bf16.mxu0 %vm832_vm3, %v5550_v4 }
 0x11c   : > { %3868 = vmatmul.mubr.msk.bf16.gmra.mrb[20].mxu1 %vm832_vm3, %v5077_v36  ;;  %4022 = vmatmul.mubr.msk.bf16.gmra.mrb[4].mxu0 %vm832_vm3, %v5551_v21 }
 0x11d   : > { %3871 = vmatprep.mubr.msk.bf16.mxu1 %vm832_vm3, %v5081_v18  ;;  %4025 = vmatprep.mubr.msk.bf16.mxu0 %vm832_vm3, %v5552_v13 }
 0x124   : > { %3872 = vmatmul.mubr.msk.bf16.gmra.mrb[24].mxu1 %vm832_vm3, %v5085_v49  ;;  %4026 = vmatmul.mubr.msk.bf16.gmra.mrb[8].mxu0 %vm832_vm3, %v4948_v37  ;;  %v3566_v37 = vrot.slane %v5251_v24, 9 }
 0x125   : > { %3875 = vmatprep.mubr.msk.bf16.mxu1 %vm832_vm3, %v5095_v29  ;;  %4029 = vmatprep.mubr.msk.bf16.mxu0 %vm832_vm3, %v4979_v41  ;;  %v2848_v41 = vrot.slane %v2846_v34, 4 }
 0x12c   : > { %3876 = vmatmul.mubr.msk.bf16.gmra.mrb[28].mxu1 %vm832_vm3, %v5240_v11  ;;  %4030 = vmatmul.mubr.msk.bf16.gmra.mrb[12].mxu0 %vm832_vm3, %v4983_v50  ;;  %v2849_v50 = vrot.slane %v393_v55, 5 }
 0x12d   : > { %3897 = vmatprep.mubr.msk.bf16.mxu1 %vm832_vm3, %v5560_v27  ;;  %4033 = vmatprep.mubr.msk.bf16.mxu0 %vm832_vm3, %v5005_v20  ;;  %v2847_v20 = vsel %vm4697_vm7, %v3566_v37, %v2846_v34 }
 0x134   : > { %3898 = vmatmul.mubr.msk.bf16.vlgmr.msra.gmra.mrb[16].mxu1 %vm832_vm3, %v5561_v6  ;;  %4034 = vmatmul.mubr.msk.bf16.gmra.mrb[16].mxu0 %vm832_vm3, %v5016_v0  ;;  %v2850_v0 = vsel %vm4697_vm7, %v2848_v41, %v2849_v50 }
 0x135   : > { %3901 = vmatprep.mubr.msk.bf16.mxu1 %vm832_vm3, %v5562_v7  ;;  %4037 = vmatprep.mubr.msk.bf16.mxu0 %vm832_vm3, %v5059_v62  ;;  %v3568_v22 = vcombine.low %v2847_v20, %v2850_v0 }
 0x13c   : > { %3902 = vmatmul.mubr.msk.bf16.gmra.mrb[20].mxu1 %vm832_vm3, %v5564_v46  ;;  %4038 = vmatmul.mubr.msk.bf16.gmra.mrb[20].mxu0 %vm832_vm3, %v5091_v31 }
 0x13d   : > { %3905 = vmatprep.mubr.msk.bf16.mxu1 %vm832_vm3, %v5565_v12  ;;  %4041 = vmatprep.mubr.msk.bf16.mxu0 %vm832_vm3, %v5127_v45 }
 0x144   : > { %3906 = vmatmul.mubr.msk.bf16.gmra.mrb[24].mxu1 %vm832_vm3, %v4950_v30  ;;  %4042 = vmatmul.mubr.msk.bf16.gmra.mrb[24].mxu0 %vm832_vm3, %v5137_v1 }
 0x145   : > { %3909 = vmatprep.mubr.msk.bf16.mxu1 %vm832_vm3, %v4977_v63  ;;  %4045 = vmatprep.mubr.msk.bf16.mxu0 %vm832_vm3, %v5156_v19 }
 0x14c   : > { %3910 = vmatmul.mubr.msk.bf16.gmra.mrb[28].mxu1 %vm832_vm3, %v5162_v16  ;;  %4046 = vmatmul.mubr.msk.bf16.gmra.mrb[28].mxu0 %vm832_vm3, %v3568_v22 }
 0x1c7   : > { %v3849_v30 = vpop.f32.mrb[0].mxu1 }
 0x1c8   : > { %v1810_v63 = vpop.f32.mrb[1].mxu1 }
 0x1c9   : > { %v3850_v57 = vpop.f32.mrb[2].mxu1 }
 0x1ca   : > { %v1813_v62 = vpop.f32.mrb[3].mxu1 }
 0x1cf   : > { %v3853_v5 = vpop.f32.mrb[4].mxu1 }
 0x1d0   : > { %v1826_v54 = vpop.f32.mrb[5].mxu1 }
 0x1d1   : > { %v3854_v36 = vpop.f32.mrb[6].mxu1 }
 0x1d2   : > { %v1829_v18 = vpop.f32.mrb[7].mxu1 }
 0x1d7   : > { %v3857_v49 = vpop.f32.mrb[8].mxu1 }
 0x1d8   : > { %v1842_v31 = vpop.f32.mrb[9].mxu1 }
 0x1d9   : > { %v3858_v29 = vpop.f32.mrb[10].mxu1 }
 0x1da   : > { %v5418_v45 = vpop.f32.mrb[11].mxu1 }
 0x1df   : > { %v5420_v8 = vpop.f32.mrb[12].mxu1 }
 0x1e0   : > { %v5422_v1 = vpop.f32.mrb[13].mxu1 }
 0x1e1   : > { %v5424_v40 = vpop.f32.mrb[14].mxu1 }
 0x1e2   : > { %v5426_v19 = vpop.f32.mrb[15].mxu1 }
 0x1e7   : > { %v4019_v16 = vpop.f32.mrb[0].mxu0 }
 0x1e8   : > { %v4051_v3 = vadd.f32 %v4019_v16, %v3849_v30  ;;  %v2896_v4 = vpop.f32.mrb[1].mxu0 }
 0x1e9   : > { %v4052_v11 = vadd.f32 %v2896_v4, %v1810_v63  ;;  %v4020_v21 = vpop.f32.mrb[2].mxu0 }
 0x1ea   : > { %v3064_v13 = vadd.f32 %v4051_v3, %v5431_v52  ;;  %v4053_v24 = vadd.f32 %v4020_v21, %v3850_v57  ;;  %v2899_v9 = vpop.f32.mrb[3].mxu0 }
 0x1eb   : > { %v3062_v10 = vadd.f32 %v4052_v11, %v5431_v52  ;;  %v4054_v51 = vadd.f32 %v2899_v9, %v1813_v62 }
 0x1ec   : > { %v3065_v33 = vadd.f32 %v4053_v24, %v5431_v52  ;;  %v3096_v42 = vmax.f32 %v3064_v13, 0.0 }
 0x1ed   : > { %v3094_v39 = vmax.f32 %v3062_v10, 0.0  ;;  %v3063_v58 = vadd.f32 %v4054_v51, %v5431_v52 }
 0x1ee   : > { %v3097_v6 = vmax.f32 %v3065_v33, 0.0  ;;  %v3175_v47 = vmul.f32 %v3096_v42, %v3096_v42 }
 0x1ef   : > { %v3095_v15 = vmax.f32 %v3063_v58, 0.0  ;;  %v4023_v27 = vpop.f32.mrb[4].mxu0  ;;  %v3173_v14 = vmul.f32 %v3094_v39, %v3094_v39 }
 0x1f0   : > { %v4055_v7 = vadd.f32 %v4023_v27, %v3853_v5  ;;  %v2912_v60 = vpop.f32.mrb[5].mxu0  ;;  %v3176_v35 = vmul.f32 %v3097_v6, %v3097_v6 }
 0x1f1   : > { %v3133_v28 = vadd.f32 %v3095_v15, %v3094_v39  ;;  %v3174_v25 = vmul.f32 %v3095_v15, %v3095_v15  ;;  %v4056_v38 = vadd.f32 %v2912_v60, %v1826_v54  ;;  %v4024_v46 = vpop.f32.mrb[6].mxu0 }
 0x1f2   : > { %v3068_v32 = vadd.f32 %v4055_v7, %v5431_v52  ;;  %v4057_v53 = vadd.f32 %v4024_v46, %v3854_v36  ;;  %v2915_v43 = vpop.f32.mrb[7].mxu0 }
 0x1f3   : > { %v3134_v55 = vadd.f32 %v3133_v28, %v3096_v42  ;;  %v3205_v12 = vadd.f32 %v3174_v25, %v3173_v14  ;;  %v3066_v23 = vadd.f32 %v4056_v38, %v5431_v52  ;;  %v4058_v59 = vadd.f32 %v2915_v43, %v1829_v18 }
 0x1f4   : > { %v3069_v48 = vadd.f32 %v4057_v53, %v5431_v52  ;;  %v3100_v17 = vmax.f32 %v3068_v32, 0.0 }
 0x1f5   : > { %v3206_v2 = vadd.f32 %v3205_v12, %v3175_v47  ;;  %v3098_v61 = vmax.f32 %v3066_v23, 0.0  ;;  %v3135_v56 = vadd.f32 %v3134_v55, %v3097_v6  ;;  %v3067_v44 = vadd.f32 %v4058_v59, %v5431_v52 }
 0x1f6   : > { %v3101_v0 = vmax.f32 %v3069_v48, 0.0  ;;  %v3179_v54 = vmul.f32 %v3100_v17, %v3100_v17 }
 0x1f7   : > { %v3136_v34 = vadd.f32 %v3135_v56, %v3098_v61  ;;  %v3177_v37 = vmul.f32 %v3098_v61, %v3098_v61  ;;  %v3207_v41 = vadd.f32 %v3206_v2, %v3176_v35  ;;  %v3099_v50 = vmax.f32 %v3067_v44, 0.0  ;;  %v4027_v20 = vpop.f32.mrb[8].mxu0 }
 0x1f8   : > { %v4059_v22 = vadd.f32 %v4027_v20, %v3857_v49  ;;  %v2928_v26 = vpop.f32.mrb[9].mxu0  ;;  %v3180_v13 = vmul.f32 %v3101_v0, %v3101_v0 }
 0x1f9   : > { %v3208_v30 = vadd.f32 %v3207_v41, %v3177_v37  ;;  %v3137_v63 = vadd.f32 %v3136_v34, %v3099_v50  ;;  %v3178_v57 = vmul.f32 %v3099_v50, %v3099_v50  ;;  %v4060_v62 = vadd.f32 %v2928_v26, %v1842_v31  ;;  %v4028_v5 = vpop.f32.mrb[10].mxu0 }
 0x1fa   : > { %v3072_v36 = vadd.f32 %v4059_v22, %v5431_v52  ;;  %v4061_v18 = vadd.f32 %v4028_v5, %v3858_v29  ;;  %v2931_v16 = vpop.f32.mrb[11].mxu0 }
 0x1fb   : > { %v3138_v3 = vadd.f32 %v3137_v63, %v3100_v17  ;;  %v3209_v4 = vadd.f32 %v3208_v30, %v3178_v57  ;;  %v3070_v11 = vadd.f32 %v4060_v62, %v5431_v52  ;;  %v4062_v21 = vadd.f32 %v2931_v16, %v5418_v45 }
 0x1fc   : > { %v3073_v49 = vadd.f32 %v4061_v18, %v5431_v52  ;;  %v3104_v51 = vmax.f32 %v3072_v36, 0.0 }
 0x1fd   : > { %v3210_v24 = vadd.f32 %v3209_v4, %v3179_v54  ;;  %v3102_v9 = vmax.f32 %v3070_v11, 0.0  ;;  %v3139_v10 = vadd.f32 %v3138_v3, %v3101_v0  ;;  %v3071_v31 = vadd.f32 %v4062_v21, %v5431_v52 }
 0x1fe   : > { %v3105_v15 = vmax.f32 %v3073_v49, 0.0  ;;  %v3183_v25 = vmul.f32 %v3104_v51, %v3104_v51 }
 0x1ff   : > { %v3140_v33 = vadd.f32 %v3139_v10, %v3102_v9  ;;  %v3181_v39 = vmul.f32 %v3102_v9, %v3102_v9  ;;  %v3211_v58 = vadd.f32 %v3210_v24, %v3180_v13  ;;  %v3103_v29 = vmax.f32 %v3071_v31, 0.0  ;;  %v4031_v42 = vpop.f32.mrb[12].mxu0 }
 0x200   : > { %v4063_v27 = vadd.f32 %v4031_v42, %v5420_v8  ;;  %v2944_v6 = vpop.f32.mrb[13].mxu0  ;;  %v3184_v8 = vmul.f32 %v3105_v15, %v3105_v15 }
 0x201   : > { %v3212_v7 = vadd.f32 %v3211_v58, %v3181_v39  ;;  %v3141_v45 = vadd.f32 %v3140_v33, %v3103_v29  ;;  %v3182_v60 = vmul.f32 %v3103_v29, %v3103_v29  ;;  %v4064_v14 = vadd.f32 %v2944_v6, %v5422_v1  ;;  %v4032_v28 = vpop.f32.mrb[14].mxu0 }
 0x202   : > { %v3076_v38 = vadd.f32 %v4063_v27, %v5431_v52  ;;  %v4065_v46 = vadd.f32 %v4032_v28, %v5424_v40  ;;  %v2947_v47 = vpop.f32.mrb[15].mxu0 }
 0x203   : > { %v3142_v32 = vadd.f32 %v3141_v45, %v3104_v51  ;;  %v3213_v53 = vadd.f32 %v3212_v7, %v3182_v60  ;;  %v3074_v43 = vadd.f32 %v4064_v14, %v5431_v52  ;;  %v4066_v55 = vadd.f32 %v2947_v47, %v5426_v19 }
 0x204   : > { %v3077_v12 = vadd.f32 %v4065_v46, %v5431_v52  ;;  %v3108_v48 = vmax.f32 %v3076_v38, 0.0 }
 0x205   : > { %v3214_v23 = vadd.f32 %v3213_v53, %v3183_v25  ;;  %v3106_v59 = vmax.f32 %v3074_v43, 0.0  ;;  %v3143_v35 = vadd.f32 %v3142_v32, %v3105_v15  ;;  %v3075_v1 = vadd.f32 %v4066_v55, %v5431_v52 }
 0x206   : > { %v3109_v34 = vmax.f32 %v3077_v12, 0.0  ;;  %v3187_v63 = vmul.f32 %v3108_v48, %v3108_v48 }
 0x207   : > { %v3144_v2 = vadd.f32 %v3143_v35, %v3106_v59  ;;  %v3185_v61 = vmul.f32 %v3106_v59, %v3106_v59  ;;  %v3215_v56 = vadd.f32 %v3214_v23, %v3184_v8  ;;  %v3107_v40 = vmax.f32 %v3075_v1, 0.0  ;;  %v3899_v44 = vpop.f32.mrb[16].mxu1  ;;  %v4035_v17 = vpop.f32.mrb[16].mxu0 }
 0x208   : > { %v4067_v37 = vadd.f32 %v4035_v17, %v3899_v44  ;;  %v2102_v41 = vpop.f32.mrb[17].mxu1  ;;  %v2960_v50 = vpop.f32.mrb[17].mxu0  ;;  %v3188_v4 = vmul.f32 %v3109_v34, %v3109_v34 }
 0x209   : > { %v3216_v19 = vadd.f32 %v3215_v56, %v3185_v61  ;;  %v3145_v20 = vadd.f32 %v3144_v2, %v3107_v40  ;;  %v3186_v0 = vmul.f32 %v3107_v40, %v3107_v40  ;;  %v4068_v22 = vadd.f32 %v2960_v50, %v2102_v41  ;;  %v3900_v26 = vpop.f32.mrb[18].mxu1  ;;  %v4036_v30 = vpop.f32.mrb[18].mxu0 }
 0x20a   : > { %v3080_v57 = vadd.f32 %v4067_v37, %v5431_v52  ;;  %v4069_v62 = vadd.f32 %v4036_v30, %v3900_v26  ;;  %v2105_v5 = vpop.f32.mrb[19].mxu1  ;;  %v2963_v54 = vpop.f32.mrb[19].mxu0 }
 0x20b   : > { %v3146_v36 = vadd.f32 %v3145_v20, %v3108_v48  ;;  %v3217_v18 = vadd.f32 %v3216_v19, %v3186_v0  ;;  %v3078_v16 = vadd.f32 %v4068_v22, %v5431_v52  ;;  %v4070_v3 = vadd.f32 %v2963_v54, %v2105_v5 }
 0x20c   : > { %v3081_v11 = vadd.f32 %v4069_v62, %v5431_v52  ;;  %v3112_v9 = vmax.f32 %v3080_v57, 0.0 }
 0x20d   : > { %v3218_v21 = vadd.f32 %v3217_v18, %v3187_v63  ;;  %v3110_v13 = vmax.f32 %v3078_v16, 0.0  ;;  %v3147_v49 = vadd.f32 %v3146_v36, %v3109_v34  ;;  %v3079_v24 = vadd.f32 %v4070_v3, %v5431_v52 }
 0x20e   : > { %v3113_v29 = vmax.f32 %v3081_v11, 0.0  ;;  %v3191_v25 = vmul.f32 %v3112_v9, %v3112_v9 }
 0x20f   : > { %v3148_v10 = vadd.f32 %v3147_v49, %v3110_v13  ;;  %v3189_v31 = vmul.f32 %v3110_v13, %v3110_v13  ;;  %v3219_v51 = vadd.f32 %v3218_v21, %v3188_v4  ;;  %v3111_v33 = vmax.f32 %v3079_v24, 0.0  ;;  %v3903_v39 = vpop.f32.mrb[20].mxu1  ;;  %v4039_v58 = vpop.f32.mrb[20].mxu0 }
 0x210   : > { %v4071_v42 = vadd.f32 %v4039_v58, %v3903_v39  ;;  %v2118_v15 = vpop.f32.mrb[21].mxu1  ;;  %v2976_v27 = vpop.f32.mrb[21].mxu0  ;;  %v3192_v12 = vmul.f32 %v3113_v29, %v3113_v29 }
 0x211   : > { %v3220_v6 = vadd.f32 %v3219_v51, %v3189_v31  ;;  %v3149_v7 = vadd.f32 %v3148_v10, %v3111_v33  ;;  %v3190_v45 = vmul.f32 %v3111_v33, %v3111_v33  ;;  %v4072_v60 = vadd.f32 %v2976_v27, %v2118_v15  ;;  %v3904_v14 = vpop.f32.mrb[22].mxu1  ;;  %v4040_v28 = vpop.f32.mrb[22].mxu0 }
 0x212   : > { %v3084_v38 = vadd.f32 %v4071_v42, %v5431_v52  ;;  %v4073_v46 = vadd.f32 %v4040_v28, %v3904_v14  ;;  %v2121_v47 = vpop.f32.mrb[23].mxu1  ;;  %v2979_v32 = vpop.f32.mrb[23].mxu0 }
 0x213   : > { %v3150_v53 = vadd.f32 %v3149_v7, %v3112_v9  ;;  %v3221_v43 = vadd.f32 %v3220_v6, %v3190_v45  ;;  %v3082_v55 = vadd.f32 %v4072_v60, %v5431_v52  ;;  %v4074_v8 = vadd.f32 %v2979_v32, %v2121_v47 }
 0x214   : > { %v3085_v23 = vadd.f32 %v4073_v46, %v5431_v52  ;;  %v3116_v2 = vmax.f32 %v3084_v38, 0.0 }
 0x215   : > { %v3222_v59 = vadd.f32 %v3221_v43, %v3191_v25  ;;  %v3114_v35 = vmax.f32 %v3082_v55, 0.0  ;;  %v3151_v1 = vadd.f32 %v3150_v53, %v3113_v29  ;;  %v3083_v48 = vadd.f32 %v4074_v8, %v5431_v52 }
 0x216   : > { %v3117_v37 = vmax.f32 %v3085_v23, 0.0  ;;  %v3195_v57 = vmul.f32 %v3116_v2, %v3116_v2 }
 0x217   : > { %v3152_v61 = vadd.f32 %v3151_v1, %v3114_v35  ;;  %v3193_v56 = vmul.f32 %v3114_v35, %v3114_v35  ;;  %v3223_v40 = vadd.f32 %v3222_v59, %v3192_v12  ;;  %v3115_v44 = vmax.f32 %v3083_v48, 0.0  ;;  %v3907_v17 = vpop.f32.mrb[24].mxu1  ;;  %v4043_v34 = vpop.f32.mrb[24].mxu0 }
 0x218   : > { %v4075_v41 = vadd.f32 %v4043_v34, %v3907_v17  ;;  %v2134_v50 = vpop.f32.mrb[25].mxu1  ;;  %v2992_v19 = vpop.f32.mrb[25].mxu0  ;;  %v3196_v11 = vmul.f32 %v3117_v37, %v3117_v37 }
 0x219   : > { %v3224_v20 = vadd.f32 %v3223_v40, %v3193_v56  ;;  %v3153_v0 = vadd.f32 %v3152_v61, %v3115_v44  ;;  %v3194_v22 = vmul.f32 %v3115_v44, %v3115_v44  ;;  %v4076_v26 = vadd.f32 %v2992_v19, %v2134_v50  ;;  %v3908_v30 = vpop.f32.mrb[26].mxu1  ;;  %v4044_v63 = vpop.f32.mrb[26].mxu0 }
 0x21a   : > { %v3088_v62 = vadd.f32 %v4075_v41, %v5431_v52  ;;  %v4077_v5 = vadd.f32 %v4044_v63, %v3908_v30  ;;  %v2137_v54 = vpop.f32.mrb[27].mxu1  ;;  %v2995_v36 = vpop.f32.mrb[27].mxu0 }
 0x21b   : > { %v3154_v18 = vadd.f32 %v3153_v0, %v3116_v2  ;;  %v3225_v16 = vadd.f32 %v3224_v20, %v3194_v22  ;;  %v3086_v3 = vadd.f32 %v4076_v26, %v5431_v52  ;;  %v4078_v4 = vadd.f32 %v2995_v36, %v2137_v54 }
 0x21c   : > { %v3089_v21 = vadd.f32 %v4077_v5, %v5431_v52  ;;  %v3120_v10 = vmax.f32 %v3088_v62, 0.0 }
 0x21d   : > { %v3226_v13 = vadd.f32 %v3225_v16, %v3195_v57  ;;  %v3118_v49 = vmax.f32 %v3086_v3, 0.0  ;;  %v3155_v24 = vadd.f32 %v3154_v18, %v3117_v37  ;;  %v3087_v9 = vadd.f32 %v4078_v4, %v5431_v52  ;;  %v3132_v4 = vld [vmem:[%s5408_s6] sm:$0x1] }
 0x21e   : > { %v3121_v42 = vmax.f32 %v3089_v21, 0.0  ;;  %v3199_v38 = vmul.f32 %v3120_v10, %v3120_v10 }
 0x21f   : > { %v3156_v31 = vadd.f32 %v3155_v24, %v3118_v49  ;;  %v3197_v51 = vmul.f32 %v3118_v49, %v3118_v49  ;;  %v3227_v33 = vadd.f32 %v3226_v13, %v3196_v11  ;;  %v3119_v39 = vmax.f32 %v3087_v9, 0.0  ;;  %v3911_v58 = vpop.f32.mrb[28].mxu1  ;;  %v4047_v29 = vpop.f32.mrb[28].mxu0  ;;  %v3172_v13 = vld [vmem:[%s5414_s9] sm:$0x1] }
 0x220   : > { %v4079_v15 = vadd.f32 %v4047_v29, %v3911_v58  ;;  %v2150_v27 = vpop.f32.mrb[29].mxu1  ;;  %v3008_v6 = vpop.f32.mrb[29].mxu0  ;;  %v3200_v23 = vmul.f32 %v3121_v42, %v3121_v42 }
 0x221   : > { %v3228_v7 = vadd.f32 %v3227_v33, %v3197_v51  ;;  %v3157_v45 = vadd.f32 %v3156_v31, %v3119_v39  ;;  %v3198_v60 = vmul.f32 %v3119_v39, %v3119_v39  ;;  %v4080_v14 = vadd.f32 %v3008_v6, %v2150_v27  ;;  %v3912_v28 = vpop.f32.mrb[30].mxu1  ;;  %v4048_v25 = vpop.f32.mrb[30].mxu0 }
 0x222   : > { %v3092_v46 = vadd.f32 %v4079_v15, %v5431_v52  ;;  %v4081_v47 = vadd.f32 %v4048_v25, %v3912_v28  ;;  %v2153_v32 = vpop.f32.mrb[31].mxu1  ;;  %v3011_v53 = vpop.f32.mrb[31].mxu0 }
 0x223   : > { %v3158_v43 = vadd.f32 %v3157_v45, %v3120_v10  ;;  %v3229_v55 = vadd.f32 %v3228_v7, %v3198_v60  ;;  %v3090_v8 = vadd.f32 %v4080_v14, %v5431_v52  ;;  %v4082_v12 = vadd.f32 %v3011_v53, %v2153_v32 }
 0x224   : > { %v3093_v59 = vadd.f32 %v4081_v47, %v5431_v52  ;;  %v3124_v61 = vmax.f32 %v3092_v46, 0.0 }
 0x225   : > { %v3230_v35 = vadd.f32 %v3229_v55, %v3199_v38  ;;  %v3122_v1 = vmax.f32 %v3090_v8, 0.0  ;;  %v3159_v48 = vadd.f32 %v3158_v43, %v3121_v42  ;;  %v3091_v2 = vadd.f32 %v4082_v12, %v5431_v52 }
 0x226   : > { %v3125_v37 = vmax.f32 %v3093_v59, 0.0  ;;  %v3203_v19 = vmul.f32 %v3124_v61, %v3124_v61 }
 0x227   : > { %v3160_v56 = vadd.f32 %v3159_v48, %v3122_v1  ;;  %v3201_v40 = vmul.f32 %v3122_v1, %v3122_v1  ;;  %v3231_v44 = vadd.f32 %v3230_v35, %v3200_v23  ;;  %v3123_v17 = vmax.f32 %v3091_v2, 0.0 }
 0x228   : > { %v3204_v22 = vmul.f32 %v3125_v37, %v3125_v37 }
 0x229   : > { %v3232_v34 = vadd.f32 %v3231_v44, %v3201_v40  ;;  %v3161_v41 = vadd.f32 %v3160_v56, %v3123_v17  ;;  %v3202_v50 = vmul.f32 %v3123_v17, %v3123_v17 }
 0x22b   : > { %v3162_v20 = vadd.f32 %v3161_v41, %v3124_v61  ;;  %v3233_v0 = vadd.f32 %v3232_v34, %v3202_v50 }
 0x22d   : > { %v3163_v26 = vadd.f32 %v3162_v20, %v3125_v37  ;;  %v3234_v30 = vadd.f32 %v3233_v0, %v3203_v19 }
 0x22f   : > { %v3164_v63 = vrot.slane %v3163_v26, 4  ;;  %v3235_v52 = vadd.f32 %v3234_v30, %v3204_v22 }
 0x231   : > { %v3165_v57 = vadd.f32 %v3164_v63, %v3163_v26  ;;  %v3236_v62 = vrot.slane %v3235_v52, 4 }
 0x233   : > { %v3166_v5 = vrot.slane %v3165_v57, 2  ;;  %v3237_v54 = vadd.f32 %v3236_v62, %v3235_v52 }
 0x235   : > { %v3167_v36 = vadd.f32 %v3166_v5, %v3165_v57  ;;  %v3238_v18 = vrot.slane %v3237_v54, 2 }
 0x237   : > { %v3168_v16 = vrot.slane %v3167_v36, 1  ;;  %v3239_v3 = vadd.f32 %v3238_v18, %v3237_v54 }
 0x239   : > { %v3169_v11 = vadd.f32 %v3168_v16, %v3167_v36  ;;  %v3240_v21 = vrot.slane %v3239_v3, 1 }
 0x23b   : > { %v3170_v49 = vadd.f32 %v3169_v11, %v3132_v4  ;;  %v3241_v24 = vadd.f32 %v3240_v21, %v3239_v3 }
 0x23d   : > { %3171 = vst [vmem:[%s5408_s6] sm:$0x1] %v3170_v49  ;;  %v3242_v9 = vadd.f32 %v3241_v24, %v3172_v13 }
 0x23f   : > { %3243 = vst [vmem:[%s5414_s9] sm:$0x1] %v3242_v9 }
 0x240 PF: > { %s16_s20 = sadd.s32 1, %s4389_s20   ;;  %s5566_s18 = smov %s4385_s19 }
 0x241   : > { %p13_p5 = scmp.ge.s32.totalorder %s16_s20, 4   ;;  %s5567_s19 = smov %s5569_s21 }
 0x243   :  { %15 = sbr.rel (!%p13_p5) target bundleno = 2 (0x2), region = 93 }

// kernel: conv_relu_bn.3
= control target key start
LH: loop header
LB: loop body
LE: loop exit
PB: predicated region body
PF: predicated region fallthrough
CT: control target
= control target key end

     0   :  { %s4437_s21 = smov 0   ;;  %s4439_s22 = smov 0   ;;  %s5637_s0 = inlined_call_operand.vmem [shape: bf16[2,24,18,8], index: 0, kind: input, shape index: {}, may-alias: {0,1}]   ;;  %s5638_s1 = inlined_call_operand.vmem [shape: bf16[2,24,18,8], index: 1, kind: input, shape index: {}, may-alias: {0,1}]   ;;  %s5639_s2 = inlined_call_operand.vmem [shape: bf16[9,8,128], index: 2, kind: input, shape index: {}]   ;;  %s5640_s3 = inlined_call_operand.vmem [shape: f32[1,128], index: 3, kind: input, shape index: {}]   ;;  %s5641_s4 = inlined_call_operand.vmem [shape: f32[1,128], index: 4, kind: input, shape index: {}]   ;;  %s5642_s5 = inlined_call_operand.vmem [shape: f32[1,128], index: 5, kind: input, shape index: {}]   ;;  %s5643_s6 = inlined_call_operand.vmem [shape: f32[512,8], index: 6, kind: output, shape index: {}]  }
   0x1   :  { %s4441_s23 = smov 0  }
   0x2 LB: > { %s28_s24 = sadd.s32 1, %s4396_s22  ;;  %p3366_p0 = scmp.ge.s32.totalorder %s4400_s23, 1  ;;  %s4400_s23 = sphi %s4441_s23, %s16_s23   ;;  %s4396_s22 = sphi %s4439_s22, %s5722_s22   ;;  %s4392_s21 = sphi %s4437_s21, %s5721_s21  }
   0x3   : > { %p30_p1 = scmp.ge.s32.totalorder %s28_s24, 2  ;;  %p270_p2 = scmp.lt.s32.totalorder %s4400_s23, 3 }
   0x5   : > { %s5724_s24 = smov (%p30_p1, %s28_s24), 0  ;;  %p271_p3 = pnand %p3366_p0, %p270_p2 }
   0x7   : > { %274 = sbr.rel (%p271_p3) target bundleno = 559 (0x22f), region = 44 }
   0xe   : > { %v3371_v0 = vld [vmem:[%s5639_s2 + $0x4] sm:$0xf]  ;;  %vm909_vm0 = vcmask 1043456   ;;  %v3503_v1 = vld [vmem:[%s5639_s2 + $0x10] sm:$0xf]  ;;  %p329_p4 = scmp.lt.s32.totalorder %s4392_s21, 1 }
   0xf   : > { %4319 = vmatprep.subr.msk.bf16.mxu1 %vm909_vm0, %v3371_v0  ;;  %4323 = vmatprep.subr.msk.bf16.mxu0 %vm909_vm0, %v3503_v1  ;;  %v911_v2 = vsel %vm909_vm0, %v3371_v0, 0  ;;  %v4468_v3 = vsel %vm909_vm0, %v3503_v1, 0  ;;  %v422_v4 = vld [vmem:[%s5639_s2] sm:$0xf]  ;;  %v3522_v5 = vld [vmem:[%s5639_s2 + $0x14] sm:$0xf] }
  0x10   : > { %5675 = vst [vmem:[#allocation2_spill] sm:$0xff] %v4468_v3  ;;  %3756 = vmatpush3.bf16.msra.mxu1 %v911_v2  ;;  %3892 = vmatpush3.bf16.msra.mxu0 %v4468_v3  ;;  %s4472_s29 = scalar_select %p329_p4, %s4392_s21, 1  ;;  %vm423_vm1 = vsmask.f32 3328  ;;  %vm424_vm2 = vsmask.f32 7440 }
  0x11   : > { %4320 = vmatprep.subr.msk.bf16.mxu1 %vm909_vm0, %v422_v4  ;;  %4325 = vmatprep.subr.msk.bf16.mxu0 %vm909_vm0, %v3522_v5  ;;  %v4491_v6 = vsel %vm909_vm0, %v422_v4, 0  ;;  %v4494_v7 = vsel %vm909_vm0, %v3522_v5, 0  ;;  %v4499_v8 = vld [vmem:[%s5639_s2 + $0x18] sm:$0xf]  ;;  %vm860_vm3 = vcmask 64512   ;;  %vm4535_vm4 = vmor %vm423_vm1, %vm424_vm2  ;;  %vm1382_vm5 = vcmask 1042432  }
  0x12   : > { %s4329_s10 = smul.u32 288, %s4472_s29  ;;  %v4523_v20 = vsel %vm909_vm0, %v4499_v8, 0  ;;  %vm1383_vm6 = vcmask 1046532  }
  0x13   : > { %vm4716_vm7 = vmor %vm1382_vm5, %vm1383_vm6 }
  0x14   : > { %s4488_s13 = scalar_lea.vmem %s5637_s0, %s4329_s10  ;;  %s3601_s26 = sadd.s32 192, %s4329_s10 }
  0x15   : > { %v4502_v9 = vld [vmem:[%s4488_s13] sm:$0xf]  ;;  %v4505_v10 = vld [vmem:[%s4488_s13 + $0x4] sm:$0xf]  ;;  %v370_v11 = vld [vmem:[%s4488_s13 + $0x8] sm:$0x1]  ;;  %s5084_s29 = scalar_lea.vmem %s5638_s1, %s3601_s26 }
  0x16   : > { %v427_v12 = vshrl.u32 %v4502_v9, 16  ;;  %v430_v13 = vshll.u32 %v4502_v9, 16  ;;  %v436_v14 = vshll.u32 %v4505_v10, 16  ;;  %v440_v15 = vshrl.u32 %v4505_v10, 16  ;;  %v4513_v16 = vld [vmem:[%s4488_s13 + $0xc] sm:$0xf] }
  0x17   : > { %v446_v17 = vshll.u32 %v370_v11, 16  ;;  %v4516_v18 = vld [vmem:[%s4488_s13 + $0x10] sm:$0xf]  ;;  %v4519_v19 = vld [vmem:[%s4488_s13 + $0x14] sm:$0x1]  ;;  %v451_v26 = vshrl.u32 %v4513_v16, 16 }
  0x18   : > { %v429_v21 = vrot.slane %v427_v12, 4  ;;  %v432_v22 = vrot.slane %v430_v13, 5  ;;  %v438_v23 = vrot.slane %v436_v14, 5  ;;  %v442_v24 = vrot.slane %v440_v15, 4  ;;  %v4531_v33 = vld [vmem:[%s4488_s13 + $0x18] sm:$0xf] }
  0x19   : > { %v448_v25 = vrot.slane %v446_v17, 5  ;;  %v454_v27 = vshll.u32 %v4513_v16, 16  ;;  %v460_v28 = vshll.u32 %v4516_v18, 16  ;;  %v464_v31 = vshrl.u32 %v4516_v18, 16  ;;  %v4544_v39 = vld [vmem:[%s4488_s13 + $0x1c] sm:$0xf] }
  0x1a   : > { %v433_v29 = vor.u32 %v432_v22, %v429_v21  ;;  %v443_v30 = vor.u32 %v442_v24, %v438_v23  ;;  %v470_v32 = vshll.u32 %v4519_v19, 16  ;;  %v453_v35 = vrot.slane %v451_v26, 4  ;;  %v4548_v46 = vld [vmem:[%s4488_s13 + $0x20] sm:$0x1]  ;;  %v4558_v57 = vld [vmem:[%s4488_s13 + $0x24] sm:$0xf] }
  0x1b   : > { %v456_v36 = vrot.slane %v454_v27, 5  ;;  %v462_v37 = vrot.slane %v460_v28, 5  ;;  %v4541_v38 = vcombine.low %v4513_v16, %v4516_v18  ;;  %v466_v42 = vrot.slane %v464_v31, 4  ;;  %v4563_v62 = vld [vmem:[%s4488_s13 + $0x28] sm:$0xf]  ;;  %s3369_s10 = sshll.u32 %s4392_s21, 5 }
  0x1c   : > { %v434_v40 = vrot.slane %v433_v29, 4  ;;  %v444_v41 = vrot.slane %v443_v30, 4  ;;  %v472_v43 = vrot.slane %v470_v32, 5  ;;  %v1397_v45 = vrot.slane %v4519_v19, 5  ;;  %v4571_v4 = vld [vmem:[%s4488_s13 + $0x2c] sm:$0x1] }
  0x1d   : > { %v457_v44 = vor.u32 %v456_v36, %v453_v35  ;;  %v475_v47 = vshrl.u32 %v4531_v33, 16  ;;  %v478_v48 = vshll.u32 %v4531_v33, 16  ;;  %v467_v51 = vor.u32 %v466_v42, %v462_v37  ;;  %v4577_v14 = vld [vmem:[%s4488_s13 + $0x30] sm:$0xf]  ;;  %v4589_v28 = vld [vmem:[%s4488_s13 + $0x34] sm:$0xf] }
  0x1e   : > { %v439_v49 = vsel %vm4535_vm4, %v434_v40, %v438_v23  ;;  %v449_v50 = vsel %vm4535_vm4, %v444_v41, %v448_v25  ;;  %v484_v52 = vshll.u32 %v4544_v39, 16  ;;  %v488_v60 = vshrl.u32 %v4544_v39, 16  ;;  %v4584_v23 = vld [vmem:[%s5639_s2 + $0x8] sm:$0xf]  ;;  %v4596_v32 = vld [vmem:[%s4488_s13 + $0x38] sm:$0x1] }
  0x1f   : > { %v3372_v53 = vcombine.low %v439_v49, %v449_v50  ;;  %v458_v54 = vrot.slane %v457_v44, 4  ;;  %v477_v55 = vrot.slane %v475_v47, 4  ;;  %v480_v56 = vrot.slane %v478_v48, 5  ;;  %v4604_v48 = vld [vmem:[%s4488_s13 + $0x3c] sm:$0xf]  ;;  %p361_p5 = scmp.lt.s32.totalorder %s3369_s10, 63 }
  0x20   : > { %v468_v58 = vrot.slane %v467_v51, 4  ;;  %v486_v59 = vrot.slane %v484_v52, 5  ;;  %v494_v61 = vshll.u32 %v4548_v46, 16  ;;  %v1401_v1 = vrot.slane %v4544_v39, 5  ;;  %v4612_v52 = vld [vmem:[%s4488_s13 + $0x40] sm:$0xf] }
  0x21   : > { %3757 = vmatprep.mubr.msk.bf16.mxu1 %vm860_vm3, %v3372_v53  ;;  %v463_v63 = vsel %vm4535_vm4, %v458_v54, %v462_v37  ;;  %v481_v0 = vor.u32 %v480_v56, %v477_v55  ;;  %v1404_v2 = vrot.slane %v4548_v46, 5  ;;  %v490_v11 = vrot.slane %v488_v60, 4  ;;  %s5726_s10 = smov (!%p361_p5, %s3369_s10), 63 }
  0x22   : > { %v473_v5 = vsel %vm4535_vm4, %v468_v58, %v472_v43  ;;  %v496_v12 = vrot.slane %v494_v61, 5  ;;  %v499_v13 = vshrl.u32 %v4558_v57, 16  ;;  %v502_v21 = vshll.u32 %v4558_v57, 16  ;;  %s3370_s14 = sshll.u32 %s5726_s10, 3 }
  0x23   : > { %v3373_v15 = vcombine.low %v463_v63, %v473_v5  ;;  %v482_v17 = vrot.slane %v481_v0, 4  ;;  %v508_v22 = vshll.u32 %v4563_v62, 16  ;;  %v491_v24 = vor.u32 %v490_v11, %v486_v59  ;;  %v4624_v5 = vld [vmem:[%s4488_s13 + $0x44] sm:$0x1]  ;;  %s5463_s19 = scalar_lea.vmem %s5643_s6, %s3370_s14 }
  0x24   : > { %v501_v25 = vrot.slane %v499_v13, 4  ;;  %v512_v26 = vshrl.u32 %v4563_v62, 16  ;;  %v518_v27 = vshll.u32 %v4571_v4, 16  ;;  %v504_v30 = vrot.slane %v502_v21, 5  ;;  %v4629_v13 = vld [vmem:[%s4488_s13 + $0x48] sm:$0xf] }
  0x25   : > { %3893 = vmatprep.mubr.msk.bf16.mxu0 %vm860_vm3, %v3373_v15  ;;  %3758 = vmatmul.mubr.msk.bf16.vlgmr.msra.gmra.mrb[0].mxu1 %vm860_vm3, %v3373_v15  ;;  %v487_v29 = vsel %vm4535_vm4, %v482_v17, %v486_v59  ;;  %v510_v31 = vrot.slane %v508_v22, 5  ;;  %v523_v35 = vshrl.u32 %v4577_v14, 16  ;;  %v492_v36 = vrot.slane %v491_v24, 4  ;;  %v4636_v24 = vld [vmem:[%s4488_s13 + $0x4c] sm:$0xf] }
  0x26   : > { %3790 = vmatpush3.bf16.msra.mxu1 %v4491_v6  ;;  %v514_v37 = vrot.slane %v512_v26, 4  ;;  %v520_v40 = vrot.slane %v518_v27, 5  ;;  %v526_v41 = vshll.u32 %v4577_v14, 16  ;;  %v505_v42 = vor.u32 %v504_v30, %v501_v25 }
  0x27   : > { %v525_v43 = vrot.slane %v523_v35, 4  ;;  %v532_v44 = vshll.u32 %v4589_v28, 16  ;;  %v536_v47 = vshrl.u32 %v4589_v28, 16  ;;  %4321 = vmatprep.subr.msk.bf16.mxu1 %vm909_vm0, %v4584_v23  ;;  %v497_v49 = vsel %vm4535_vm4, %v492_v36, %v496_v12 }
  0x28   : > { %v515_v6 = vor.u32 %v514_v37, %v510_v31  ;;  %v528_v50 = vrot.slane %v526_v41, 5  ;;  %v542_v51 = vshll.u32 %v4596_v32, 16  ;;  %v4614_v53 = vcombine.low %v487_v29, %v497_v49 }
  0x29   : > { %v506_v54 = vrot.slane %v505_v42, 4  ;;  %v534_v55 = vrot.slane %v532_v44, 5  ;;  %v538_v56 = vrot.slane %v536_v47, 4  ;;  %v547_v61 = vshrl.u32 %v4604_v48, 16  ;;  %v4658_v42 = vld [vmem:[%s4488_s13 + $0x54] sm:$0xf] }
  0x2a   : > { %5678 = vst [vmem:[#allocation3_spill] sm:$0xff] %v4614_v53  ;;  %v516_v58 = vrot.slane %v515_v6, 4  ;;  %v529_v59 = vor.u32 %v528_v50, %v525_v43  ;;  %v544_v60 = vrot.slane %v542_v51, 5  ;;  %3894 = vmatmul.mubr.msk.bf16.vlgmr.msra.gmra.mrb[0].mxu0 %vm860_vm3, %v4614_v53  ;;  %3761 = vmatprep.mubr.msk.bf16.mxu1 %vm860_vm3, %v4614_v53  ;;  %v550_v11 = vshll.u32 %v4604_v48, 16  ;;  %5680 = vst [vmem:[#allocation5_spill] sm:$0xff] %v4658_v42 }
  0x2b   : > { %v511_v63 = vsel %vm4535_vm4, %v506_v54, %v510_v31  ;;  %v539_v0 = vor.u32 %v538_v56, %v534_v55  ;;  %v556_v12 = vshll.u32 %v4612_v52, 16  ;;  %3926 = vmatpush3.bf16.msra.mxu0 %v4494_v7  ;;  %v549_v21 = vrot.slane %v547_v61, 4  ;;  %v4663_v6 = vld [vmem:[%s4488_s13 + $0x58] sm:$0xf] }
  0x2c   : > { %v521_v15 = vsel %vm4535_vm4, %v516_v58, %v520_v40  ;;  %v530_v17 = vrot.slane %v529_v59, 4  ;;  %v560_v22 = vshrl.u32 %v4612_v52, 16  ;;  %v552_v27 = vrot.slane %v550_v11, 5  ;;  %4326 = vmatprep.subr.msk.bf16.mxu0 %vm909_vm0, %v4499_v8  ;;  %v4653_v8 = vld [vmem:[%s4488_s13 + $0x50] sm:$0x1] }
  0x2d   : > { %v4638_v25 = vcombine.low %v511_v63, %v521_v15  ;;  %v540_v26 = vrot.slane %v539_v0, 4  ;;  %v558_v29 = vrot.slane %v556_v12, 5  ;;  %v566_v31 = vshll.u32 %v4624_v5, 16  ;;  %v4676_v11 = vld [vmem:[%s4488_s13 + $0x5c] sm:$0x1] }
  0x2e   : > { %v535_v7 = vsel %vm4535_vm4, %v530_v17, %v534_v55  ;;  %v562_v30 = vrot.slane %v560_v22, 4  ;;  %v571_v35 = vshrl.u32 %v4629_v13, 16  ;;  %v553_v37 = vor.u32 %v552_v27, %v549_v21  ;;  %v4680_v15 = vld [vmem:[%s4488_s13 + $0x60] sm:$0xf]  ;;  %v4685_v27 = vld [vmem:[%s4488_s13 + $0x64] sm:$0xf] }
  0x2f   : > { %5679 = vst [vmem:[#allocation4_spill] sm:$0xff] %v4638_v25  ;;  %3897 = vmatprep.mubr.msk.bf16.mxu0 %vm860_vm3, %v4638_v25  ;;  %3762 = vmatmul.mubr.msk.bf16.gmra.mrb[4].mxu1 %vm860_vm3, %v4638_v25  ;;  %v545_v36 = vsel %vm4535_vm4, %v540_v26, %v544_v60  ;;  %v574_v40 = vshll.u32 %v4629_v13, 16  ;;  %v580_v41 = vshll.u32 %v4636_v24, 16  ;;  %v568_v47 = vrot.slane %v566_v31, 5  ;;  %v4897_v25 = vld [vmem:[%s4488_s13 + $0xa8] sm:$0xf] }
  0x30   : > { %v4660_v43 = vcombine.low %v535_v7, %v545_v36  ;;  %v563_v44 = vor.u32 %v562_v30, %v558_v29  ;;  %v573_v49 = vrot.slane %v571_v35, 4  ;;  %v554_v50 = vrot.slane %v553_v37, 4 }
  0x31   : > { %v576_v51 = vrot.slane %v574_v40, 5  ;;  %v582_v54 = vrot.slane %v580_v41, 5  ;;  %v584_v55 = vshrl.u32 %v4636_v24, 16  ;;  %v590_v58 = vshll.u32 %v4653_v8, 16 }
  0x32   : > { %5681 = vst [vmem:[#allocation6_spill] sm:$0xff] %v4660_v43  ;;  %3765 = vmatprep.mubr.msk.bf16.mxu1 %vm860_vm3, %v4660_v43  ;;  %v564_v56 = vrot.slane %v563_v44, 4  ;;  %v595_v59 = vshrl.u32 %v4658_v42, 16  ;;  %v598_v60 = vshll.u32 %v4658_v42, 16  ;;  %3898 = vmatmul.mubr.msk.bf16.gmra.mrb[4].mxu0 %vm860_vm3, %v4660_v43  ;;  %v559_v61 = vsel %vm4535_vm4, %v554_v50, %v558_v29 }
  0x33   : > { %v577_v63 = vor.u32 %v576_v51, %v573_v49  ;;  %v586_v0 = vrot.slane %v584_v55, 4  ;;  %v604_v12 = vshll.u32 %v4663_v6, 16  ;;  %v592_v21 = vrot.slane %v590_v58, 5 }
  0x34   : > { %v569_v17 = vsel %vm4535_vm4, %v564_v56, %v568_v47  ;;  %v597_v22 = vrot.slane %v595_v59, 4  ;;  %v600_v26 = vrot.slane %v598_v60, 5  ;;  %v608_v36 = vshrl.u32 %v4663_v6, 16  ;;  %v4699_v47 = vld [vmem:[%s4488_s13 + $0x68] sm:$0x1] }
  0x35   : > { %v4687_v7 = vcombine.low %v559_v61, %v569_v17  ;;  %v578_v29 = vrot.slane %v577_v63, 4  ;;  %v587_v30 = vor.u32 %v586_v0, %v582_v54  ;;  %v606_v31 = vrot.slane %v604_v12, 5 }
  0x36   : > { %v601_v35 = vor.u32 %v600_v26, %v597_v22  ;;  %v614_v37 = vshll.u32 %v4676_v11, 16  ;;  %v619_v40 = vshrl.u32 %v4680_v15, 16  ;;  %v622_v49 = vshll.u32 %v4680_v15, 16 }
  0x37   : > { %5682 = vst [vmem:[#allocation7_spill] sm:$0xff] %v4687_v7  ;;  %3901 = vmatprep.mubr.msk.bf16.mxu0 %vm860_vm3, %v4687_v7  ;;  %3766 = vmatmul.mubr.msk.bf16.gmra.mrb[8].mxu1 %vm860_vm3, %v4687_v7  ;;  %v583_v41 = vsel %vm4535_vm4, %v578_v29, %v582_v54  ;;  %v588_v44 = vrot.slane %v587_v30, 4  ;;  %v628_v50 = vshll.u32 %v4685_v27, 16  ;;  %v610_v55 = vrot.slane %v608_v36, 4  ;;  %v4707_v54 = vld [vmem:[%s4488_s13 + $0x6c] sm:$0xf] }
  0x38   : > { %v602_v51 = vrot.slane %v601_v35, 4  ;;  %v616_v56 = vrot.slane %v614_v37, 5  ;;  %v621_v58 = vrot.slane %v619_v40, 4  ;;  %v624_v60 = vrot.slane %v622_v49, 5  ;;  %v4723_v36 = vld [vmem:[%s4488_s13 + $0x70] sm:$0xf] }
  0x39   : > { %v593_v59 = vsel %vm4535_vm4, %v588_v44, %v592_v21  ;;  %v630_v61 = vrot.slane %v628_v50, 5  ;;  %v632_v63 = vshrl.u32 %v4685_v27, 16  ;;  %v611_v17 = vor.u32 %v610_v55, %v606_v31  ;;  %v4874_v7 = vld [vmem:[%s4488_s13 + $0xa0] sm:$0xf] }
  0x3a   : > { %v4709_v0 = vcombine.low %v583_v41, %v593_v59  ;;  %v607_v12 = vsel %vm4535_vm4, %v602_v51, %v606_v31  ;;  %v638_v22 = vshll.u32 %v4699_v47, 16  ;;  %v625_v21 = vor.u32 %v624_v60, %v621_v58  ;;  %v4736_v51 = vld [vmem:[%s4488_s13 + $0x74] sm:$0x1] }
  0x3b   : > { %v634_v29 = vrot.slane %v632_v63, 4  ;;  %v3437_v30 = vrot.slane %v4513_v16, 9  ;;  %v1394_v35 = vrot.slane %v4516_v18, 5  ;;  %v612_v31 = vrot.slane %v611_v17, 4 }
  0x3c   : > { %5683 = vst [vmem:[#allocation8_spill] sm:$0xff] %v4709_v0  ;;  %3902 = vmatmul.mubr.msk.bf16.gmra.mrb[8].mxu0 %vm860_vm3, %v4709_v0  ;;  %3769 = vmatprep.mubr.msk.bf16.mxu1 %vm860_vm3, %v4709_v0  ;;  %v640_v37 = vrot.slane %v638_v22, 5  ;;  %v643_v40 = vshrl.u32 %v4707_v54, 16  ;;  %v646_v41 = vshll.u32 %v4707_v54, 16  ;;  %v626_v44 = vrot.slane %v625_v21, 4 }
  0x3d   : > { %v635_v49 = vor.u32 %v634_v29, %v630_v61  ;;  %v1395_v16 = vsel %vm4716_vm7, %v3437_v30, %v1394_v35  ;;  %v1396_v18 = vrot.slane %v1394_v35, 4  ;;  %v617_v50 = vsel %vm4535_vm4, %v612_v31, %v616_v56  ;;  %v4748_v56 = vld [vmem:[%s4488_s13 + $0x78] sm:$0xf]  ;;  %v4764_v31 = vld [vmem:[%s4488_s13 + $0x7c] sm:$0xf] }
  0x3e   : > { %v645_v55 = vrot.slane %v643_v40, 4  ;;  %v648_v58 = vrot.slane %v646_v41, 5  ;;  %v652_v59 = vshll.u32 %v4723_v36, 16  ;;  %v4739_v60 = vcombine.low %v607_v12, %v617_v50 }
  0x3f   : > { %v631_v63 = vsel %vm4535_vm4, %v626_v44, %v630_v61  ;;  %v636_v17 = vrot.slane %v635_v49, 4  ;;  %v1398_v22 = vsel %vm4716_vm7, %v1396_v18, %v1397_v45  ;;  %v656_v35 = vshrl.u32 %v4723_v36, 16  ;;  %v4769_v49 = vld [vmem:[%s4488_s13 + $0x80] sm:$0x1] }
  0x40   : > { %5686 = vst [vmem:[#allocation9_spill] sm:$0xff] %v4739_v60  ;;  %v4750_v21 = vcombine.low %v1395_v16, %v1398_v22  ;;  %v649_v29 = vor.u32 %v648_v58, %v645_v55  ;;  %v654_v30 = vrot.slane %v652_v59, 5  ;;  %3905 = vmatprep.mubr.msk.bf16.mxu0 %vm860_vm3, %v4739_v60  ;;  %3770 = vmatmul.mubr.msk.bf16.gmra.mrb[12].mxu1 %vm860_vm3, %v4739_v60  ;;  %v662_v45 = vshll.u32 %v4736_v51, 16  ;;  %v4867_v60 = vld [vmem:[%s4488_s13 + $0x9c] sm:$0xf] }
  0x41   : > { %v641_v19 = vsel %vm4535_vm4, %v636_v17, %v640_v37  ;;  %v3438_v61 = vrot.slane %v4531_v33, 9  ;;  %v1403_v12 = vrot.slane %v1401_v1, 4  ;;  %v658_v44 = vrot.slane %v656_v35, 4 }
  0x42   : > { %5687 = vst [vmem:[#allocation10_spill] sm:$0xff] %v4750_v21  ;;  %v4766_v40 = vcombine.low %v631_v63, %v641_v19  ;;  %v650_v41 = vrot.slane %v649_v29, 4  ;;  %v667_v16 = vshrl.u32 %v4748_v56, 16  ;;  %v664_v18 = vrot.slane %v662_v45, 5  ;;  %v4795_v29 = vld [vmem:[%s4488_s13 + $0x84] sm:$0xf] }
  0x43   : > { %v1402_v37 = vsel %vm4716_vm7, %v3438_v61, %v1401_v1  ;;  %v1405_v50 = vsel %vm4716_vm7, %v1403_v12, %v1404_v2  ;;  %v670_v55 = vshll.u32 %v4748_v56, 16  ;;  %v659_v59 = vor.u32 %v658_v44, %v654_v30 }
  0x44   : > { %5688 = vst [vmem:[#allocation11_spill] sm:$0xff] %v4766_v40  ;;  %3906 = vmatmul.mubr.msk.bf16.gmra.mrb[12].mxu0 %vm860_vm3, %v4766_v40  ;;  %3773 = vmatprep.mubr.msk.bf16.mxu1 %vm860_vm3, %v4766_v40  ;;  %v655_v58 = vsel %vm4535_vm4, %v650_v41, %v654_v30  ;;  %v4787_v63 = vcombine.low %v1402_v37, %v1405_v50  ;;  %v669_v1 = vrot.slane %v667_v16, 4  ;;  %v676_v2 = vshll.u32 %v4764_v31, 16  ;;  %v4801_v16 = vld [vmem:[%s4488_s13 + $0x88] sm:$0xf] }
  0x45   : > { %3927 = vmatprep.mubr.msk.bf16.mxu0 %vm860_vm3, %v4750_v21  ;;  %v672_v46 = vrot.slane %v670_v55, 5  ;;  %v680_v17 = vshrl.u32 %v4764_v31, 16  ;;  %v686_v22 = vshll.u32 %v4769_v49, 16  ;;  %v660_v35 = vrot.slane %v659_v59, 4 }
  0x46   : > { %5689 = vst [vmem:[#allocation12_spill] sm:$0xff] %v4787_v63  ;;  %v3439_v30 = vrot.slane %v4558_v57, 9  ;;  %v1408_v19 = vrot.slane %v4563_v62, 5  ;;  %v1411_v45 = vrot.slane %v4571_v4, 5  ;;  %v678_v12 = vrot.slane %v676_v2, 5 }
  0x47   : > { %v673_v61 = vor.u32 %v672_v46, %v669_v1  ;;  %v682_v41 = vrot.slane %v680_v17, 4  ;;  %v688_v44 = vrot.slane %v686_v22, 5  ;;  %v665_v37 = vsel %vm4535_vm4, %v660_v35, %v664_v18  ;;  %v4811_v1 = vld [vmem:[%s4488_s13 + $0x8c] sm:$0x1] }
  0x48   : > { %v1409_v50 = vsel %vm4716_vm7, %v3439_v30, %v1408_v19  ;;  %v1410_v55 = vrot.slane %v1408_v19, 4  ;;  %v691_v59 = vshrl.u32 %v4795_v29, 16  ;;  %v4808_v3 = vcombine.low %v655_v58, %v665_v37 }
  0x49   : > { %v674_v40 = vrot.slane %v673_v61, 4  ;;  %v683_v4 = vor.u32 %v682_v41, %v678_v12  ;;  %v694_v46 = vshll.u32 %v4795_v29, 16  ;;  %v700_v18 = vshll.u32 %v4801_v16, 16  ;;  %v4825_v61 = vld [vmem:[%s4488_s13 + $0x90] sm:$0xf] }
  0x4a   : > { %5690 = vst [vmem:[#allocation13_spill] sm:$0xff] %v4808_v3  ;;  %v1412_v2 = vsel %vm4716_vm7, %v1410_v55, %v1411_v45  ;;  %v693_v17 = vrot.slane %v691_v59, 4  ;;  %v704_v22 = vshrl.u32 %v4801_v16, 16  ;;  %3774 = vmatmul.mubr.msk.bf16.gmra.mrb[16].mxu1 %vm860_vm3, %v4808_v3  ;;  %v4830_v45 = vld [vmem:[%s5639_s2 + $0x1c] sm:$0xf]  ;;  %v1415_v59 = vrot.slane %v4589_v28, 5 }
  0x4b   : > { %v679_v58 = vsel %vm4535_vm4, %v674_v40, %v678_v12  ;;  %v684_v35 = vrot.slane %v683_v4, 4  ;;  %v4822_v30 = vcombine.low %v1409_v50, %v1412_v2  ;;  %v696_v19 = vrot.slane %v694_v46, 5  ;;  %5692 = vst [vmem:[#allocation15_spill] sm:$0xff] %v4830_v45  ;;  %v4844_v46 = vld [vmem:[%s4488_s13 + $0x94] sm:$0xf] }
  0x4c   : > { %3928 = vmatmul.mubr.msk.bf16.vlgmr.msra.gmra.mrb[0].mxu0 %vm860_vm3, %v4787_v63  ;;  %v702_v41 = vrot.slane %v700_v18, 5  ;;  %v706_v37 = vrot.slane %v704_v22, 4  ;;  %v710_v40 = vshll.u32 %v4811_v1, 16  ;;  %v3440_v12 = vrot.slane %v4577_v14, 9  ;;  %v4849_v3 = vld [vmem:[%s4488_s13 + $0x98] sm:$0x1] }
  0x4d   : > { %5691 = vst [vmem:[#allocation14_spill] sm:$0xff] %v4822_v30  ;;  %3960 = vmatpush3.bf16.msra.mxu0 %v4523_v20  ;;  %v689_v50 = vsel %vm4535_vm4, %v684_v35, %v688_v44  ;;  %3931 = vmatprep.mubr.msk.bf16.mxu0 %vm860_vm3, %v4822_v30  ;;  %v697_v55 = vor.u32 %v696_v19, %v693_v17  ;;  %v1418_v4 = vrot.slane %v4596_v32, 5  ;;  %v715_v20 = vshrl.u32 %v4825_v61, 16 }
  0x4e   : > { %v4846_v2 = vcombine.low %v679_v58, %v689_v50  ;;  %v707_v18 = vor.u32 %v706_v37, %v702_v41  ;;  %v712_v22 = vrot.slane %v710_v40, 5  ;;  %4327 = vmatprep.subr.msk.bf16.mxu0 %vm909_vm0, %v4830_v45  ;;  %v1416_v17 = vsel %vm4716_vm7, %v3440_v12, %v1415_v59 }
  0x4f   : > { %v698_v44 = vrot.slane %v697_v55, 4  ;;  %v1417_v35 = vrot.slane %v1415_v59, 4  ;;  %v718_v32 = vshll.u32 %v4825_v61, 16  ;;  %v717_v19 = vrot.slane %v715_v20, 4 }
  0x50   : > { %5693 = vst [vmem:[#allocation16_spill] sm:$0xff] %v4846_v2  ;;  %3777 = vmatprep.mubr.msk.bf16.mxu1 %vm860_vm3, %v4846_v2  ;;  %v708_v58 = vrot.slane %v707_v18, 4  ;;  %v724_v37 = vshll.u32 %v4844_v46, 16  ;;  %v728_v40 = vshrl.u32 %v4844_v46, 16  ;;  %v734_v59 = vshll.u32 %v4849_v3, 16 }
  0x51   : > { %v703_v50 = vsel %vm4535_vm4, %v698_v44, %v702_v41  ;;  %v1419_v55 = vsel %vm4716_vm7, %v1417_v35, %v1418_v4  ;;  %v720_v12 = vrot.slane %v718_v32, 5  ;;  %v3441_v4 = vrot.slane %v4604_v48, 9 }
  0x52   : > { %v713_v2 = vsel %vm4535_vm4, %v708_v58, %v712_v22  ;;  %v4871_v18 = vcombine.low %v1416_v17, %v1419_v55  ;;  %v726_v20 = vrot.slane %v724_v37, 5  ;;  %v730_v0 = vrot.slane %v728_v40, 4  ;;  %v4887_v58 = vld [vmem:[%s4488_s13 + $0xa4] sm:$0x1] }
  0x53   : > { %v4876_v43 = vcombine.low %v703_v50, %v713_v2  ;;  %v721_v41 = vor.u32 %v720_v12, %v717_v19  ;;  %v736_v44 = vrot.slane %v734_v59, 5  ;;  %v1422_v32 = vrot.slane %v4612_v52, 5 }
  0x54   : > { %5694 = vst [vmem:[#allocation17_spill] sm:$0xff] %v4871_v18  ;;  %3932 = vmatmul.mubr.msk.bf16.gmra.mrb[4].mxu0 %vm860_vm3, %v4871_v18  ;;  %v731_v35 = vor.u32 %v730_v0, %v726_v20  ;;  %v1425_v22 = vrot.slane %v4624_v5, 5  ;;  %v739_v17 = vshrl.u32 %v4867_v60, 16  ;;  %v742_v19 = vshll.u32 %v4867_v60, 16 }
  0x55   : > { %5695 = vst [vmem:[#allocation18_spill] sm:$0xff] %v4876_v43  ;;  %3778 = vmatmul.mubr.msk.bf16.gmra.mrb[20].mxu1 %vm860_vm3, %v4876_v43  ;;  %v722_v2 = vrot.slane %v721_v41, 4  ;;  %v748_v37 = vshll.u32 %v4874_v7, 16  ;;  %v752_v0 = vshrl.u32 %v4874_v7, 16  ;;  %v1423_v5 = vsel %vm4716_vm7, %v3441_v4, %v1422_v32 }
  0x56   : > { %v732_v40 = vrot.slane %v731_v35, 4  ;;  %v1424_v50 = vrot.slane %v1422_v32, 4  ;;  %v741_v55 = vrot.slane %v739_v17, 4  ;;  %v744_v59 = vrot.slane %v742_v19, 5  ;;  %v4906_v32 = vld [vmem:[%s4488_s13 + $0xac] sm:$0xf] }
  0x57   : > { %v727_v12 = vsel %vm4535_vm4, %v722_v2, %v726_v20  ;;  %v750_v41 = vrot.slane %v748_v37, 5  ;;  %v754_v43 = vrot.slane %v752_v0, 4  ;;  %v758_v35 = vshll.u32 %v4887_v58, 16 }
  0x58   : > { %v737_v53 = vsel %vm4535_vm4, %v732_v40, %v736_v44  ;;  %v1426_v18 = vsel %vm4716_vm7, %v1424_v50, %v1425_v22  ;;  %v3442_v4 = vrot.slane %v4629_v13, 9  ;;  %v745_v2 = vor.u32 %v744_v59, %v741_v55 }
  0x59   : > { %v4908_v17 = vcombine.low %v727_v12, %v737_v53  ;;  %v4910_v20 = vcombine.low %v1423_v5, %v1426_v18  ;;  %v755_v19 = vor.u32 %v754_v43, %v750_v41  ;;  %v760_v37 = vrot.slane %v758_v35, 5  ;;  %v4920_v18 = vld [vmem:[%s4488_s13 + $0xb0] sm:$0x1] }
  0x5a   : > { %v1429_v0 = vrot.slane %v4636_v24, 5  ;;  %v1432_v44 = vrot.slane %v4653_v8, 5  ;;  %v763_v22 = vshrl.u32 %v4897_v25, 16  ;;  %v746_v53 = vrot.slane %v745_v2, 4 }
  0x5b   : > { %5696 = vst [vmem:[#allocation19_spill] sm:$0xff] %v4908_v17  ;;  %5697 = vst [vmem:[#allocation20_spill] sm:$0xff] %v4910_v20  ;;  %3781 = vmatprep.mubr.msk.bf16.mxu1 %vm860_vm3, %v4908_v17  ;;  %3935 = vmatprep.mubr.msk.bf16.mxu0 %vm860_vm3, %v4910_v20  ;;  %v756_v40 = vrot.slane %v755_v19, 4  ;;  %v766_v43 = vshll.u32 %v4897_v25, 16  ;;  %v772_v5 = vshll.u32 %v4906_v32, 16  ;;  %v776_v12 = vshrl.u32 %v4906_v32, 16 }
  0x5c   : > { %v1430_v8 = vsel %vm4716_vm7, %v3442_v4, %v1429_v0  ;;  %v1431_v50 = vrot.slane %v1429_v0, 4  ;;  %v765_v55 = vrot.slane %v763_v22, 4  ;;  %v751_v59 = vsel %vm4535_vm4, %v746_v53, %v750_v41  ;;  %v4932_v17 = vld [vmem:[%s4488_s13 + $0xb4] sm:$0xf]  ;;  %v4944_v53 = vld [vmem:[%s4488_s13 + $0xb8] sm:$0xf] }
  0x5d   : > { %v761_v35 = vsel %vm4535_vm4, %v756_v40, %v760_v37  ;;  %v768_v2 = vrot.slane %v766_v43, 5  ;;  %v774_v19 = vrot.slane %v772_v5, 5  ;;  %v778_v0 = vrot.slane %v776_v12, 4 }
  0x5e   : > { %v4934_v20 = vcombine.low %v751_v59, %v761_v35  ;;  %v1433_v4 = vsel %vm4716_vm7, %v1431_v50, %v1432_v44  ;;  %v782_v22 = vshll.u32 %v4920_v18, 16  ;;  %v3443_v41 = vrot.slane %v4658_v42, 9  ;;  %v4950_v44 = vld [vmem:[%s4488_s13 + $0xbc] sm:$0x1] }
  0x5f   : > { %v4939_v30 = vcombine.low %v1430_v8, %v1433_v4  ;;  %v769_v63 = vor.u32 %v768_v2, %v765_v55  ;;  %v1436_v37 = vrot.slane %v4663_v6, 5  ;;  %v779_v40 = vor.u32 %v778_v0, %v774_v19 }
  0x60   : > { %5698 = vst [vmem:[#allocation21_spill] sm:$0xff] %v4934_v20  ;;  %3782 = vmatmul.mubr.msk.bf16.gmra.mrb[24].mxu1 %vm860_vm3, %v4934_v20  ;;  %v784_v43 = vrot.slane %v782_v22, 5  ;;  %v1439_v5 = vrot.slane %v4676_v11, 5  ;;  %v787_v50 = vshrl.u32 %v4932_v17, 16  ;;  %v790_v59 = vshll.u32 %v4932_v17, 16 }
  0x61   : > { %5699 = vst [vmem:[#allocation22_spill] sm:$0xff] %v4939_v30  ;;  %3936 = vmatmul.mubr.msk.bf16.gmra.mrb[8].mxu0 %vm860_vm3, %v4939_v30  ;;  %v770_v8 = vrot.slane %v769_v63, 4  ;;  %v1437_v55 = vsel %vm4716_vm7, %v3443_v41, %v1436_v37  ;;  %v1438_v12 = vrot.slane %v1436_v37, 4  ;;  %v780_v35 = vrot.slane %v779_v40, 4 }
  0x62   : > { %v789_v2 = vrot.slane %v787_v50, 4  ;;  %v796_v4 = vshll.u32 %v4944_v53, 16  ;;  %v800_v11 = vshrl.u32 %v4944_v53, 16  ;;  %v792_v20 = vrot.slane %v790_v59, 5 }
  0x63   : > { %v775_v0 = vsel %vm4535_vm4, %v770_v8, %v774_v19  ;;  %v1440_v22 = vsel %vm4716_vm7, %v1438_v12, %v1439_v5  ;;  %v806_v63 = vshll.u32 %v4950_v44, 16  ;;  %v785_v41 = vsel %vm4535_vm4, %v780_v35, %v784_v43 }
  0x64   : > { %v4967_v37 = vcombine.low %v1437_v55, %v1440_v22  ;;  %v798_v40 = vrot.slane %v796_v4, 5  ;;  %v802_v50 = vrot.slane %v800_v11, 4  ;;  %v4969_v30 = vcombine.low %v775_v0, %v785_v41 }
  0x65   : > { %v793_v21 = vor.u32 %v792_v20, %v789_v2  ;;  %v808_v45 = vrot.slane %v806_v63, 5  ;;  %v3444_v42 = vrot.slane %v4680_v15, 9  ;;  %v1443_v5 = vrot.slane %v4685_v27, 5 }
  0x66   : > { %3939 = vmatprep.mubr.msk.bf16.mxu0 %vm860_vm3, %v4967_v37  ;;  %v803_v19 = vor.u32 %v802_v50, %v798_v40  ;;  %v1446_v8 = vrot.slane %v4699_v47, 5  ;;  %v3445_v43 = vrot.slane %v4707_v54, 9  ;;  %3785 = vmatprep.mubr.msk.bf16.mxu1 %vm860_vm3, %v4969_v30  ;;  %v3404_v20 = vcombine.low %v4502_v9, %v4505_v10 }
  0x67   : > { %v794_v55 = vrot.slane %v793_v21, 4  ;;  %v1450_v12 = vrot.slane %v4723_v36, 5  ;;  %v1453_v59 = vrot.slane %v4736_v51, 5  ;;  %v1444_v2 = vsel %vm4716_vm7, %v3444_v42, %v1443_v5 }
  0x68   : > { %v804_v35 = vrot.slane %v803_v19, 4  ;;  %v1445_v4 = vrot.slane %v1443_v5, 4  ;;  %v1457_v47 = vrot.slane %v4764_v31, 5  ;;  %v3446_v9 = vrot.slane %v4748_v56, 9 }
  0x69   : > { %v799_v11 = vsel %vm4535_vm4, %v794_v55, %v798_v40  ;;  %v1451_v21 = vsel %vm4716_vm7, %v3445_v43, %v1450_v12  ;;  %v1452_v0 = vrot.slane %v1450_v12, 4  ;;  %v1460_v42 = vrot.slane %v4769_v49, 5 }
  0x6a   : > { %v809_v10 = vsel %vm4535_vm4, %v804_v35, %v808_v45  ;;  %v1447_v51 = vsel %vm4716_vm7, %v1445_v4, %v1446_v8  ;;  %v1459_v22 = vrot.slane %v1457_v47, 4  ;;  %v3447_v19 = vrot.slane %v4795_v29, 9 }
  0x6b   : > { %v4996_v63 = vcombine.low %v799_v11, %v809_v10  ;;  %v4998_v41 = vcombine.low %v1444_v2, %v1447_v51  ;;  %v1454_v40 = vsel %vm4716_vm7, %v1452_v0, %v1453_v59  ;;  %v1464_v5 = vrot.slane %v4801_v16, 5 }
  0x6c   : > { %v5002_v50 = vcombine.low %v1451_v21, %v1454_v40  ;;  %v1467_v49 = vrot.slane %v4811_v1, 5  ;;  %v1458_v45 = vsel %vm4716_vm7, %v3446_v9, %v1457_v47  ;;  %v1461_v8 = vsel %vm4716_vm7, %v1459_v22, %v1460_v42 }
  0x6d   : > { %3786 = vmatmul.mubr.msk.bf16.gmra.mrb[28].mxu1 %vm860_vm3, %v4996_v63  ;;  %3940 = vmatmul.mubr.msk.bf16.gmra.mrb[12].mxu0 %vm860_vm3, %v4998_v41  ;;  %v1466_v43 = vrot.slane %v1464_v5, 4  ;;  %v1471_v55 = vrot.slane %v4844_v46, 5  ;;  %v1478_v12 = vrot.slane %v4874_v7, 5  ;;  %v1465_v59 = vsel %vm4716_vm7, %v3447_v19, %v1464_v5 }
  0x6e   : > { %3791 = vmatprep.mubr.msk.bf16.mxu1 %vm860_vm3, %v3404_v20  ;;  %3943 = vmatprep.mubr.msk.bf16.mxu0 %vm860_vm3, %v5002_v50  ;;  %v5024_v20 = vcombine.low %v1458_v45, %v1461_v8  ;;  %v3448_v35 = vrot.slane %v4825_v61, 9  ;;  %v1474_v4 = vrot.slane %v4849_v3, 5  ;;  %v5030_v47 = vcombine.low %v4531_v33, %v4544_v39  ;;  %v5042_v3 = vld [vmem:[%s5639_s2 + $0xc] sm:$0xf] }
  0x6f   : > { %v1468_v1 = vsel %vm4716_vm7, %v1466_v43, %v1467_v49  ;;  %v1473_v2 = vrot.slane %v1471_v55, 4  ;;  %v3449_v11 = vrot.slane %v4867_v60, 9  ;;  %v1596_v21 = vsel %vm909_vm0, %v4584_v23, 0 }
  0x70   : > { %v5035_v0 = vcombine.low %v1465_v59, %v1468_v1  ;;  %v1480_v9 = vrot.slane %v1478_v12, 4  ;;  %v1481_v10 = vrot.slane %v4887_v58, 5  ;;  %v1485_v51 = vrot.slane %v4906_v32, 5 }
  0x71   : > { %v1472_v33 = vsel %vm4716_vm7, %v3448_v35, %v1471_v55  ;;  %v1475_v39 = vsel %vm4716_vm7, %v1473_v2, %v1474_v4  ;;  %v5058_v23 = vcombine.low %v4558_v57, %v4563_v62  ;;  %v1479_v58 = vsel %vm4716_vm7, %v3449_v11, %v1478_v12 }
  0x72   : > { %v5064_v22 = vcombine.low %v4680_v15, %v4685_v27  ;;  %v1482_v42 = vsel %vm4716_vm7, %v1480_v9, %v1481_v10  ;;  %v3450_v40 = vrot.slane %v4897_v25, 9  ;;  %v1492_v19 = vrot.slane %v4944_v53, 5 }
  0x73   : > { %v5074_v57 = vcombine.low %v4707_v54, %v4723_v36  ;;  %v5078_v62 = vcombine.low %v1472_v33, %v1475_v39  ;;  %v1487_v15 = vrot.slane %v1485_v51, 4  ;;  %v1488_v27 = vrot.slane %v4920_v18, 5 }
  0x74   : > { %v5088_v5 = vcombine.low %v4748_v56, %v4764_v31  ;;  %v5092_v54 = vcombine.low %v4795_v29, %v4801_v16  ;;  %v5096_v36 = vcombine.low %v4825_v61, %v4844_v46  ;;  %v5100_v18 = vcombine.low %v4867_v60, %v4874_v7  ;;  %v5119_v61 = vld [vmem:[%s5084_s29 + $0x4] sm:$0xf] }
  0x75   : > { %3792 = vmatmul.mubr.msk.bf16.vlgmr.msra.gmra.mrb[0].mxu1 %vm860_vm3, %v4541_v38  ;;  %3944 = vmatmul.mubr.msk.bf16.gmra.mrb[16].mxu0 %vm860_vm3, %v5024_v20  ;;  %v5104_v49 = vcombine.low %v4897_v25, %v4906_v32  ;;  %v5108_v56 = vcombine.low %v4577_v14, %v4589_v28  ;;  %v5110_v31 = vcombine.low %v1479_v58, %v1482_v42  ;;  %v3451_v16 = vrot.slane %v4932_v17, 9  ;;  %v5700_v42 = vld [vmem:[#allocation5_spill] sm:$0xff] }
  0x76   : > { %3824 = vmatpush3.bf16.msra.mxu1 %v1596_v21  ;;  %3795 = vmatprep.mubr.msk.bf16.mxu1 %vm860_vm3, %v5030_v47  ;;  %v5114_v29 = vcombine.low %v4932_v17, %v4944_v53  ;;  %v1494_v7 = vrot.slane %v1492_v19, 4  ;;  %v1495_v60 = vrot.slane %v4950_v44, 5  ;;  %v1486_v14 = vsel %vm4716_vm7, %v3450_v40, %v1485_v51  ;;  %v5139_v17 = vld [vmem:[%s5084_s29] sm:$0xf]  ;;  %v418_v53 = vld [vmem:[%s5084_s29 + $0x8] sm:$0x1] }
  0x77   : > { %3947 = vmatprep.mubr.msk.bf16.mxu0 %vm860_vm3, %v5035_v0  ;;  %4322 = vmatprep.subr.msk.bf16.mxu1 %vm909_vm0, %v5042_v3  ;;  %v1489_v28 = vsel %vm4716_vm7, %v1487_v15, %v1488_v27  ;;  %v2228_v25 = vrot.slane %v5119_v61, 5  ;;  %v1493_v46 = vsel %vm4716_vm7, %v3451_v16, %v1492_v19  ;;  %v5144_v44 = vcombine.low %v4604_v48, %v4612_v52 }
  0x78   : > { %v1496_v32 = vsel %vm4716_vm7, %v1494_v7, %v1495_v60  ;;  %v5146_v45 = vcombine.low %v1486_v14, %v1489_v28  ;;  %v5150_v8 = vcombine.low %v4629_v13, %v4636_v24  ;;  %v1998_v43 = vshrl.u32 %v5139_v17, 16  ;;  %v3577_v60 = vld [vmem:[%s5639_s2 + $0x20] sm:$0xf]  ;;  %v4374_v14 = vld [vmem:[%s4488_s13 + $0x4] sm:$0xf] }
  0x79   : > { %v2001_v55 = vshll.u32 %v5139_v17, 16  ;;  %v2007_v12 = vshll.u32 %v5119_v61, 16  ;;  %v2011_v59 = vshrl.u32 %v5119_v61, 16  ;;  %v5156_v1 = vcombine.low %v1493_v46, %v1496_v32  ;;  %v4376_v32 = vld [vmem:[%s4488_s13] sm:$0xf] }
  0x7a   : > { %v3521_v35 = vrot.slane %v5139_v17, 9  ;;  %v2230_v48 = vrot.slane %v2228_v25, 4  ;;  %v2231_v52 = vrot.slane %v418_v53, 5  ;;  %v2000_v2 = vrot.slane %v1998_v43, 4 }
  0x7b   : > { %v2003_v4 = vrot.slane %v2001_v55, 5  ;;  %v2009_v11 = vrot.slane %v2007_v12, 5  ;;  %v2013_v21 = vrot.slane %v2011_v59, 4  ;;  %v2017_v9 = vshll.u32 %v418_v53, 16 }
  0x7c   : > { %v2229_v10 = vsel %vm4716_vm7, %v3521_v35, %v2228_v25  ;;  %v2232_v51 = vsel %vm4716_vm7, %v2230_v48, %v2231_v52  ;;  %v5173_v40 = vcombine.low %v5700_v42, %v4663_v6  ;;  %v5701_v6 = vld [vmem:[#allocation15_spill] sm:$0xff]  ;;  %v1387_v28 = vrot.slane %v4374_v14, 5  ;;  %v5702_v48 = vld [vmem:[#allocation10_spill] sm:$0xff]  ;;  %v5703_v52 = vld [vmem:[#allocation12_spill] sm:$0xff] }
  0x7d   : > { %3796 = vmatmul.mubr.msk.bf16.gmra.mrb[4].mxu1 %vm860_vm3, %v5058_v23  ;;  %3948 = vmatmul.mubr.msk.bf16.gmra.mrb[20].mxu0 %vm860_vm3, %v5078_v62  ;;  %v2004_v13 = vor.u32 %v2003_v4, %v2000_v2  ;;  %v2014_v24 = vor.u32 %v2013_v21, %v2009_v11  ;;  %v2019_v58 = vrot.slane %v2017_v9, 5  ;;  %v5175_v19 = vcombine.low %v2229_v10, %v2232_v51  ;;  %v4375_v25 = vld [vmem:[%s4488_s13 + $0x8] sm:$0x1]  ;;  %v4377_v2 = vld [vmem:[%s5639_s2 + $0x10] sm:$0xf]  ;;  %v5705_v4 = vld [vmem:[#allocation17_spill] sm:$0xff] }
  0x7e   : > { %3799 = vmatprep.mubr.msk.bf16.mxu1 %vm860_vm3, %v5108_v56  ;;  %3951 = vmatprep.mubr.msk.bf16.mxu0 %vm860_vm3, %v5110_v31  ;;  %v2676_v7 = vsel %vm909_vm0, %v5701_v6, 0  ;;  %v1390_v46 = vrot.slane %v4375_v25, 5  ;;  %v3436_v53 = vrot.slane %v4376_v32, 9  ;;  %v1389_v43 = vrot.slane %v1387_v28, 4  ;;  %v5706_v21 = vld [vmem:[#allocation20_spill] sm:$0xff]  ;;  %v5713_v42 = vld [vmem:[#allocation9_spill] sm:$0xff] }
  0x7f   : > { %v2005_v33 = vrot.slane %v2004_v13, 4  ;;  %v2015_v39 = vrot.slane %v2014_v24, 4  ;;  %v1802_v35 = vsel %vm909_vm0, %v5042_v3, 0  ;;  %v5704_v3 = vld [vmem:[#allocation14_spill] sm:$0xff]  ;;  %v5270_v24 = vld [vmem:[%s5084_s29 + $0xc] sm:$0xf] }
  0x80   : > { %v1388_v55 = vsel %vm4716_vm7, %v3436_v53, %v1387_v28  ;;  %v1391_v12 = vsel %vm4716_vm7, %v1389_v43, %v1390_v46  ;;  %v5707_v13 = vld [vmem:[#allocation22_spill] sm:$0xff]  ;;  %v5273_v9 = vld [vmem:[%s5084_s29 + $0x10] sm:$0xf]  ;;  %v2888_v10 = vsel %vm909_vm0, %v3577_v60, 0  ;;  %v2647_v14 = vshll.u32 %v5270_v24, 16  ;;  %v5719_v46 = vld [vmem:[#allocation19_spill] sm:$0xff] }
  0x81   : > { %v2010_v15 = vsel %vm4535_vm4, %v2005_v33, %v2009_v11  ;;  %v2020_v27 = vsel %vm4535_vm4, %v2015_v39, %v2019_v58  ;;  %v3453_v59 = vcombine.low %v1388_v55, %v1391_v12  ;;  %v5259_v11 = vcombine.low %v5139_v17, %v5119_v61  ;;  %v5708_v17 = vld [vmem:[#allocation3_spill] sm:$0xff]  ;;  %v5709_v51 = vld [vmem:[#allocation4_spill] sm:$0xff]  ;;  %v5710_v33 = vld [vmem:[#allocation6_spill] sm:$0xff] }
  0x82   : > { %v5181_v16 = vcombine.low %v2010_v15, %v2020_v27  ;;  %v3541_v61 = vcombine.low %v5270_v24, %v5273_v9  ;;  %v5711_v39 = vld [vmem:[#allocation7_spill] sm:$0xff]  ;;  %v5712_v58 = vld [vmem:[#allocation8_spill] sm:$0xff]  ;;  %v5715_v27 = vld [vmem:[#allocation13_spill] sm:$0xff]  ;;  %v2657_v28 = vshrl.u32 %v5273_v9, 16  ;;  %v2649_v32 = vrot.slane %v2647_v14, 5 }
  0x83   : > { %v5714_v15 = vld [vmem:[#allocation11_spill] sm:$0xff]  ;;  %v5716_v6 = vld [vmem:[#allocation16_spill] sm:$0xff]  ;;  %v5718_v25 = vld [vmem:[#allocation2_spill] sm:$0xff]  ;;  %v2874_v34 = vrot.slane %v5273_v9, 5 }
  0x84   : > { %v2659_v43 = vrot.slane %v2657_v28, 4  ;;  %v421_v55 = vld [vmem:[%s5084_s29 + $0x14] sm:$0x1]  ;;  %v5720_v12 = vld [vmem:[#allocation21_spill] sm:$0xff] }
  0x85   : > { %3800 = vmatmul.mubr.msk.bf16.gmra.mrb[8].mxu1 %vm860_vm3, %v5144_v44  ;;  %3952 = vmatmul.mubr.msk.bf16.gmra.mrb[24].mxu0 %vm860_vm3, %v5146_v45 }
  0x86   : > { %3803 = vmatprep.mubr.msk.bf16.mxu1 %vm860_vm3, %v5150_v8  ;;  %3955 = vmatprep.mubr.msk.bf16.mxu0 %vm860_vm3, %v5156_v1 }
  0x8d   : > { %3804 = vmatmul.mubr.msk.bf16.gmra.mrb[12].mxu1 %vm860_vm3, %v5173_v40  ;;  %3956 = vmatmul.mubr.msk.bf16.gmra.mrb[28].mxu0 %vm860_vm3, %v5175_v19 }
  0x8e   : > { %3807 = vmatprep.mubr.msk.bf16.mxu1 %vm860_vm3, %v5064_v22  ;;  %3961 = vmatprep.mubr.msk.bf16.mxu0 %vm860_vm3, %v5030_v47 }
  0x95   : > { %3808 = vmatmul.mubr.msk.bf16.gmra.mrb[16].mxu1 %vm860_vm3, %v5074_v57  ;;  %3962 = vmatmul.mubr.msk.bf16.vlgmr.msra.gmra.mrb[0].mxu0 %vm860_vm3, %v5058_v23 }
  0x96   : > { %3994 = vmatpush3.bf16.msra.mxu0 %v2676_v7  ;;  %3811 = vmatprep.mubr.msk.bf16.mxu1 %vm860_vm3, %v5088_v5  ;;  %v5717_v7 = vld [vmem:[#allocation18_spill] sm:$0xff] }
  0x97   : > { %3965 = vmatprep.mubr.msk.bf16.mxu0 %vm860_vm3, %v5108_v56  ;;  %4328 = vmatprep.subr.msk.bf16.mxu0 %vm909_vm0, %v3577_v60  ;;  %v2644_v60 = vshrl.u32 %v5270_v24, 16 }
  0x9d   : > { %3812 = vmatmul.mubr.msk.bf16.gmra.mrb[20].mxu1 %vm860_vm3, %v5092_v54  ;;  %3966 = vmatmul.mubr.msk.bf16.gmra.mrb[4].mxu0 %vm860_vm3, %v5144_v44 }
  0x9e   : > { %3815 = vmatprep.mubr.msk.bf16.mxu1 %vm860_vm3, %v5096_v36  ;;  %3969 = vmatprep.mubr.msk.bf16.mxu0 %vm860_vm3, %v5150_v8 }
  0xa5   : > { %3816 = vmatmul.mubr.msk.bf16.gmra.mrb[24].mxu1 %vm860_vm3, %v5100_v18  ;;  %3970 = vmatmul.mubr.msk.bf16.gmra.mrb[8].mxu0 %vm860_vm3, %v5173_v40 }
  0xa6   : > { %3819 = vmatprep.mubr.msk.bf16.mxu1 %vm860_vm3, %v5104_v49  ;;  %3973 = vmatprep.mubr.msk.bf16.mxu0 %vm860_vm3, %v5064_v22 }
  0xad   : > { %3820 = vmatmul.mubr.msk.bf16.gmra.mrb[28].mxu1 %vm860_vm3, %v5114_v29  ;;  %3974 = vmatmul.mubr.msk.bf16.gmra.mrb[12].mxu0 %vm860_vm3, %v5074_v57 }
  0xae   : > { %3825 = vmatprep.mubr.msk.bf16.mxu1 %vm860_vm3, %v3453_v59  ;;  %3977 = vmatprep.mubr.msk.bf16.mxu0 %vm860_vm3, %v5088_v5 }
  0xb5   : > { %3826 = vmatmul.mubr.msk.bf16.vlgmr.msra.gmra.mrb[0].mxu1 %vm860_vm3, %v5702_v48  ;;  %3978 = vmatmul.mubr.msk.bf16.gmra.mrb[16].mxu0 %vm860_vm3, %v5092_v54 }
  0xb6   : > { %3858 = vmatpush3.bf16.msra.mxu1 %v1802_v35  ;;  %3829 = vmatprep.mubr.msk.bf16.mxu1 %vm860_vm3, %v5703_v52  ;;  %v2663_v35 = vshll.u32 %v421_v55, 16 }
  0xb7   : > { %3981 = vmatprep.mubr.msk.bf16.mxu0 %vm860_vm3, %v5096_v36  ;;  %4324 = vmatprep.subr.msk.bf16.mxu1 %vm909_vm0, %v4377_v2 }
  0xbd   : > { %3830 = vmatmul.mubr.msk.bf16.gmra.mrb[4].mxu1 %vm860_vm3, %v5704_v3  ;;  %3982 = vmatmul.mubr.msk.bf16.gmra.mrb[20].mxu0 %vm860_vm3, %v5100_v18 }
  0xbe   : > { %3833 = vmatprep.mubr.msk.bf16.mxu1 %vm860_vm3, %v5705_v4  ;;  %3985 = vmatprep.mubr.msk.bf16.mxu0 %vm860_vm3, %v5104_v49 }
  0xc5   : > { %3834 = vmatmul.mubr.msk.bf16.gmra.mrb[8].mxu1 %vm860_vm3, %v5706_v21  ;;  %3986 = vmatmul.mubr.msk.bf16.gmra.mrb[24].mxu0 %vm860_vm3, %v5114_v29 }
  0xc6   : > { %3837 = vmatprep.mubr.msk.bf16.mxu1 %vm860_vm3, %v5707_v13  ;;  %3989 = vmatprep.mubr.msk.bf16.mxu0 %vm860_vm3, %v5259_v11 }
  0xcd   : > { %3838 = vmatmul.mubr.msk.bf16.gmra.mrb[12].mxu1 %vm860_vm3, %v4967_v37  ;;  %3990 = vmatmul.mubr.msk.bf16.gmra.mrb[28].mxu0 %vm860_vm3, %v3541_v61  ;;  %v2665_v61 = vrot.slane %v2663_v35, 5 }
  0xce   : > { %3841 = vmatprep.mubr.msk.bf16.mxu1 %vm860_vm3, %v4998_v41  ;;  %3995 = vmatprep.mubr.msk.bf16.mxu0 %vm860_vm3, %v5708_v17 }
  0xd5   : > { %3842 = vmatmul.mubr.msk.bf16.gmra.mrb[16].mxu1 %vm860_vm3, %v5002_v50  ;;  %3996 = vmatmul.mubr.msk.bf16.vlgmr.msra.gmra.mrb[0].mxu0 %vm860_vm3, %v5709_v51 }
  0xd6   : > { %4028 = vmatpush3.bf16.msra.mxu0 %v2888_v10  ;;  %3845 = vmatprep.mubr.msk.bf16.mxu1 %vm860_vm3, %v5024_v20 }
  0xd7   : > { %3999 = vmatprep.mubr.msk.bf16.mxu0 %vm860_vm3, %v5710_v33 }
  0xdd   : > { %3846 = vmatmul.mubr.msk.bf16.gmra.mrb[20].mxu1 %vm860_vm3, %v5035_v0  ;;  %4000 = vmatmul.mubr.msk.bf16.gmra.mrb[4].mxu0 %vm860_vm3, %v5711_v39 }
  0xde   : > { %3849 = vmatprep.mubr.msk.bf16.mxu1 %vm860_vm3, %v5078_v62  ;;  %4003 = vmatprep.mubr.msk.bf16.mxu0 %vm860_vm3, %v5712_v58  ;;  %v5456_v58 = vld [vmem:[%s5642_s5] ss:$0 sm:$0xff] }
  0xe5   : > { %3850 = vmatmul.mubr.msk.bf16.gmra.mrb[24].mxu1 %vm860_vm3, %v5110_v31  ;;  %4004 = vmatmul.mubr.msk.bf16.gmra.mrb[8].mxu0 %vm860_vm3, %v5713_v42 }
  0xe6   : > { %3853 = vmatprep.mubr.msk.bf16.mxu1 %vm860_vm3, %v5146_v45  ;;  %4007 = vmatprep.mubr.msk.bf16.mxu0 %vm860_vm3, %v5714_v15 }
  0xed   : > { %3854 = vmatmul.mubr.msk.bf16.gmra.mrb[28].mxu1 %vm860_vm3, %v5156_v1  ;;  %4008 = vmatmul.mubr.msk.bf16.gmra.mrb[12].mxu0 %vm860_vm3, %v5715_v27 }
  0xee   : > { %3859 = vmatprep.mubr.msk.bf16.mxu1 %vm860_vm3, %v4541_v38  ;;  %4011 = vmatprep.mubr.msk.bf16.mxu0 %vm860_vm3, %v5716_v6  ;;  %v2653_v38 = vshll.u32 %v5273_v9, 16  ;;  %v5449_v9 = vld [vmem:[%s5641_s4] ss:$0 sm:$0xff] }
  0xf0   : > { %v2655_v53 = vrot.slane %v2653_v38, 5 }
  0xf2   : > { %v2660_v59 = vor.u32 %v2659_v43, %v2655_v53 }
  0xf4   : > { %v2661_v2 = vrot.slane %v2660_v59, 4 }
  0xf5   : > { %3860 = vmatmul.mubr.msk.bf16.vlgmr.msra.gmra.mrb[0].mxu1 %vm860_vm3, %v5030_v47  ;;  %4012 = vmatmul.mubr.msk.bf16.gmra.mrb[16].mxu0 %vm860_vm3, %v5717_v7  ;;  %v2646_v47 = vrot.slane %v2644_v60, 4 }
  0xf6   : > { %4062 = vmatpush3.bf16.msra.mxu1 %v5718_v25  ;;  %3863 = vmatprep.mubr.msk.bf16.mxu1 %vm860_vm3, %v5058_v23 }
  0xf7   : > { %4015 = vmatprep.mubr.msk.bf16.mxu0 %vm860_vm3, %v5719_v46  ;;  %v2650_v23 = vor.u32 %v2649_v32, %v2646_v47 }
  0xf9   : > { %v2651_v48 = vrot.slane %v2650_v23, 4 }
  0xfd   : > { %3864 = vmatmul.mubr.msk.bf16.gmra.mrb[4].mxu1 %vm860_vm3, %v5108_v56  ;;  %4016 = vmatmul.mubr.msk.bf16.gmra.mrb[20].mxu0 %vm860_vm3, %v5720_v12  ;;  %v2656_v56 = vsel %vm4535_vm4, %v2651_v48, %v2655_v53 }
  0xfe   : > { %3867 = vmatprep.mubr.msk.bf16.mxu1 %vm860_vm3, %v5144_v44  ;;  %4019 = vmatprep.mubr.msk.bf16.mxu0 %vm860_vm3, %v4969_v30  ;;  %v2666_v44 = vsel %vm4535_vm4, %v2661_v2, %v2665_v61 }
  0xff   : > { %v3559_v17 = vcombine.low %v2656_v56, %v2666_v44 }
 0x105   : > { %3868 = vmatmul.mubr.msk.bf16.gmra.mrb[8].mxu1 %vm860_vm3, %v5150_v8  ;;  %4020 = vmatmul.mubr.msk.bf16.gmra.mrb[24].mxu0 %vm860_vm3, %v4996_v63 }
 0x106   : > { %3871 = vmatprep.mubr.msk.bf16.mxu1 %vm860_vm3, %v5173_v40  ;;  %4023 = vmatprep.mubr.msk.bf16.mxu0 %vm860_vm3, %v5181_v16 }
 0x10d   : > { %3872 = vmatmul.mubr.msk.bf16.gmra.mrb[12].mxu1 %vm860_vm3, %v5064_v22  ;;  %4024 = vmatmul.mubr.msk.bf16.gmra.mrb[28].mxu0 %vm860_vm3, %v3559_v17 }
 0x10e   : > { %3875 = vmatprep.mubr.msk.bf16.mxu1 %vm860_vm3, %v5074_v57  ;;  %4029 = vmatprep.mubr.msk.bf16.mxu0 %vm860_vm3, %v5703_v52 }
 0x115   : > { %3876 = vmatmul.mubr.msk.bf16.gmra.mrb[16].mxu1 %vm860_vm3, %v5088_v5  ;;  %4030 = vmatmul.mubr.msk.bf16.vlgmr.msra.gmra.mrb[0].mxu0 %vm860_vm3, %v5704_v3 }
 0x116   : > { %3879 = vmatprep.mubr.msk.bf16.mxu1 %vm860_vm3, %v5092_v54  ;;  %4033 = vmatprep.mubr.msk.bf16.mxu0 %vm860_vm3, %v5705_v4 }
 0x11d   : > { %3880 = vmatmul.mubr.msk.bf16.gmra.mrb[20].mxu1 %vm860_vm3, %v5096_v36  ;;  %4034 = vmatmul.mubr.msk.bf16.gmra.mrb[4].mxu0 %vm860_vm3, %v5706_v21 }
 0x11e   : > { %3883 = vmatprep.mubr.msk.bf16.mxu1 %vm860_vm3, %v5100_v18  ;;  %4037 = vmatprep.mubr.msk.bf16.mxu0 %vm860_vm3, %v5707_v13 }
 0x125   : > { %3884 = vmatmul.mubr.msk.bf16.gmra.mrb[24].mxu1 %vm860_vm3, %v5104_v49  ;;  %4038 = vmatmul.mubr.msk.bf16.gmra.mrb[8].mxu0 %vm860_vm3, %v4967_v37  ;;  %v3576_v37 = vrot.slane %v5270_v24, 9 }
 0x126   : > { %3887 = vmatprep.mubr.msk.bf16.mxu1 %vm860_vm3, %v5114_v29  ;;  %4041 = vmatprep.mubr.msk.bf16.mxu0 %vm860_vm3, %v4998_v41  ;;  %v2876_v41 = vrot.slane %v2874_v34, 4 }
 0x12d   : > { %3888 = vmatmul.mubr.msk.bf16.gmra.mrb[28].mxu1 %vm860_vm3, %v5259_v11  ;;  %4042 = vmatmul.mubr.msk.bf16.gmra.mrb[12].mxu0 %vm860_vm3, %v5002_v50  ;;  %v2877_v50 = vrot.slane %v421_v55, 5 }
 0x12e   : > { %3909 = vmatprep.mubr.msk.bf16.mxu1 %vm860_vm3, %v5715_v27  ;;  %4045 = vmatprep.mubr.msk.bf16.mxu0 %vm860_vm3, %v5024_v20  ;;  %v2875_v20 = vsel %vm4716_vm7, %v3576_v37, %v2874_v34 }
 0x135   : > { %3910 = vmatmul.mubr.msk.bf16.vlgmr.msra.gmra.mrb[16].mxu1 %vm860_vm3, %v5716_v6  ;;  %4046 = vmatmul.mubr.msk.bf16.gmra.mrb[16].mxu0 %vm860_vm3, %v5035_v0  ;;  %v2878_v0 = vsel %vm4716_vm7, %v2876_v41, %v2877_v50 }
 0x136   : > { %3913 = vmatprep.mubr.msk.bf16.mxu1 %vm860_vm3, %v5717_v7  ;;  %4049 = vmatprep.mubr.msk.bf16.mxu0 %vm860_vm3, %v5078_v62  ;;  %v3578_v22 = vcombine.low %v2875_v20, %v2878_v0 }
 0x13d   : > { %3914 = vmatmul.mubr.msk.bf16.gmra.mrb[20].mxu1 %vm860_vm3, %v5719_v46  ;;  %4050 = vmatmul.mubr.msk.bf16.gmra.mrb[20].mxu0 %vm860_vm3, %v5110_v31 }
 0x13e   : > { %3917 = vmatprep.mubr.msk.bf16.mxu1 %vm860_vm3, %v5720_v12  ;;  %4053 = vmatprep.mubr.msk.bf16.mxu0 %vm860_vm3, %v5146_v45 }
 0x145   : > { %3918 = vmatmul.mubr.msk.bf16.gmra.mrb[24].mxu1 %vm860_vm3, %v4969_v30  ;;  %4054 = vmatmul.mubr.msk.bf16.gmra.mrb[24].mxu0 %vm860_vm3, %v5156_v1 }
 0x146   : > { %3921 = vmatprep.mubr.msk.bf16.mxu1 %vm860_vm3, %v4996_v63  ;;  %4057 = vmatprep.mubr.msk.bf16.mxu0 %vm860_vm3, %v5175_v19 }
 0x14d   : > { %3922 = vmatmul.mubr.msk.bf16.gmra.mrb[28].mxu1 %vm860_vm3, %v5181_v16  ;;  %4058 = vmatmul.mubr.msk.bf16.gmra.mrb[28].mxu0 %vm860_vm3, %v3578_v22  ;;  %v5443_v16 = vld [vmem:[%s5640_s3] ss:$0 sm:$0xff] }
 0x1c8   : > { %v3861_v30 = vpop.f32.mrb[0].mxu1 }
 0x1c9   : > { %v1838_v57 = vpop.f32.mrb[1].mxu1 }
 0x1ca   : > { %v3862_v62 = vpop.f32.mrb[2].mxu1 }
 0x1cb   : > { %v1841_v63 = vpop.f32.mrb[3].mxu1 }
 0x1d0   : > { %v3865_v5 = vpop.f32.mrb[4].mxu1 }
 0x1d1   : > { %v1854_v54 = vpop.f32.mrb[5].mxu1 }
 0x1d2   : > { %v3866_v36 = vpop.f32.mrb[6].mxu1 }
 0x1d3   : > { %v1857_v18 = vpop.f32.mrb[7].mxu1 }
 0x1d8   : > { %v5423_v49 = vpop.f32.mrb[8].mxu1 }
 0x1d9   : > { %v5425_v31 = vpop.f32.mrb[9].mxu1 }
 0x1da   : > { %v5427_v26 = vpop.f32.mrb[10].mxu1 }
 0x1db   : > { %v5429_v29 = vpop.f32.mrb[11].mxu1 }
 0x1e0   : > { %v5431_v45 = vpop.f32.mrb[12].mxu1 }
 0x1e1   : > { %v5433_v8 = vpop.f32.mrb[13].mxu1 }
 0x1e2   : > { %v5435_v1 = vpop.f32.mrb[14].mxu1 }
 0x1e3   : > { %v5438_v40 = vpop.f32.mrb[15].mxu1 }
 0x1e8   : > { %v4031_v19 = vpop.f32.mrb[0].mxu0 }
 0x1e9   : > { %v4063_v52 = vadd.f32 %v4031_v19, %v3861_v30  ;;  %v2924_v3 = vpop.f32.mrb[1].mxu0 }
 0x1ea   : > { %v4064_v4 = vadd.f32 %v2924_v3, %v1838_v57  ;;  %v4032_v11 = vpop.f32.mrb[2].mxu0 }
 0x1eb   : > { %v3092_v21 = vadd.f32 %v4063_v52, %v5443_v16  ;;  %v4065_v13 = vadd.f32 %v4032_v11, %v3862_v62  ;;  %v2927_v24 = vpop.f32.mrb[3].mxu0 }
 0x1ec   : > { %v3090_v10 = vadd.f32 %v4064_v4, %v5443_v16  ;;  %v4066_v51 = vadd.f32 %v2927_v24, %v1841_v63 }
 0x1ed   : > { %v3124_v33 = vmax.f32 %v3092_v21, 0.0  ;;  %v3093_v39 = vadd.f32 %v4065_v13, %v5443_v16 }
 0x1ee   : > { %v3122_v42 = vmax.f32 %v3090_v10, 0.0  ;;  %v3091_v15 = vadd.f32 %v4066_v51, %v5443_v16 }
 0x1ef   : > { %v3163_v27 = vmul.f32 %v5449_v9, %v3124_v33  ;;  %v3125_v6 = vmax.f32 %v3093_v39, 0.0 }
 0x1f0   : > { %v3161_v7 = vmul.f32 %v5449_v9, %v3122_v42  ;;  %v3123_v60 = vmax.f32 %v3091_v15, 0.0  ;;  %v4035_v14 = vpop.f32.mrb[4].mxu0 }
 0x1f1   : > { %v3202_v28 = vadd.f32 %v5456_v58, %v3163_v27  ;;  %v3164_v25 = vmul.f32 %v5449_v9, %v3125_v6  ;;  %v4067_v38 = vadd.f32 %v4035_v14, %v3865_v5  ;;  %v2940_v46 = vpop.f32.mrb[5].mxu0 }
 0x1f2   : > { %v3200_v47 = vadd.f32 %v5456_v58, %v3161_v7  ;;  %v3162_v32 = vmul.f32 %v5449_v9, %v3123_v60  ;;  %v4068_v53 = vadd.f32 %v2940_v46, %v1854_v54  ;;  %v4036_v43 = vpop.f32.mrb[6].mxu0 }
 0x1f3   : > { %3234 = vst.msk [vmem:[%s5463_s19 + $0x10] sm:$0xff] %vm860_vm3, %v3202_v28  ;;  %v3203_v55 = vadd.f32 %v5456_v58, %v3164_v25  ;;  %v3096_v12 = vadd.f32 %v4067_v38, %v5443_v16  ;;  %v4069_v23 = vadd.f32 %v4036_v43, %v3866_v36  ;;  %v2943_v59 = vpop.f32.mrb[7].mxu0 }
 0x1f4   : > { %3232 = vst.msk [vmem:[%s5463_s19] sm:$0xff] %vm860_vm3, %v3200_v47  ;;  %v3201_v35 = vadd.f32 %v5456_v58, %v3162_v32  ;;  %v3094_v48 = vadd.f32 %v4068_v53, %v5443_v16  ;;  %v4070_v2 = vadd.f32 %v2943_v59, %v1857_v18 }
 0x1f5   : > { %3235 = vst.msk [vmem:[%s5463_s19 + $0x18] sm:$0xff] %vm860_vm3, %v3203_v55  ;;  %v3128_v61 = vmax.f32 %v3096_v12, 0.0  ;;  %v3097_v56 = vadd.f32 %v4069_v23, %v5443_v16 }
 0x1f6   : > { %3233 = vst.msk [vmem:[%s5463_s19 + $0x8] sm:$0xff] %vm860_vm3, %v3201_v35  ;;  %v3126_v44 = vmax.f32 %v3094_v48, 0.0  ;;  %v3095_v17 = vadd.f32 %v4070_v2, %v5443_v16 }
 0x1f7   : > { %v3167_v34 = vmul.f32 %v5449_v9, %v3128_v61  ;;  %v3129_v37 = vmax.f32 %v3097_v56, 0.0 }
 0x1f8   : > { %v3165_v41 = vmul.f32 %v5449_v9, %v3126_v44  ;;  %v3127_v50 = vmax.f32 %v3095_v17, 0.0  ;;  %v4039_v20 = vpop.f32.mrb[8].mxu0 }
 0x1f9   : > { %v3206_v0 = vadd.f32 %v5456_v58, %v3167_v34  ;;  %v3168_v22 = vmul.f32 %v5449_v9, %v3129_v37  ;;  %v4071_v30 = vadd.f32 %v4039_v20, %v5423_v49  ;;  %v2956_v57 = vpop.f32.mrb[9].mxu0 }
 0x1fa   : > { %v3204_v62 = vadd.f32 %v5456_v58, %v3165_v41  ;;  %v3166_v63 = vmul.f32 %v5449_v9, %v3127_v50  ;;  %v4072_v5 = vadd.f32 %v2956_v57, %v5425_v31  ;;  %v4040_v54 = vpop.f32.mrb[10].mxu0 }
 0x1fb   : > { %3238 = vst.msk [vmem:[%s5463_s19 + $0x30] sm:$0xff] %vm860_vm3, %v3206_v0  ;;  %v3207_v36 = vadd.f32 %v5456_v58, %v3168_v22  ;;  %v3100_v18 = vadd.f32 %v4071_v30, %v5443_v16  ;;  %v4073_v19 = vadd.f32 %v4040_v54, %v5427_v26  ;;  %v2959_v52 = vpop.f32.mrb[11].mxu0 }
 0x1fc   : > { %3236 = vst.msk [vmem:[%s5463_s19 + $0x20] sm:$0xff] %vm860_vm3, %v3204_v62  ;;  %v3205_v49 = vadd.f32 %v5456_v58, %v3166_v63  ;;  %v3098_v3 = vadd.f32 %v4072_v5, %v5443_v16  ;;  %v4074_v4 = vadd.f32 %v2959_v52, %v5429_v29 }
 0x1fd   : > { %3239 = vst.msk [vmem:[%s5463_s19 + $0x38] sm:$0xff] %vm860_vm3, %v3207_v36  ;;  %v3132_v31 = vmax.f32 %v3100_v18, 0.0  ;;  %v3101_v11 = vadd.f32 %v4073_v19, %v5443_v16 }
 0x1fe   : > { %3237 = vst.msk [vmem:[%s5463_s19 + $0x28] sm:$0xff] %vm860_vm3, %v3205_v49  ;;  %v3130_v21 = vmax.f32 %v3098_v3, 0.0  ;;  %v3099_v26 = vadd.f32 %v4074_v4, %v5443_v16 }
 0x1ff   : > { %v3171_v13 = vmul.f32 %v5449_v9, %v3132_v31  ;;  %v3133_v24 = vmax.f32 %v3101_v11, 0.0 }
 0x200   : > { %v3169_v10 = vmul.f32 %v5449_v9, %v3130_v21  ;;  %v3131_v51 = vmax.f32 %v3099_v26, 0.0  ;;  %v4043_v33 = vpop.f32.mrb[12].mxu0 }
 0x201   : > { %v3210_v29 = vadd.f32 %v5456_v58, %v3171_v13  ;;  %v3172_v39 = vmul.f32 %v5449_v9, %v3133_v24  ;;  %v4075_v42 = vadd.f32 %v4043_v33, %v5431_v45  ;;  %v2972_v15 = vpop.f32.mrb[13].mxu0 }
 0x202   : > { %v3208_v27 = vadd.f32 %v5456_v58, %v3169_v10  ;;  %v3170_v6 = vmul.f32 %v5449_v9, %v3131_v51  ;;  %v4076_v7 = vadd.f32 %v2972_v15, %v5433_v8  ;;  %v4044_v60 = vpop.f32.mrb[14].mxu0 }
 0x203   : > { %3242 = vst.msk [vmem:[%s5463_s19 + $0x50] sm:$0xff] %vm860_vm3, %v3210_v29  ;;  %v3211_v14 = vadd.f32 %v5456_v58, %v3172_v39  ;;  %v3104_v28 = vadd.f32 %v4075_v42, %v5443_v16  ;;  %v4077_v25 = vadd.f32 %v4044_v60, %v5435_v1  ;;  %v2975_v38 = vpop.f32.mrb[15].mxu0 }
 0x204   : > { %3240 = vst.msk [vmem:[%s5463_s19 + $0x40] sm:$0xff] %vm860_vm3, %v3208_v27  ;;  %v3209_v45 = vadd.f32 %v5456_v58, %v3170_v6  ;;  %v3102_v46 = vadd.f32 %v4076_v7, %v5443_v16  ;;  %v4078_v47 = vadd.f32 %v2975_v38, %v5438_v40 }
 0x205   : > { %3243 = vst.msk [vmem:[%s5463_s19 + $0x58] sm:$0xff] %vm860_vm3, %v3211_v14  ;;  %v3136_v8 = vmax.f32 %v3104_v28, 0.0  ;;  %v3105_v32 = vadd.f32 %v4077_v25, %v5443_v16 }
 0x206   : > { %3241 = vst.msk [vmem:[%s5463_s19 + $0x48] sm:$0xff] %vm860_vm3, %v3209_v45  ;;  %v3134_v53 = vmax.f32 %v3102_v46, 0.0  ;;  %v3103_v43 = vadd.f32 %v4078_v47, %v5443_v16 }
 0x207   : > { %v3175_v1 = vmul.f32 %v5449_v9, %v3136_v8  ;;  %v3137_v55 = vmax.f32 %v3105_v32, 0.0 }
 0x208   : > { %v3173_v12 = vmul.f32 %v5449_v9, %v3134_v53  ;;  %v3135_v23 = vmax.f32 %v3103_v43, 0.0  ;;  %v3911_v59 = vpop.f32.mrb[16].mxu1  ;;  %v4047_v35 = vpop.f32.mrb[16].mxu0 }
 0x209   : > { %v3214_v40 = vadd.f32 %v5456_v58, %v3175_v1  ;;  %v3176_v48 = vmul.f32 %v5449_v9, %v3137_v55  ;;  %v4079_v2 = vadd.f32 %v4047_v35, %v3911_v59  ;;  %v2130_v61 = vpop.f32.mrb[17].mxu1  ;;  %v2988_v56 = vpop.f32.mrb[17].mxu0 }
 0x20a   : > { %v3212_v44 = vadd.f32 %v5456_v58, %v3173_v12  ;;  %v3174_v17 = vmul.f32 %v5449_v9, %v3135_v23  ;;  %v4080_v34 = vadd.f32 %v2988_v56, %v2130_v61  ;;  %v3912_v37 = vpop.f32.mrb[18].mxu1  ;;  %v4048_v41 = vpop.f32.mrb[18].mxu0 }
 0x20b   : > { %3246 = vst.msk [vmem:[%s5463_s19 + $0x70] sm:$0xff] %vm860_vm3, %v3214_v40  ;;  %v3215_v50 = vadd.f32 %v5456_v58, %v3176_v48  ;;  %v3108_v20 = vadd.f32 %v4079_v2, %v5443_v16  ;;  %v4081_v0 = vadd.f32 %v4048_v41, %v3912_v37  ;;  %v2133_v22 = vpop.f32.mrb[19].mxu1  ;;  %v2991_v30 = vpop.f32.mrb[19].mxu0 }
 0x20c   : > { %3244 = vst.msk [vmem:[%s5463_s19 + $0x60] sm:$0xff] %vm860_vm3, %v3212_v44  ;;  %v3213_v57 = vadd.f32 %v5456_v58, %v3174_v17  ;;  %v3106_v62 = vadd.f32 %v4080_v34, %v5443_v16  ;;  %v4082_v63 = vadd.f32 %v2991_v30, %v2133_v22 }
 0x20d   : > { %3247 = vst.msk [vmem:[%s5463_s19 + $0x78] sm:$0xff] %vm860_vm3, %v3215_v50  ;;  %v3140_v5 = vmax.f32 %v3108_v20, 0.0  ;;  %v3109_v54 = vadd.f32 %v4081_v0, %v5443_v16 }
 0x20e   : > { %3245 = vst.msk [vmem:[%s5463_s19 + $0x68] sm:$0xff] %vm860_vm3, %v3213_v57  ;;  %v3138_v36 = vmax.f32 %v3106_v62, 0.0  ;;  %v3107_v18 = vadd.f32 %v4082_v63, %v5443_v16 }
 0x20f   : > { %v3179_v19 = vmul.f32 %v5449_v9, %v3140_v5  ;;  %v3141_v52 = vmax.f32 %v3109_v54, 0.0 }
 0x210   : > { %v3177_v49 = vmul.f32 %v5449_v9, %v3138_v36  ;;  %v3139_v3 = vmax.f32 %v3107_v18, 0.0  ;;  %v3915_v4 = vpop.f32.mrb[20].mxu1  ;;  %v4051_v31 = vpop.f32.mrb[20].mxu0 }
 0x211   : > { %v3218_v11 = vadd.f32 %v5456_v58, %v3179_v19  ;;  %v3180_v21 = vmul.f32 %v5449_v9, %v3141_v52  ;;  %v4083_v26 = vadd.f32 %v4051_v31, %v3915_v4  ;;  %v2146_v13 = vpop.f32.mrb[21].mxu1  ;;  %v3004_v24 = vpop.f32.mrb[21].mxu0 }
 0x212   : > { %v3216_v10 = vadd.f32 %v5456_v58, %v3177_v49  ;;  %v3178_v51 = vmul.f32 %v5449_v9, %v3139_v3  ;;  %v4084_v33 = vadd.f32 %v3004_v24, %v2146_v13  ;;  %v3916_v29 = vpop.f32.mrb[22].mxu1  ;;  %v4052_v39 = vpop.f32.mrb[22].mxu0 }
 0x213   : > { %3250 = vst.msk [vmem:[%s5463_s19 + $0x90] sm:$0xff] %vm860_vm3, %v3218_v11  ;;  %v3219_v42 = vadd.f32 %v5456_v58, %v3180_v21  ;;  %v3112_v15 = vadd.f32 %v4083_v26, %v5443_v16  ;;  %v4085_v27 = vadd.f32 %v4052_v39, %v3916_v29  ;;  %v2149_v6 = vpop.f32.mrb[23].mxu1  ;;  %v3007_v7 = vpop.f32.mrb[23].mxu0 }
 0x214   : > { %3248 = vst.msk [vmem:[%s5463_s19 + $0x80] sm:$0xff] %vm860_vm3, %v3216_v10  ;;  %v3217_v60 = vadd.f32 %v5456_v58, %v3178_v51  ;;  %v3110_v14 = vadd.f32 %v4084_v33, %v5443_v16  ;;  %v4086_v28 = vadd.f32 %v3007_v7, %v2149_v6 }
 0x215   : > { %3251 = vst.msk [vmem:[%s5463_s19 + $0x98] sm:$0xff] %vm860_vm3, %v3219_v42  ;;  %v3144_v25 = vmax.f32 %v3112_v15, 0.0  ;;  %v3113_v38 = vadd.f32 %v4085_v27, %v5443_v16 }
 0x216   : > { %3249 = vst.msk [vmem:[%s5463_s19 + $0x88] sm:$0xff] %vm860_vm3, %v3217_v60  ;;  %v3142_v45 = vmax.f32 %v3110_v14, 0.0  ;;  %v3111_v46 = vadd.f32 %v4086_v28, %v5443_v16 }
 0x217   : > { %v3183_v47 = vmul.f32 %v5449_v9, %v3144_v25  ;;  %v3145_v8 = vmax.f32 %v3113_v38, 0.0 }
 0x218   : > { %v3181_v32 = vmul.f32 %v5449_v9, %v3142_v45  ;;  %v3143_v53 = vmax.f32 %v3111_v46, 0.0  ;;  %v3919_v43 = vpop.f32.mrb[24].mxu1  ;;  %v4055_v1 = vpop.f32.mrb[24].mxu0 }
 0x219   : > { %v3222_v55 = vadd.f32 %v5456_v58, %v3183_v47  ;;  %v3184_v12 = vmul.f32 %v5449_v9, %v3145_v8  ;;  %v4087_v23 = vadd.f32 %v4055_v1, %v3919_v43  ;;  %v2162_v59 = vpop.f32.mrb[25].mxu1  ;;  %v3020_v35 = vpop.f32.mrb[25].mxu0 }
 0x21a   : > { %v3220_v40 = vadd.f32 %v5456_v58, %v3181_v32  ;;  %v3182_v48 = vmul.f32 %v5449_v9, %v3143_v53  ;;  %v4088_v2 = vadd.f32 %v3020_v35, %v2162_v59  ;;  %v3920_v61 = vpop.f32.mrb[26].mxu1  ;;  %v4056_v56 = vpop.f32.mrb[26].mxu0 }
 0x21b   : > { %3254 = vst.msk [vmem:[%s5463_s19 + $0xb0] sm:$0xff] %vm860_vm3, %v3222_v55  ;;  %v3223_v44 = vadd.f32 %v5456_v58, %v3184_v12  ;;  %v3116_v17 = vadd.f32 %v4087_v23, %v5443_v16  ;;  %v4089_v34 = vadd.f32 %v4056_v56, %v3920_v61  ;;  %v2165_v37 = vpop.f32.mrb[27].mxu1  ;;  %v3023_v41 = vpop.f32.mrb[27].mxu0 }
 0x21c   : > { %3252 = vst.msk [vmem:[%s5463_s19 + $0xa0] sm:$0xff] %vm860_vm3, %v3220_v40  ;;  %v3221_v50 = vadd.f32 %v5456_v58, %v3182_v48  ;;  %v3114_v20 = vadd.f32 %v4088_v2, %v5443_v16  ;;  %v4090_v0 = vadd.f32 %v3023_v41, %v2165_v37 }
 0x21d   : > { %3255 = vst.msk [vmem:[%s5463_s19 + $0xb8] sm:$0xff] %vm860_vm3, %v3223_v44  ;;  %v3148_v22 = vmax.f32 %v3116_v17, 0.0  ;;  %v3117_v30 = vadd.f32 %v4089_v34, %v5443_v16 }
 0x21e   : > { %3253 = vst.msk [vmem:[%s5463_s19 + $0xa8] sm:$0xff] %vm860_vm3, %v3221_v50  ;;  %v3146_v57 = vmax.f32 %v3114_v20, 0.0  ;;  %v3115_v62 = vadd.f32 %v4090_v0, %v5443_v16 }
 0x21f   : > { %v3187_v63 = vmul.f32 %v5449_v9, %v3148_v22  ;;  %v3149_v5 = vmax.f32 %v3117_v30, 0.0 }
 0x220   : > { %v3185_v54 = vmul.f32 %v5449_v9, %v3146_v57  ;;  %v3147_v36 = vmax.f32 %v3115_v62, 0.0  ;;  %v3923_v18 = vpop.f32.mrb[28].mxu1  ;;  %v4059_v19 = vpop.f32.mrb[28].mxu0 }
 0x221   : > { %v3226_v52 = vadd.f32 %v5456_v58, %v3187_v63  ;;  %v3188_v49 = vmul.f32 %v5449_v9, %v3149_v5  ;;  %v4091_v3 = vadd.f32 %v4059_v19, %v3923_v18  ;;  %v2178_v4 = vpop.f32.mrb[29].mxu1  ;;  %v3036_v31 = vpop.f32.mrb[29].mxu0 }
 0x222   : > { %v3224_v11 = vadd.f32 %v5456_v58, %v3185_v54  ;;  %v3186_v21 = vmul.f32 %v5449_v9, %v3147_v36  ;;  %v4092_v26 = vadd.f32 %v3036_v31, %v2178_v4  ;;  %v3924_v13 = vpop.f32.mrb[30].mxu1  ;;  %v4060_v24 = vpop.f32.mrb[30].mxu0 }
 0x223   : > { %3258 = vst.msk [vmem:[%s5463_s19 + $0xd0] sm:$0xff] %vm860_vm3, %v3226_v52  ;;  %v3227_v10 = vadd.f32 %v5456_v58, %v3188_v49  ;;  %v3120_v51 = vadd.f32 %v4091_v3, %v5443_v16  ;;  %v4093_v33 = vadd.f32 %v4060_v24, %v3924_v13  ;;  %v2181_v29 = vpop.f32.mrb[31].mxu1  ;;  %v3039_v39 = vpop.f32.mrb[31].mxu0 }
 0x224   : > { %3256 = vst.msk [vmem:[%s5463_s19 + $0xc0] sm:$0xff] %vm860_vm3, %v3224_v11  ;;  %v3225_v42 = vadd.f32 %v5456_v58, %v3186_v21  ;;  %v3118_v15 = vadd.f32 %v4092_v26, %v5443_v16  ;;  %v4094_v27 = vadd.f32 %v3039_v39, %v2181_v29 }
 0x225   : > { %3259 = vst.msk [vmem:[%s5463_s19 + $0xd8] sm:$0xff] %vm860_vm3, %v3227_v10  ;;  %v3152_v6 = vmax.f32 %v3120_v51, 0.0  ;;  %v3121_v7 = vadd.f32 %v4093_v33, %v5443_v16 }
 0x226   : > { %3257 = vst.msk [vmem:[%s5463_s19 + $0xc8] sm:$0xff] %vm860_vm3, %v3225_v42  ;;  %v3150_v60 = vmax.f32 %v3118_v15, 0.0  ;;  %v3119_v14 = vadd.f32 %v4094_v27, %v5443_v16 }
 0x227   : > { %v3191_v28 = vmul.f32 %v5449_v9, %v3152_v6  ;;  %v3153_v25 = vmax.f32 %v3121_v7, 0.0 }
 0x228   : > { %v3189_v38 = vmul.f32 %v5449_v9, %v3150_v60  ;;  %v3151_v45 = vmax.f32 %v3119_v14, 0.0 }
 0x229   : > { %v3230_v46 = vadd.f32 %v5456_v58, %v3191_v28  ;;  %v3192_v47 = vmul.f32 %v5449_v9, %v3153_v25 }
 0x22a   : > { %v3228_v8 = vadd.f32 %v5456_v58, %v3189_v38  ;;  %v3190_v32 = vmul.f32 %v5449_v9, %v3151_v45 }
 0x22b   : > { %3262 = vst.msk [vmem:[%s5463_s19 + $0xf0] sm:$0xff] %vm860_vm3, %v3230_v46  ;;  %v3231_v53 = vadd.f32 %v5456_v58, %v3192_v47 }
 0x22c   : > { %3260 = vst.msk [vmem:[%s5463_s19 + $0xe0] sm:$0xff] %vm860_vm3, %v3228_v8  ;;  %v3229_v16 = vadd.f32 %v5456_v58, %v3190_v32 }
 0x22d   : > { %3263 = vst.msk [vmem:[%s5463_s19 + $0xf8] sm:$0xff] %vm860_vm3, %v3231_v53 }
 0x22e   : > { %3261 = vst.msk [vmem:[%s5463_s19 + $0xe8] sm:$0xff] %vm860_vm3, %v3229_v16 }
 0x22f PF: > { %s16_s23 = sadd.s32 1, %s4400_s23   ;;  %s5721_s21 = smov %s4396_s22 }
 0x230   : > { %p13_p6 = scmp.ge.s32.totalorder %s16_s23, 4   ;;  %s5722_s22 = smov %s5724_s24 }
 0x232   :  { %15 = sbr.rel (!%p13_p6) target bundleno = 2 (0x2), region = 85 }

</bundles_post_ra>
